<compile_context>
chip_gen: v7x
topology: tpu7x:2x2x1
jax: 0.10.0
libtpu: 0.0.40
codegen_flags: <defaults>
</compile_context>

<pallas_src>
import functools
import math

import jax
import jax.numpy as jnp
from jax.experimental import pallas as pl
from jax.experimental.pallas import tpu as pltpu


# ---------------------------------------------------------------------------
# Trace-time weight re-arrangement helpers (tiny glue outside the kernel).
# ---------------------------------------------------------------------------
def _band_matrix(w, w_in, w_out):
    """Banded matrix so that `unfold_rows(x) @ band == valid_conv(x, w)`.

    w: (Co, Ci, KH, KW).  Rows ordered (kh, ci, wi), columns (co, wo).
    """
    co_n, ci_n, kh_n, kw_n = w.shape
    wi = jnp.arange(w_in)[:, None]
    wo = jnp.arange(w_out)[None, :]
    kw = wi - wo                                      # (w_in, w_out)
    valid = (kw >= 0) & (kw < kw_n)
    g = w[:, :, :, jnp.clip(kw, 0, kw_n - 1)]         # (Co, Ci, KH, w_in, w_out)
    g = jnp.where(valid[None, None, None], g, 0.0)
    g = g.transpose(2, 1, 3, 0, 4)                    # (KH, Ci, w_in, Co, w_out)
    return g.reshape(kh_n * ci_n * w_in, co_n * w_out)


def _row_pool_sel(bt, h_in, h_out, parity):
    """Block-diagonal 0/1 row selection: (bt*h_out, bt*h_in)."""
    r = jnp.arange(bt * h_out)
    c = jnp.arange(bt * h_in)
    same_b = (r[:, None] // h_out) == (c[None, :] // h_in)
    hit = (c[None, :] % h_in) == (2 * (r[:, None] % h_out) + parity)
    return (same_b & hit).astype(jnp.float32)


def _col_pool_sel(ch, w_in, w_out, parity):
    """0/1 column selection: (ch*w_in, ch*w_out)."""
    n = jnp.arange(ch * w_in)
    m = jnp.arange(ch * w_out)
    same_c = (n[:, None] // w_in) == (m[None, :] // w_out)
    hit = (n[:, None] % w_in) == (2 * (m[None, :] % w_out) + parity)
    return (same_c & hit).astype(jnp.float32)


def _fc_perm_sel(bt, hp):
    """Row permutation (hp*bt, bt*hp): P[h*bt + b, b*hp + h] = 1."""
    r = jnp.arange(hp * bt)
    c = jnp.arange(bt * hp)
    return ((r[:, None] // bt == c[None, :] % hp) &
            (r[:, None] % bt == c[None, :] // hp)).astype(jnp.float32)


# ---------------------------------------------------------------------------
# Fused kernel: one batch tile per grid step.
# ---------------------------------------------------------------------------
def _stn_fused_kernel(x_ref, band1_ref, bias1_ref, s1re_ref, s1ro_ref,
                      s1ce_ref, s1co_ref, band2_ref, bias2_ref, s2re_ref,
                      s2ro_ref, s2ce_ref, s2co_ref, sperm_ref, fw1_ref,
                      fb1_ref, fw2_ref, fb2_ref, o_ref, x1_scr, x2_scr,
                      *, k1, k2, c1, nbr_stn, stack_input):
    bt, cin, H, W = x_ref.shape
    ho1, wo1 = H - k1 + 1, W - k1 + 1
    hp1, wp1 = ho1 // 2, wo1 // 2
    ho2, wo2 = hp1 - k2 + 1, wp1 - k2 + 1
    hp2 = ho2 // 2
    hd = fw1_ref.shape[2]
    f32 = jnp.float32

    # ---- conv1 (k=7): unfold into bf16 scratch (contiguous slab writes),
    #      then ONE 2D GEMM against the banded weight matrix -----------------
    for b in range(bt):
        for kh in range(k1):
            for ci in range(cin):
                t = kh * cin + ci
                x1_scr[b * ho1:(b + 1) * ho1, t * W:(t + 1) * W] = (
                    x_ref[b, ci, kh:kh + ho1, :].astype(jnp.bfloat16))
    y1 = jnp.dot(x1_scr[...], band1_ref[...], preferred_element_type=f32)
    y1 = y1 + bias1_ref[...]                          # (bt*ho1, c1*wo1)

    # ---- 2x2/2 max-pool + ReLU via exact 0/1 selection GEMMs ---------------
    rmax1 = jnp.maximum(
        jnp.dot(s1re_ref[...], y1, preferred_element_type=f32),
        jnp.dot(s1ro_ref[...], y1, preferred_element_type=f32))
    h1 = jnp.maximum(
        jnp.maximum(jnp.dot(rmax1, s1ce_ref[...], preferred_element_type=f32),
                    jnp.dot(rmax1, s1co_ref[...], preferred_element_type=f32)),
        0.0)                                          # (bt*hp1, c1*wp1)

    # ---- conv2 (k=5): same structure ---------------------------------------
    cw1 = c1 * wp1
    for b in range(bt):
        for kh in range(k2):
            x2_scr[b * ho2:(b + 1) * ho2, kh * cw1:(kh + 1) * cw1] = (
                h1[b * hp1 + kh:b * hp1 + kh + ho2, :].astype(jnp.bfloat16))
    y2 = jnp.dot(x2_scr[...], band2_ref[...], preferred_element_type=f32)
    y2 = y2 + bias2_ref[...]                          # (bt*ho2, c2*wo2)

    rmax2 = jnp.maximum(
        jnp.dot(s2re_ref[...], y2, preferred_element_type=f32),
        jnp.dot(s2ro_ref[...], y2, preferred_element_type=f32))
    h2 = jnp.maximum(
        jnp.maximum(jnp.dot(rmax2, s2ce_ref[...], preferred_element_type=f32),
                    jnp.dot(rmax2, s2co_ref[...], preferred_element_type=f32)),
        0.0)                                          # (bt*hp2, c2*wp2)

    # ---- fc_loc: Linear -> ReLU -> Linear (theta stays in registers) -------
    # Row-permute to (h-major, batch-minor) so each fc1 partial is a
    # contiguous (bt, c2*wp2) slab; fc1 weight columns were permuted to match.
    p = jnp.dot(sperm_ref[...], h2, preferred_element_type=f32)  # (hp2*bt, .)
    acc = jnp.zeros((bt, hd), f32)
    for h in range(hp2):
        acc = acc + jnp.dot(p[h * bt:(h + 1) * bt, :].astype(jnp.bfloat16),
                            fw1_ref[h], preferred_element_type=f32)
    hfc = jnp.maximum(acc + fb1_ref[...], 0.0)        # (bt, 128)
    theta = jnp.dot(hfc, fw2_ref[...], preferred_element_type=f32)
    theta = theta + fb2_ref[...]                      # (bt, 4*nbr_stn)

    # ---- affine_grid + grid_sample (bilinear, zeros pad, align_corners=False)
    # theta per STN = [a, tx, c, ty] -> [[a, 0, tx], [0, c, ty]]; the
    # hardwired zero off-diagonals make the separable row/col pass exact.
    x3 = x_ref[...].reshape(bt, cin * H, W)           # layout-free merge
    wo_i = jax.lax.broadcasted_iota(jnp.int32, (bt, W, W), 2).astype(f32)
    wi_i = jax.lax.broadcasted_iota(jnp.int32, (bt, W, W), 1).astype(f32)
    ho_i = jax.lax.broadcasted_iota(jnp.int32, (bt, H, H), 1).astype(f32)
    hi_i = jax.lax.broadcasted_iota(jnp.int32, (bt, H, H), 2).astype(f32)
    xb = (2.0 * wo_i + 1.0) / W - 1.0
    yb = (2.0 * ho_i + 1.0) / H - 1.0

    for i in range(nbr_stn):
        a = theta[:, 4 * i + 0:4 * i + 1].reshape(bt, 1, 1)
        tx = theta[:, 4 * i + 1:4 * i + 2].reshape(bt, 1, 1)
        c = theta[:, 4 * i + 2:4 * i + 3].reshape(bt, 1, 1)
        ty = theta[:, 4 * i + 3:4 * i + 4].reshape(bt, 1, 1)

        ix = ((a * xb + tx + 1.0) * W - 1.0) * 0.5    # varies along w_out
        iy = ((c * yb + ty + 1.0) * H - 1.0) * 0.5    # varies along h_out
        rxT = jnp.maximum(1.0 - jnp.abs(ix - wi_i), 0.0)   # (bt, w_in, w_out)
        ry = jnp.maximum(1.0 - jnp.abs(iy - hi_i), 0.0)    # (bt, h_out, h_in)

        # column pass batched over the tile, channels as a free matmul dim
        tmpw = jnp.einsum('bmw,bwv->bmv', x3, rxT,
                          preferred_element_type=f32)      # (bt, cin*H, W)
        for ch in range(cin):
            res = jnp.einsum('bij,bjv->biv', ry,
                             tmpw[:, ch * H:(ch + 1) * H, :],
                             preferred_element_type=f32)   # (bt, H, W)
            o_ref[:, i * cin + ch] = res.astype(o_ref.dtype)

    if stack_input:
        o_ref[:, nbr_stn * cin:] = x_ref[...].astype(o_ref.dtype)


# ---------------------------------------------------------------------------
# Forward pass (== STNbasedNet.forward)
# ---------------------------------------------------------------------------
def stn_based_net_forward(params, x, nbr_stn=2, stn_stack_input=True,
                          batch_tile=8):
    B, cin, H, W = x.shape
    w1, b1 = params["conv1_w"], params["conv1_b"]
    w2, b2 = params["conv2_w"], params["conv2_b"]
    c1, _, k1, _ = w1.shape
    c2, _, k2, _ = w2.shape

    ho1, wo1 = H - k1 + 1, W - k1 + 1
    hp1, wp1 = ho1 // 2, wo1 // 2
    ho2, wo2 = hp1 - k2 + 1, wp1 - k2 + 1
    hp2, wp2 = ho2 // 2, wo2 // 2

    bt = min(batch_tile, B)
    bp = ((B + bt - 1) // bt) * bt
    xf = x.astype(jnp.float32)
    if bp != B:
        xf = jnp.pad(xf, ((0, bp - B), (0, 0), (0, 0), (0, 0)))

    # Trace-time weight pre-arrangement (no per-activation traffic).
    band1 = _band_matrix(w1, W, wo1).astype(jnp.bfloat16)     # (k1*cin*W, c1*wo1)
    band2 = _band_matrix(w2, wp1, wo2).astype(jnp.bfloat16)   # (k2*c1*wp1, c2*wo2)
    bias1 = jnp.repeat(b1, wo1).reshape(1, c1 * wo1).astype(jnp.float32)
    bias2 = jnp.repeat(b2, wo2).reshape(1, c2 * wo2).astype(jnp.float32)

    s1re = _row_pool_sel(bt, ho1, hp1, 0)
    s1ro = _row_pool_sel(bt, ho1, hp1, 1)
    s1ce = _col_pool_sel(c1, wo1, wp1, 0)
    s1co = _col_pool_sel(c1, wo1, wp1, 1)
    s2re = _row_pool_sel(bt, ho2, hp2, 0)
    s2ro = _row_pool_sel(bt, ho2, hp2, 1)
    s2ce = _col_pool_sel(c2, wo2, wp2, 0)
    s2co = _col_pool_sel(c2, wo2, wp2, 1)
    sperm = _fc_perm_sel(bt, hp2)

    hd = params["fc1_w"].shape[0]
    # fc1 weight columns permuted to the kernel's (h, ci, w) feature order.
    fw1 = (params["fc1_w"].reshape(hd, c2, hp2, wp2)
           .transpose(2, 1, 3, 0)
           .reshape(hp2, c2 * wp2, hd)
           .astype(jnp.bfloat16))
    fb1 = params["fc1_b"].reshape(1, hd).astype(jnp.float32)
    fw2 = params["fc2_w"].T.astype(jnp.float32)               # (hd, 4*nbr_stn)
    fb2 = params["fc2_b"].reshape(1, -1).astype(jnp.float32)

    c_out = (nbr_stn + (1 if stn_stack_input else 0)) * cin
    k1cat = k1 * cin * W
    k2cat = k2 * c1 * wp1

    kern = functools.partial(_stn_fused_kernel, k1=k1, k2=k2, c1=c1,
                             nbr_stn=nbr_stn, stack_input=stn_stack_input)

    const2 = lambda b: (0, 0)
    const3 = lambda b: (0, 0, 0)

    out = pl.pallas_call(
        kern,
        out_shape=jax.ShapeDtypeStruct((bp, c_out, H, W), jnp.float32),
        grid=(bp // bt,),
        in_specs=[
            pl.BlockSpec((bt, cin, H, W), lambda b: (b, 0, 0, 0)),
            pl.BlockSpec(band1.shape, const2),
            pl.BlockSpec(bias1.shape, const2),
            pl.BlockSpec(s1re.shape, const2),
            pl.BlockSpec(s1ro.shape, const2),
            pl.BlockSpec(s1ce.shape, const2),
            pl.BlockSpec(s1co.shape, const2),
            pl.BlockSpec(band2.shape, const2),
            pl.BlockSpec(bias2.shape, const2),
            pl.BlockSpec(s2re.shape, const2),
            pl.BlockSpec(s2ro.shape, const2),
            pl.BlockSpec(s2ce.shape, const2),
            pl.BlockSpec(s2co.shape, const2),
            pl.BlockSpec(sperm.shape, const2),
            pl.BlockSpec(fw1.shape, const3),
            pl.BlockSpec(fb1.shape, const2),
            pl.BlockSpec(fw2.shape, const2),
            pl.BlockSpec(fb2.shape, const2),
        ],
        out_specs=pl.BlockSpec((bt, c_out, H, W), lambda b: (b, 0, 0, 0)),
        scratch_shapes=[
            pltpu.VMEM((bt * ho1, k1cat), jnp.bfloat16),   # conv1 unfold
            pltpu.VMEM((bt * ho2, k2cat), jnp.bfloat16),   # conv2 unfold
        ],
        # TODO(synk): on v7x, verify in a profile that the batch-tile axis
        # actually shards across both TensorCores; if not, switch this axis
        # to pltpu.CORE_PARALLEL (or an explicit core_map over 2 cores).
        compiler_params=pltpu.CompilerParams(
            dimension_semantics=("parallel",),
            vmem_limit_bytes=48 * 1024 * 1024),   # < 64 MiB/TC on v7x
    )(xf, band1, bias1, s1re, s1ro, s1ce, s1co, band2, bias2,
      s2re, s2ro, s2ce, s2co, sperm, fw1, fb1, fw2, fb2)

    return out[:B] if bp != B else out


# ---------------------------------------------------------------------------
# Parameter init (deterministic, mirroring STNbasedNet.__init__ shapes)
# ---------------------------------------------------------------------------
def init_params(key, input_depth, input_dim, nbr_stn):
    dim = input_dim
    dim = (dim - 7) + 1            # Conv2d k=7
    dim = (dim - 2) // 2 + 1       # MaxPool2d 2/2
    dim = (dim - 5) + 1            # Conv2d k=5
    dim = (dim - 2) // 2 + 1       # MaxPool2d 2/2
    fc_in = 16 * dim * dim

    def u(k, shape, fan_in):
        bound = 1.0 / math.sqrt(fan_in)
        return jax.random.uniform(k, shape, jnp.float32, -bound, bound)

    k1, k2, k3, k4, k5, k6 = jax.random.split(key, 6)
    return {
        "conv1_w": u(k1, (8, input_depth, 7, 7), input_depth * 49),
        "conv1_b": u(k2, (8,), input_depth * 49),
        "conv2_w": u(k3, (16, 8, 5, 5), 8 * 25),
        "conv2_b": u(k4, (16,), 8 * 25),
        "fc1_w": u(k5, (128, fc_in), fc_in),
        "fc1_b": u(k6, (128,), fc_in),
        # fc_loc[2]: weight filled with 0, bias = [.25,0,.25,0] + [.5,0,.5,0]*
        "fc2_w": jnp.zeros((nbr_stn * 4, 128), jnp.float32),
        "fc2_b": jnp.concatenate(
            [jnp.array([0.25, 0.0, 0.25, 0.0], jnp.float32)]
            + [jnp.array([0.5, 0.0, 0.5, 0.0], jnp.float32)
               for _ in range(nbr_stn - 1)]),
    }


if __name__ == "__main__":
    key = jax.random.PRNGKey(0)
    kx, kp = jax.random.split(key)
    B, C, S = 2, 1, 32                     # small: input_dim=32, input_depth=1
    x = jax.random.normal(kx, (B, C, S, S), jnp.float32)
    params = init_params(kp, input_depth=C, input_dim=S, nbr_stn=2)

    fwd = jax.jit(functools.partial(stn_based_net_forward,
                                    nbr_stn=2, stn_stack_input=True,
                                    batch_tile=8))
    out = jax.block_until_ready(fwd(params, x))

    assert out.shape == (B, 3 * C, S, S), out.shape
    assert bool(jnp.all(jnp.isfinite(out)))
    print("KERNEL_OK")
</pallas_src>

<mosaic_0001>
module attributes {stable_mosaic.version = 11 : i64} {
  func.func @_stn_fused_kernel(%arg0: i32, %arg1: memref<2x1x32x32xf32, #tpu.memory_space<vmem>>, %arg2: memref<224x208xbf16, #tpu.memory_space<vmem>>, %arg3: memref<1x208xf32, #tpu.memory_space<vmem>>, %arg4: memref<26x52xf32, #tpu.memory_space<vmem>>, %arg5: memref<26x52xf32, #tpu.memory_space<vmem>>, %arg6: memref<208x104xf32, #tpu.memory_space<vmem>>, %arg7: memref<208x104xf32, #tpu.memory_space<vmem>>, %arg8: memref<520x144xbf16, #tpu.memory_space<vmem>>, %arg9: memref<1x144xf32, #tpu.memory_space<vmem>>, %arg10: memref<8x18xf32, #tpu.memory_space<vmem>>, %arg11: memref<8x18xf32, #tpu.memory_space<vmem>>, %arg12: memref<144x64xf32, #tpu.memory_space<vmem>>, %arg13: memref<144x64xf32, #tpu.memory_space<vmem>>, %arg14: memref<8x8xf32, #tpu.memory_space<vmem>>, %arg15: memref<4x64x128xbf16, #tpu.memory_space<vmem>>, %arg16: memref<1x128xf32, #tpu.memory_space<vmem>>, %arg17: memref<128x8xf32, #tpu.memory_space<vmem>>, %arg18: memref<1x8xf32, #tpu.memory_space<vmem>>, %arg19: memref<2x3x32x32xf32, #tpu.memory_space<vmem>>, %arg20: memref<52x224xbf16, #tpu.memory_space<vmem>>, %arg21: memref<18x520xbf16, #tpu.memory_space<vmem>>) attributes {dimension_semantics = [#tpu.dimension_semantics<parallel>], iteration_bounds = array<i64: 1>, scalar_prefetch = 0 : i64, scratch_operands = 2 : i64, tpu.core_type = #tpu.core_type<tc>, window_params = [{transform_indices = @transform_0, window_bounds = array<i64: 2, 1, 32, 32>}, {pipeline_mode = #tpu.pipeline_mode<synchronous>, transform_indices = @transform_1, window_bounds = array<i64: 224, 208>}, {pipeline_mode = #tpu.pipeline_mode<synchronous>, transform_indices = @transform_2, window_bounds = array<i64: 1, 208>}, {pipeline_mode = #tpu.pipeline_mode<synchronous>, transform_indices = @transform_3, window_bounds = array<i64: 26, 52>}, {pipeline_mode = #tpu.pipeline_mode<synchronous>, transform_indices = @transform_4, window_bounds = array<i64: 26, 52>}, {pipeline_mode = #tpu.pipeline_mode<synchronous>, transform_indices = @transform_5, window_bounds = array<i64: 208, 104>}, {pipeline_mode = #tpu.pipeline_mode<synchronous>, transform_indices = @transform_6, window_bounds = array<i64: 208, 104>}, {pipeline_mode = #tpu.pipeline_mode<synchronous>, transform_indices = @transform_7, window_bounds = array<i64: 520, 144>}, {pipeline_mode = #tpu.pipeline_mode<synchronous>, transform_indices = @transform_8, window_bounds = array<i64: 1, 144>}, {pipeline_mode = #tpu.pipeline_mode<synchronous>, transform_indices = @transform_9, window_bounds = array<i64: 8, 18>}, {pipeline_mode = #tpu.pipeline_mode<synchronous>, transform_indices = @transform_10, window_bounds = array<i64: 8, 18>}, {pipeline_mode = #tpu.pipeline_mode<synchronous>, transform_indices = @transform_11, window_bounds = array<i64: 144, 64>}, {pipeline_mode = #tpu.pipeline_mode<synchronous>, transform_indices = @transform_12, window_bounds = array<i64: 144, 64>}, {pipeline_mode = #tpu.pipeline_mode<synchronous>, transform_indices = @transform_13, window_bounds = array<i64: 8, 8>}, {pipeline_mode = #tpu.pipeline_mode<synchronous>, transform_indices = @transform_14, window_bounds = array<i64: 4, 64, 128>}, {pipeline_mode = #tpu.pipeline_mode<synchronous>, transform_indices = @transform_15, window_bounds = array<i64: 1, 128>}, {pipeline_mode = #tpu.pipeline_mode<synchronous>, transform_indices = @transform_16, window_bounds = array<i64: 128, 8>}, {pipeline_mode = #tpu.pipeline_mode<synchronous>, transform_indices = @transform_17, window_bounds = array<i64: 1, 8>}, {transform_indices = @transform_18, window_bounds = array<i64: 2, 3, 32, 32>}]} {
    %c0 = arith.constant 0 : index
    %c0_0 = arith.constant 0 : index
    %c0_1 = arith.constant 0 : index
    %c0_2 = arith.constant 0 : index
    %0 = vector.load %arg1[%c0, %c0_0, %c0_1, %c0_2] : memref<2x1x32x32xf32, #tpu.memory_space<vmem>>, vector<1x1x26x32xf32>
    %1 = vector.shape_cast %0 : vector<1x1x26x32xf32> to vector<26x32xf32>
    %2 = arith.truncf %1 : vector<26x32xf32> to vector<26x32xbf16>
    %c0_3 = arith.constant 0 : index
    %c0_4 = arith.constant 0 : index
    %3 = vector.load %arg20[%c0_3, %c0_4] : memref<52x224xbf16, #tpu.memory_space<vmem>>, vector<26x32xbf16>
    tpu.vector_store %arg20[%c0_3, %c0_4], %2 {strides = array<i32>} : memref<52x224xbf16, #tpu.memory_space<vmem>>, vector<26x32xbf16>,
    %c0_5 = arith.constant 0 : index
    %c0_6 = arith.constant 0 : index
    %c1 = arith.constant 1 : index
    %c0_7 = arith.constant 0 : index
    %4 = vector.load %arg1[%c0_5, %c0_6, %c1, %c0_7] : memref<2x1x32x32xf32, #tpu.memory_space<vmem>>, vector<1x1x26x32xf32>
    %5 = vector.shape_cast %4 : vector<1x1x26x32xf32> to vector<26x32xf32>
    %6 = arith.truncf %5 : vector<26x32xf32> to vector<26x32xbf16>
    %c0_8 = arith.constant 0 : index
    %c32 = arith.constant 32 : index
    %7 = vector.load %arg20[%c0_8, %c32] : memref<52x224xbf16, #tpu.memory_space<vmem>>, vector<26x32xbf16>
    tpu.vector_store %arg20[%c0_8, %c32], %6 {strides = array<i32>} : memref<52x224xbf16, #tpu.memory_space<vmem>>, vector<26x32xbf16>,
    %c0_9 = arith.constant 0 : index
    %c0_10 = arith.constant 0 : index
    %c2 = arith.constant 2 : index
    %c0_11 = arith.constant 0 : index
    %8 = vector.load %arg1[%c0_9, %c0_10, %c2, %c0_11] : memref<2x1x32x32xf32, #tpu.memory_space<vmem>>, vector<1x1x26x32xf32>
    %9 = vector.shape_cast %8 : vector<1x1x26x32xf32> to vector<26x32xf32>
    %10 = arith.truncf %9 : vector<26x32xf32> to vector<26x32xbf16>
    %c0_12 = arith.constant 0 : index
    %c64 = arith.constant 64 : index
    %11 = vector.load %arg20[%c0_12, %c64] : memref<52x224xbf16, #tpu.memory_space<vmem>>, vector<26x32xbf16>
    tpu.vector_store %arg20[%c0_12, %c64], %10 {strides = array<i32>} : memref<52x224xbf16, #tpu.memory_space<vmem>>, vector<26x32xbf16>,
    %c0_13 = arith.constant 0 : index
    %c0_14 = arith.constant 0 : index
    %c3 = arith.constant 3 : index
    %c0_15 = arith.constant 0 : index
    %12 = vector.load %arg1[%c0_13, %c0_14, %c3, %c0_15] : memref<2x1x32x32xf32, #tpu.memory_space<vmem>>, vector<1x1x26x32xf32>
    %13 = vector.shape_cast %12 : vector<1x1x26x32xf32> to vector<26x32xf32>
    %14 = arith.truncf %13 : vector<26x32xf32> to vector<26x32xbf16>
    %c0_16 = arith.constant 0 : index
    %c96 = arith.constant 96 : index
    %15 = vector.load %arg20[%c0_16, %c96] : memref<52x224xbf16, #tpu.memory_space<vmem>>, vector<26x32xbf16>
    tpu.vector_store %arg20[%c0_16, %c96], %14 {strides = array<i32>} : memref<52x224xbf16, #tpu.memory_space<vmem>>, vector<26x32xbf16>,
    %c0_17 = arith.constant 0 : index
    %c0_18 = arith.constant 0 : index
    %c4 = arith.constant 4 : index
    %c0_19 = arith.constant 0 : index
    %16 = vector.load %arg1[%c0_17, %c0_18, %c4, %c0_19] : memref<2x1x32x32xf32, #tpu.memory_space<vmem>>, vector<1x1x26x32xf32>
    %17 = vector.shape_cast %16 : vector<1x1x26x32xf32> to vector<26x32xf32>
    %18 = arith.truncf %17 : vector<26x32xf32> to vector<26x32xbf16>
    %c0_20 = arith.constant 0 : index
    %c128 = arith.constant 128 : index
    %19 = vector.load %arg20[%c0_20, %c128] : memref<52x224xbf16, #tpu.memory_space<vmem>>, vector<26x32xbf16>
    tpu.vector_store %arg20[%c0_20, %c128], %18 {strides = array<i32>} : memref<52x224xbf16, #tpu.memory_space<vmem>>, vector<26x32xbf16>,
    %c0_21 = arith.constant 0 : index
    %c0_22 = arith.constant 0 : index
    %c5 = arith.constant 5 : index
    %c0_23 = arith.constant 0 : index
    %20 = vector.load %arg1[%c0_21, %c0_22, %c5, %c0_23] : memref<2x1x32x32xf32, #tpu.memory_space<vmem>>, vector<1x1x26x32xf32>
    %21 = vector.shape_cast %20 : vector<1x1x26x32xf32> to vector<26x32xf32>
    %22 = arith.truncf %21 : vector<26x32xf32> to vector<26x32xbf16>
    %c0_24 = arith.constant 0 : index
    %c160 = arith.constant 160 : index
    %23 = vector.load %arg20[%c0_24, %c160] : memref<52x224xbf16, #tpu.memory_space<vmem>>, vector<26x32xbf16>
    tpu.vector_store %arg20[%c0_24, %c160], %22 {strides = array<i32>} : memref<52x224xbf16, #tpu.memory_space<vmem>>, vector<26x32xbf16>,
    %c0_25 = arith.constant 0 : index
    %c0_26 = arith.constant 0 : index
    %c6 = arith.constant 6 : index
    %c0_27 = arith.constant 0 : index
    %24 = vector.load %arg1[%c0_25, %c0_26, %c6, %c0_27] : memref<2x1x32x32xf32, #tpu.memory_space<vmem>>, vector<1x1x26x32xf32>
    %25 = vector.shape_cast %24 : vector<1x1x26x32xf32> to vector<26x32xf32>
    %26 = arith.truncf %25 : vector<26x32xf32> to vector<26x32xbf16>
    %c0_28 = arith.constant 0 : index
    %c192 = arith.constant 192 : index
    %27 = vector.load %arg20[%c0_28, %c192] : memref<52x224xbf16, #tpu.memory_space<vmem>>, vector<26x32xbf16>
    tpu.vector_store %arg20[%c0_28, %c192], %26 {strides = array<i32>} : memref<52x224xbf16, #tpu.memory_space<vmem>>, vector<26x32xbf16>,
    %c1_29 = arith.constant 1 : index
    %c0_30 = arith.constant 0 : index
    %c0_31 = arith.constant 0 : index
    %c0_32 = arith.constant 0 : index
    %28 = vector.load %arg1[%c1_29, %c0_30, %c0_31, %c0_32] : memref<2x1x32x32xf32, #tpu.memory_space<vmem>>, vector<1x1x26x32xf32>
    %29 = vector.shape_cast %28 : vector<1x1x26x32xf32> to vector<26x32xf32>
    %30 = arith.truncf %29 : vector<26x32xf32> to vector<26x32xbf16>
    %c26 = arith.constant 26 : index
    %c0_33 = arith.constant 0 : index
    %31 = vector.load %arg20[%c26, %c0_33] : memref<52x224xbf16, #tpu.memory_space<vmem>>, vector<26x32xbf16>
    tpu.vector_store %arg20[%c26, %c0_33], %30 {strides = array<i32>} : memref<52x224xbf16, #tpu.memory_space<vmem>>, vector<26x32xbf16>,
    %c1_34 = arith.constant 1 : index
    %c0_35 = arith.constant 0 : index
    %c1_36 = arith.constant 1 : index
    %c0_37 = arith.constant 0 : index
    %32 = vector.load %arg1[%c1_34, %c0_35, %c1_36, %c0_37] : memref<2x1x32x32xf32, #tpu.memory_space<vmem>>, vector<1x1x26x32xf32>
    %33 = vector.shape_cast %32 : vector<1x1x26x32xf32> to vector<26x32xf32>
    %34 = arith.truncf %33 : vector<26x32xf32> to vector<26x32xbf16>
    %c26_38 = arith.constant 26 : index
    %c32_39 = arith.constant 32 : index
    %35 = vector.load %arg20[%c26_38, %c32_39] : memref<52x224xbf16, #tpu.memory_space<vmem>>, vector<26x32xbf16>
    tpu.vector_store %arg20[%c26_38, %c32_39], %34 {strides = array<i32>} : memref<52x224xbf16, #tpu.memory_space<vmem>>, vector<26x32xbf16>,
    %c1_40 = arith.constant 1 : index
    %c0_41 = arith.constant 0 : index
    %c2_42 = arith.constant 2 : index
    %c0_43 = arith.constant 0 : index
    %36 = vector.load %arg1[%c1_40, %c0_41, %c2_42, %c0_43] : memref<2x1x32x32xf32, #tpu.memory_space<vmem>>, vector<1x1x26x32xf32>
    %37 = vector.shape_cast %36 : vector<1x1x26x32xf32> to vector<26x32xf32>
    %38 = arith.truncf %37 : vector<26x32xf32> to vector<26x32xbf16>
    %c26_44 = arith.constant 26 : index
    %c64_45 = arith.constant 64 : index
    %39 = vector.load %arg20[%c26_44, %c64_45] : memref<52x224xbf16, #tpu.memory_space<vmem>>, vector<26x32xbf16>
    tpu.vector_store %arg20[%c26_44, %c64_45], %38 {strides = array<i32>} : memref<52x224xbf16, #tpu.memory_space<vmem>>, vector<26x32xbf16>,
    %c1_46 = arith.constant 1 : index
    %c0_47 = arith.constant 0 : index
    %c3_48 = arith.constant 3 : index
    %c0_49 = arith.constant 0 : index
    %40 = vector.load %arg1[%c1_46, %c0_47, %c3_48, %c0_49] : memref<2x1x32x32xf32, #tpu.memory_space<vmem>>, vector<1x1x26x32xf32>
    %41 = vector.shape_cast %40 : vector<1x1x26x32xf32> to vector<26x32xf32>
    %42 = arith.truncf %41 : vector<26x32xf32> to vector<26x32xbf16>
    %c26_50 = arith.constant 26 : index
    %c96_51 = arith.constant 96 : index
    %43 = vector.load %arg20[%c26_50, %c96_51] : memref<52x224xbf16, #tpu.memory_space<vmem>>, vector<26x32xbf16>
    tpu.vector_store %arg20[%c26_50, %c96_51], %42 {strides = array<i32>} : memref<52x224xbf16, #tpu.memory_space<vmem>>, vector<26x32xbf16>,
    %c1_52 = arith.constant 1 : index
    %c0_53 = arith.constant 0 : index
    %c4_54 = arith.constant 4 : index
    %c0_55 = arith.constant 0 : index
    %44 = vector.load %arg1[%c1_52, %c0_53, %c4_54, %c0_55] : memref<2x1x32x32xf32, #tpu.memory_space<vmem>>, vector<1x1x26x32xf32>
    %45 = vector.shape_cast %44 : vector<1x1x26x32xf32> to vector<26x32xf32>
    %46 = arith.truncf %45 : vector<26x32xf32> to vector<26x32xbf16>
    %c26_56 = arith.constant 26 : index
    %c128_57 = arith.constant 128 : index
    %47 = vector.load %arg20[%c26_56, %c128_57] : memref<52x224xbf16, #tpu.memory_space<vmem>>, vector<26x32xbf16>
    tpu.vector_store %arg20[%c26_56, %c128_57], %46 {strides = array<i32>} : memref<52x224xbf16, #tpu.memory_space<vmem>>, vector<26x32xbf16>,
    %c1_58 = arith.constant 1 : index
    %c0_59 = arith.constant 0 : index
    %c5_60 = arith.constant 5 : index
    %c0_61 = arith.constant 0 : index
    %48 = vector.load %arg1[%c1_58, %c0_59, %c5_60, %c0_61] : memref<2x1x32x32xf32, #tpu.memory_space<vmem>>, vector<1x1x26x32xf32>
    %49 = vector.shape_cast %48 : vector<1x1x26x32xf32> to vector<26x32xf32>
    %50 = arith.truncf %49 : vector<26x32xf32> to vector<26x32xbf16>
    %c26_62 = arith.constant 26 : index
    %c160_63 = arith.constant 160 : index
    %51 = vector.load %arg20[%c26_62, %c160_63] : memref<52x224xbf16, #tpu.memory_space<vmem>>, vector<26x32xbf16>
    tpu.vector_store %arg20[%c26_62, %c160_63], %50 {strides = array<i32>} : memref<52x224xbf16, #tpu.memory_space<vmem>>, vector<26x32xbf16>,
    %c1_64 = arith.constant 1 : index
    %c0_65 = arith.constant 0 : index
    %c6_66 = arith.constant 6 : index
    %c0_67 = arith.constant 0 : index
    %52 = vector.load %arg1[%c1_64, %c0_65, %c6_66, %c0_67] : memref<2x1x32x32xf32, #tpu.memory_space<vmem>>, vector<1x1x26x32xf32>
    %53 = vector.shape_cast %52 : vector<1x1x26x32xf32> to vector<26x32xf32>
    %54 = arith.truncf %53 : vector<26x32xf32> to vector<26x32xbf16>
    %c26_68 = arith.constant 26 : index
    %c192_69 = arith.constant 192 : index
    %55 = vector.load %arg20[%c26_68, %c192_69] : memref<52x224xbf16, #tpu.memory_space<vmem>>, vector<26x32xbf16>
    tpu.vector_store %arg20[%c26_68, %c192_69], %54 {strides = array<i32>} : memref<52x224xbf16, #tpu.memory_space<vmem>>, vector<26x32xbf16>,
    %c0_70 = arith.constant 0 : index
    %c0_71 = arith.constant 0 : index
    %56 = vector.load %arg20[%c0_70, %c0_71] : memref<52x224xbf16, #tpu.memory_space<vmem>>, vector<52x224xbf16>
    %c0_72 = arith.constant 0 : index
    %c0_73 = arith.constant 0 : index
    %57 = vector.load %arg2[%c0_72, %c0_73] : memref<224x208xbf16, #tpu.memory_space<vmem>>, vector<224x208xbf16>
    %cst = arith.constant dense<0.000000e+00> : vector<52x208xf32>
    %58 = tpu.matmul %56, %57, %cst {dimension_numbers = #tpu.dot_dimension_numbers<[1], [0], [0], [1], [0, 0, 1, 1], [], []>} : vector<52x224xbf16>, vector<224x208xbf16>, vector<52x208xf32> -> vector<52x208xf32>
    %c0_74 = arith.constant 0 : index
    %c0_75 = arith.constant 0 : index
    %59 = vector.load %arg3[%c0_74, %c0_75] : memref<1x208xf32, #tpu.memory_space<vmem>>, vector<1x208xf32>
    %60 = vector.broadcast %59 : vector<1x208xf32> to vector<52x208xf32>
    %61 = arith.addf %58, %60 : vector<52x208xf32>
    %c0_76 = arith.constant 0 : index
    %c0_77 = arith.constant 0 : index
    %62 = vector.load %arg4[%c0_76, %c0_77] : memref<26x52xf32, #tpu.memory_space<vmem>>, vector<26x52xf32>
    %cst_78 = arith.constant dense<0.000000e+00> : vector<26x208xf32>
    %63 = tpu.matmul %62, %61, %cst_78 {dimension_numbers = #tpu.dot_dimension_numbers<[1], [0], [0], [1], [0, 0, 1, 1], [], []>} : vector<26x52xf32>, vector<52x208xf32>, vector<26x208xf32> -> vector<26x208xf32>
    %c0_79 = arith.constant 0 : index
    %c0_80 = arith.constant 0 : index
    %64 = vector.load %arg5[%c0_79, %c0_80] : memref<26x52xf32, #tpu.memory_space<vmem>>, vector<26x52xf32>
    %cst_81 = arith.constant dense<0.000000e+00> : vector<26x208xf32>
    %65 = tpu.matmul %64, %61, %cst_81 {dimension_numbers = #tpu.dot_dimension_numbers<[1], [0], [0], [1], [0, 0, 1, 1], [], []>} : vector<26x52xf32>, vector<52x208xf32>, vector<26x208xf32> -> vector<26x208xf32>
    %66 = arith.maximumf %63, %65 : vector<26x208xf32>
    %c0_82 = arith.constant 0 : index
    %c0_83 = arith.constant 0 : index
    %67 = vector.load %arg6[%c0_82, %c0_83] : memref<208x104xf32, #tpu.memory_space<vmem>>, vector<208x104xf32>
    %cst_84 = arith.constant dense<0.000000e+00> : vector<26x104xf32>
    %68 = tpu.matmul %66, %67, %cst_84 {dimension_numbers = #tpu.dot_dimension_numbers<[1], [0], [0], [1], [0, 0, 1, 1], [], []>} : vector<26x208xf32>, vector<208x104xf32>, vector<26x104xf32> -> vector<26x104xf32>
    %c0_85 = arith.constant 0 : index
    %c0_86 = arith.constant 0 : index
    %69 = vector.load %arg7[%c0_85, %c0_86] : memref<208x104xf32, #tpu.memory_space<vmem>>, vector<208x104xf32>
    %cst_87 = arith.constant dense<0.000000e+00> : vector<26x104xf32>
    %70 = tpu.matmul %66, %69, %cst_87 {dimension_numbers = #tpu.dot_dimension_numbers<[1], [0], [0], [1], [0, 0, 1, 1], [], []>} : vector<26x208xf32>, vector<208x104xf32>, vector<26x104xf32> -> vector<26x104xf32>
    %71 = arith.maximumf %68, %70 : vector<26x104xf32>
    %cst_88 = arith.constant 0.000000e+00 : f32
    %72 = vector.broadcast %cst_88 : f32 to vector<26x104xf32>
    %73 = arith.maximumf %71, %72 : vector<26x104xf32>
    %74 = vector.extract_strided_slice %73 {offsets = [0, 0], sizes = [9, 104], strides = [1, 1]} : vector<26x104xf32> to vector<9x104xf32>
    %75 = arith.truncf %74 : vector<9x104xf32> to vector<9x104xbf16>
    %c0_89 = arith.constant 0 : index
    %c0_90 = arith.constant 0 : index
    %76 = vector.load %arg21[%c0_89, %c0_90] : memref<18x520xbf16, #tpu.memory_space<vmem>>, vector<9x104xbf16>
    tpu.vector_store %arg21[%c0_89, %c0_90], %75 {strides = array<i32>} : memref<18x520xbf16, #tpu.memory_space<vmem>>, vector<9x104xbf16>,
    %77 = vector.extract_strided_slice %73 {offsets = [1, 0], sizes = [9, 104], strides = [1, 1]} : vector<26x104xf32> to vector<9x104xf32>
    %78 = arith.truncf %77 : vector<9x104xf32> to vector<9x104xbf16>
    %c0_91 = arith.constant 0 : index
    %c104 = arith.constant 104 : index
    %79 = vector.load %arg21[%c0_91, %c104] : memref<18x520xbf16, #tpu.memory_space<vmem>>, vector<9x104xbf16>
    tpu.vector_store %arg21[%c0_91, %c104], %78 {strides = array<i32>} : memref<18x520xbf16, #tpu.memory_space<vmem>>, vector<9x104xbf16>,
    %80 = vector.extract_strided_slice %73 {offsets = [2, 0], sizes = [9, 104], strides = [1, 1]} : vector<26x104xf32> to vector<9x104xf32>
    %81 = arith.truncf %80 : vector<9x104xf32> to vector<9x104xbf16>
    %c0_92 = arith.constant 0 : index
    %c208 = arith.constant 208 : index
    %82 = vector.load %arg21[%c0_92, %c208] : memref<18x520xbf16, #tpu.memory_space<vmem>>, vector<9x104xbf16>
    tpu.vector_store %arg21[%c0_92, %c208], %81 {strides = array<i32>} : memref<18x520xbf16, #tpu.memory_space<vmem>>, vector<9x104xbf16>,
    %83 = vector.extract_strided_slice %73 {offsets = [3, 0], sizes = [9, 104], strides = [1, 1]} : vector<26x104xf32> to vector<9x104xf32>
    %84 = arith.truncf %83 : vector<9x104xf32> to vector<9x104xbf16>
    %c0_93 = arith.constant 0 : index
    %c312 = arith.constant 312 : index
    %85 = vector.load %arg21[%c0_93, %c312] : memref<18x520xbf16, #tpu.memory_space<vmem>>, vector<9x104xbf16>
    tpu.vector_store %arg21[%c0_93, %c312], %84 {strides = array<i32>} : memref<18x520xbf16, #tpu.memory_space<vmem>>, vector<9x104xbf16>,
    %86 = vector.extract_strided_slice %73 {offsets = [4, 0], sizes = [9, 104], strides = [1, 1]} : vector<26x104xf32> to vector<9x104xf32>
    %87 = arith.truncf %86 : vector<9x104xf32> to vector<9x104xbf16>
    %c0_94 = arith.constant 0 : index
    %c416 = arith.constant 416 : index
    %88 = vector.load %arg21[%c0_94, %c416] : memref<18x520xbf16, #tpu.memory_space<vmem>>, vector<9x104xbf16>
    tpu.vector_store %arg21[%c0_94, %c416], %87 {strides = array<i32>} : memref<18x520xbf16, #tpu.memory_space<vmem>>, vector<9x104xbf16>,
    %89 = vector.extract_strided_slice %73 {offsets = [13, 0], sizes = [9, 104], strides = [1, 1]} : vector<26x104xf32> to vector<9x104xf32>
    %90 = arith.truncf %89 : vector<9x104xf32> to vector<9x104xbf16>
    %c9 = arith.constant 9 : index
    %c0_95 = arith.constant 0 : index
    %91 = vector.load %arg21[%c9, %c0_95] : memref<18x520xbf16, #tpu.memory_space<vmem>>, vector<9x104xbf16>
    tpu.vector_store %arg21[%c9, %c0_95], %90 {strides = array<i32>} : memref<18x520xbf16, #tpu.memory_space<vmem>>, vector<9x104xbf16>,
    %92 = vector.extract_strided_slice %73 {offsets = [14, 0], sizes = [9, 104], strides = [1, 1]} : vector<26x104xf32> to vector<9x104xf32>
    %93 = arith.truncf %92 : vector<9x104xf32> to vector<9x104xbf16>
    %c9_96 = arith.constant 9 : index
    %c104_97 = arith.constant 104 : index
    %94 = vector.load %arg21[%c9_96, %c104_97] : memref<18x520xbf16, #tpu.memory_space<vmem>>, vector<9x104xbf16>
    tpu.vector_store %arg21[%c9_96, %c104_97], %93 {strides = array<i32>} : memref<18x520xbf16, #tpu.memory_space<vmem>>, vector<9x104xbf16>,
    %95 = vector.extract_strided_slice %73 {offsets = [15, 0], sizes = [9, 104], strides = [1, 1]} : vector<26x104xf32> to vector<9x104xf32>
    %96 = arith.truncf %95 : vector<9x104xf32> to vector<9x104xbf16>
    %c9_98 = arith.constant 9 : index
    %c208_99 = arith.constant 208 : index
    %97 = vector.load %arg21[%c9_98, %c208_99] : memref<18x520xbf16, #tpu.memory_space<vmem>>, vector<9x104xbf16>
    tpu.vector_store %arg21[%c9_98, %c208_99], %96 {strides = array<i32>} : memref<18x520xbf16, #tpu.memory_space<vmem>>, vector<9x104xbf16>,
    %98 = vector.extract_strided_slice %73 {offsets = [16, 0], sizes = [9, 104], strides = [1, 1]} : vector<26x104xf32> to vector<9x104xf32>
    %99 = arith.truncf %98 : vector<9x104xf32> to vector<9x104xbf16>
    %c9_100 = arith.constant 9 : index
    %c312_101 = arith.constant 312 : index
    %100 = vector.load %arg21[%c9_100, %c312_101] : memref<18x520xbf16, #tpu.memory_space<vmem>>, vector<9x104xbf16>
    tpu.vector_store %arg21[%c9_100, %c312_101], %99 {strides = array<i32>} : memref<18x520xbf16, #tpu.memory_space<vmem>>, vector<9x104xbf16>,
    %101 = vector.extract_strided_slice %73 {offsets = [17, 0], sizes = [9, 104], strides = [1, 1]} : vector<26x104xf32> to vector<9x104xf32>
    %102 = arith.truncf %101 : vector<9x104xf32> to vector<9x104xbf16>
    %c9_102 = arith.constant 9 : index
    %c416_103 = arith.constant 416 : index
    %103 = vector.load %arg21[%c9_102, %c416_103] : memref<18x520xbf16, #tpu.memory_space<vmem>>, vector<9x104xbf16>
    tpu.vector_store %arg21[%c9_102, %c416_103], %102 {strides = array<i32>} : memref<18x520xbf16, #tpu.memory_space<vmem>>, vector<9x104xbf16>,
    %c0_104 = arith.constant 0 : index
    %c0_105 = arith.constant 0 : index
    %104 = vector.load %arg21[%c0_104, %c0_105] : memref<18x520xbf16, #tpu.memory_space<vmem>>, vector<18x520xbf16>
    %c0_106 = arith.constant 0 : index
    %c0_107 = arith.constant 0 : index
    %105 = vector.load %arg8[%c0_106, %c0_107] : memref<520x144xbf16, #tpu.memory_space<vmem>>, vector<520x144xbf16>
    %cst_108 = arith.constant dense<0.000000e+00> : vector<18x144xf32>
    %106 = tpu.matmul %104, %105, %cst_108 {dimension_numbers = #tpu.dot_dimension_numbers<[1], [0], [0], [1], [0, 0, 1, 1], [], []>} : vector<18x520xbf16>, vector<520x144xbf16>, vector<18x144xf32> -> vector<18x144xf32>
    %c0_109 = arith.constant 0 : index
    %c0_110 = arith.constant 0 : index
    %107 = vector.load %arg9[%c0_109, %c0_110] : memref<1x144xf32, #tpu.memory_space<vmem>>, vector<1x144xf32>
    %108 = vector.broadcast %107 : vector<1x144xf32> to vector<18x144xf32>
    %109 = arith.addf %106, %108 : vector<18x144xf32>
    %c0_111 = arith.constant 0 : index
    %c0_112 = arith.constant 0 : index
    %110 = vector.load %arg10[%c0_111, %c0_112] : memref<8x18xf32, #tpu.memory_space<vmem>>, vector<8x18xf32>
    %cst_113 = arith.constant dense<0.000000e+00> : vector<8x144xf32>
    %111 = tpu.matmul %110, %109, %cst_113 {dimension_numbers = #tpu.dot_dimension_numbers<[1], [0], [0], [1], [0, 0, 1, 1], [], []>} : vector<8x18xf32>, vector<18x144xf32>, vector<8x144xf32> -> vector<8x144xf32>
    %c0_114 = arith.constant 0 : index
    %c0_115 = arith.constant 0 : index
    %112 = vector.load %arg11[%c0_114, %c0_115] : memref<8x18xf32, #tpu.memory_space<vmem>>, vector<8x18xf32>
    %cst_116 = arith.constant dense<0.000000e+00> : vector<8x144xf32>
    %113 = tpu.matmul %112, %109, %cst_116 {dimension_numbers = #tpu.dot_dimension_numbers<[1], [0], [0], [1], [0, 0, 1, 1], [], []>} : vector<8x18xf32>, vector<18x144xf32>, vector<8x144xf32> -> vector<8x144xf32>
    %114 = arith.maximumf %111, %113 : vector<8x144xf32>
    %c0_117 = arith.constant 0 : index
    %c0_118 = arith.constant 0 : index
    %115 = vector.load %arg12[%c0_117, %c0_118] : memref<144x64xf32, #tpu.memory_space<vmem>>, vector<144x64xf32>
    %cst_119 = arith.constant dense<0.000000e+00> : vector<8x64xf32>
    %116 = tpu.matmul %114, %115, %cst_119 {dimension_numbers = #tpu.dot_dimension_numbers<[1], [0], [0], [1], [0, 0, 1, 1], [], []>} : vector<8x144xf32>, vector<144x64xf32>, vector<8x64xf32> -> vector<8x64xf32>
    %c0_120 = arith.constant 0 : index
    %c0_121 = arith.constant 0 : index
    %117 = vector.load %arg13[%c0_120, %c0_121] : memref<144x64xf32, #tpu.memory_space<vmem>>, vector<144x64xf32>
    %cst_122 = arith.constant dense<0.000000e+00> : vector<8x64xf32>
    %118 = tpu.matmul %114, %117, %cst_122 {dimension_numbers = #tpu.dot_dimension_numbers<[1], [0], [0], [1], [0, 0, 1, 1], [], []>} : vector<8x144xf32>, vector<144x64xf32>, vector<8x64xf32> -> vector<8x64xf32>
    %119 = arith.maximumf %116, %118 : vector<8x64xf32>
    %cst_123 = arith.constant 0.000000e+00 : f32
    %120 = vector.broadcast %cst_123 : f32 to vector<8x64xf32>
    %121 = arith.maximumf %119, %120 : vector<8x64xf32>
    %c0_124 = arith.constant 0 : index
    %c0_125 = arith.constant 0 : index
    %122 = vector.load %arg14[%c0_124, %c0_125] : memref<8x8xf32, #tpu.memory_space<vmem>>, vector<8x8xf32>
    %cst_126 = arith.constant dense<0.000000e+00> : vector<8x64xf32>
    %123 = tpu.matmul %122, %121, %cst_126 {dimension_numbers = #tpu.dot_dimension_numbers<[1], [0], [0], [1], [0, 0, 1, 1], [], []>} : vector<8x8xf32>, vector<8x64xf32>, vector<8x64xf32> -> vector<8x64xf32>
    %cst_127 = arith.constant 0.000000e+00 : f32
    %124 = vector.broadcast %cst_127 : f32 to vector<2x128xf32>
    %125 = vector.extract_strided_slice %123 {offsets = [0, 0], sizes = [2, 64], strides = [1, 1]} : vector<8x64xf32> to vector<2x64xf32>
    %126 = arith.truncf %125 : vector<2x64xf32> to vector<2x64xbf16>
    %c0_128 = arith.constant 0 : index
    %c0_129 = arith.constant 0 : index
    %c0_130 = arith.constant 0 : index
    %127 = vector.load %arg15[%c0_128, %c0_129, %c0_130] : memref<4x64x128xbf16, #tpu.memory_space<vmem>>, vector<1x64x128xbf16>
    %128 = vector.shape_cast %127 : vector<1x64x128xbf16> to vector<64x128xbf16>
    %cst_131 = arith.constant dense<0.000000e+00> : vector<2x128xf32>
    %129 = tpu.matmul %126, %128, %cst_131 {dimension_numbers = #tpu.dot_dimension_numbers<[1], [0], [0], [1], [0, 0, 1, 1], [], []>} : vector<2x64xbf16>, vector<64x128xbf16>, vector<2x128xf32> -> vector<2x128xf32>
    %130 = arith.addf %124, %129 : vector<2x128xf32>
    %131 = vector.extract_strided_slice %123 {offsets = [2, 0], sizes = [2, 64], strides = [1, 1]} : vector<8x64xf32> to vector<2x64xf32>
    %132 = arith.truncf %131 : vector<2x64xf32> to vector<2x64xbf16>
    %c1_132 = arith.constant 1 : index
    %c0_133 = arith.constant 0 : index
    %c0_134 = arith.constant 0 : index
    %133 = vector.load %arg15[%c1_132, %c0_133, %c0_134] : memref<4x64x128xbf16, #tpu.memory_space<vmem>>, vector<1x64x128xbf16>
    %134 = vector.shape_cast %133 : vector<1x64x128xbf16> to vector<64x128xbf16>
    %cst_135 = arith.constant dense<0.000000e+00> : vector<2x128xf32>
    %135 = tpu.matmul %132, %134, %cst_135 {dimension_numbers = #tpu.dot_dimension_numbers<[1], [0], [0], [1], [0, 0, 1, 1], [], []>} : vector<2x64xbf16>, vector<64x128xbf16>, vector<2x128xf32> -> vector<2x128xf32>
    %136 = arith.addf %130, %135 : vector<2x128xf32>
    %137 = vector.extract_strided_slice %123 {offsets = [4, 0], sizes = [2, 64], strides = [1, 1]} : vector<8x64xf32> to vector<2x64xf32>
    %138 = arith.truncf %137 : vector<2x64xf32> to vector<2x64xbf16>
    %c2_136 = arith.constant 2 : index
    %c0_137 = arith.constant 0 : index
    %c0_138 = arith.constant 0 : index
    %139 = vector.load %arg15[%c2_136, %c0_137, %c0_138] : memref<4x64x128xbf16, #tpu.memory_space<vmem>>, vector<1x64x128xbf16>
    %140 = vector.shape_cast %139 : vector<1x64x128xbf16> to vector<64x128xbf16>
    %cst_139 = arith.constant dense<0.000000e+00> : vector<2x128xf32>
    %141 = tpu.matmul %138, %140, %cst_139 {dimension_numbers = #tpu.dot_dimension_numbers<[1], [0], [0], [1], [0, 0, 1, 1], [], []>} : vector<2x64xbf16>, vector<64x128xbf16>, vector<2x128xf32> -> vector<2x128xf32>
    %142 = arith.addf %136, %141 : vector<2x128xf32>
    %143 = vector.extract_strided_slice %123 {offsets = [6, 0], sizes = [2, 64], strides = [1, 1]} : vector<8x64xf32> to vector<2x64xf32>
    %144 = arith.truncf %143 : vector<2x64xf32> to vector<2x64xbf16>
    %c3_140 = arith.constant 3 : index
    %c0_141 = arith.constant 0 : index
    %c0_142 = arith.constant 0 : index
    %145 = vector.load %arg15[%c3_140, %c0_141, %c0_142] : memref<4x64x128xbf16, #tpu.memory_space<vmem>>, vector<1x64x128xbf16>
    %146 = vector.shape_cast %145 : vector<1x64x128xbf16> to vector<64x128xbf16>
    %cst_143 = arith.constant dense<0.000000e+00> : vector<2x128xf32>
    %147 = tpu.matmul %144, %146, %cst_143 {dimension_numbers = #tpu.dot_dimension_numbers<[1], [0], [0], [1], [0, 0, 1, 1], [], []>} : vector<2x64xbf16>, vector<64x128xbf16>, vector<2x128xf32> -> vector<2x128xf32>
    %148 = arith.addf %142, %147 : vector<2x128xf32>
    %c0_144 = arith.constant 0 : index
    %c0_145 = arith.constant 0 : index
    %149 = vector.load %arg16[%c0_144, %c0_145] : memref<1x128xf32, #tpu.memory_space<vmem>>, vector<1x128xf32>
    %150 = vector.broadcast %149 : vector<1x128xf32> to vector<2x128xf32>
    %151 = arith.addf %148, %150 : vector<2x128xf32>
    %cst_146 = arith.constant 0.000000e+00 : f32
    %152 = vector.broadcast %cst_146 : f32 to vector<2x128xf32>
    %153 = arith.maximumf %151, %152 : vector<2x128xf32>
    %c0_147 = arith.constant 0 : index
    %c0_148 = arith.constant 0 : index
    %154 = vector.load %arg17[%c0_147, %c0_148] : memref<128x8xf32, #tpu.memory_space<vmem>>, vector<128x8xf32>
    %cst_149 = arith.constant dense<0.000000e+00> : vector<2x8xf32>
    %155 = tpu.matmul %153, %154, %cst_149 {dimension_numbers = #tpu.dot_dimension_numbers<[1], [0], [0], [1], [0, 0, 1, 1], [], []>} : vector<2x128xf32>, vector<128x8xf32>, vector<2x8xf32> -> vector<2x8xf32>
    %c0_150 = arith.constant 0 : index
    %c0_151 = arith.constant 0 : index
    %156 = vector.load %arg18[%c0_150, %c0_151] : memref<1x8xf32, #tpu.memory_space<vmem>>, vector<1x8xf32>
    %157 = vector.broadcast %156 : vector<1x8xf32> to vector<2x8xf32>
    %158 = arith.addf %155, %157 : vector<2x8xf32>
    %c0_152 = arith.constant 0 : index
    %c0_153 = arith.constant 0 : index
    %c0_154 = arith.constant 0 : index
    %c0_155 = arith.constant 0 : index
    %159 = vector.load %arg1[%c0_152, %c0_153, %c0_154, %c0_155] : memref<2x1x32x32xf32, #tpu.memory_space<vmem>>, vector<2x1x32x32xf32>
    %160 = vector.shape_cast %159 : vector<2x1x32x32xf32> to vector<2x32x32xf32>
    %161 = tpu.iota {dimensions = array<i32: 2>} : vector<2x32x32xi32>
    %162 = arith.sitofp %161 : vector<2x32x32xi32> to vector<2x32x32xf32>
    %163 = tpu.iota {dimensions = array<i32: 1>} : vector<2x32x32xi32>
    %164 = arith.sitofp %163 : vector<2x32x32xi32> to vector<2x32x32xf32>
    %165 = tpu.iota {dimensions = array<i32: 1>} : vector<2x32x32xi32>
    %166 = arith.sitofp %165 : vector<2x32x32xi32> to vector<2x32x32xf32>
    %167 = tpu.iota {dimensions = array<i32: 2>} : vector<2x32x32xi32>
    %168 = arith.sitofp %167 : vector<2x32x32xi32> to vector<2x32x32xf32>
    %cst_156 = arith.constant 2.000000e+00 : f32
    %169 = vector.broadcast %cst_156 : f32 to vector<2x32x32xf32>
    %170 = arith.mulf %169, %162 : vector<2x32x32xf32>
    %cst_157 = arith.constant 1.000000e+00 : f32
    %171 = vector.broadcast %cst_157 : f32 to vector<2x32x32xf32>
    %172 = arith.addf %170, %171 : vector<2x32x32xf32>
    %cst_158 = arith.constant 3.200000e+01 : f32
    %173 = vector.broadcast %cst_158 : f32 to vector<2x32x32xf32>
    %174 = arith.divf %172, %173 : vector<2x32x32xf32>
    %cst_159 = arith.constant 1.000000e+00 : f32
    %175 = vector.broadcast %cst_159 : f32 to vector<2x32x32xf32>
    %176 = arith.subf %174, %175 : vector<2x32x32xf32>
    %cst_160 = arith.constant 2.000000e+00 : f32
    %177 = vector.broadcast %cst_160 : f32 to vector<2x32x32xf32>
    %178 = arith.mulf %177, %166 : vector<2x32x32xf32>
    %cst_161 = arith.constant 1.000000e+00 : f32
    %179 = vector.broadcast %cst_161 : f32 to vector<2x32x32xf32>
    %180 = arith.addf %178, %179 : vector<2x32x32xf32>
    %cst_162 = arith.constant 3.200000e+01 : f32
    %181 = vector.broadcast %cst_162 : f32 to vector<2x32x32xf32>
    %182 = arith.divf %180, %181 : vector<2x32x32xf32>
    %cst_163 = arith.constant 1.000000e+00 : f32
    %183 = vector.broadcast %cst_163 : f32 to vector<2x32x32xf32>
    %184 = arith.subf %182, %183 : vector<2x32x32xf32>
    %185 = vector.extract_strided_slice %158 {offsets = [0, 0], sizes = [2, 1], strides = [1, 1]} : vector<2x8xf32> to vector<2x1xf32>
    %186 = vector.shape_cast %185 : vector<2x1xf32> to vector<2x1x1xf32>
    %187 = vector.extract_strided_slice %158 {offsets = [0, 1], sizes = [2, 1], strides = [1, 1]} : vector<2x8xf32> to vector<2x1xf32>
    %188 = vector.shape_cast %187 : vector<2x1xf32> to vector<2x1x1xf32>
    %189 = vector.extract_strided_slice %158 {offsets = [0, 2], sizes = [2, 1], strides = [1, 1]} : vector<2x8xf32> to vector<2x1xf32>
    %190 = vector.shape_cast %189 : vector<2x1xf32> to vector<2x1x1xf32>
    %191 = vector.extract_strided_slice %158 {offsets = [0, 3], sizes = [2, 1], strides = [1, 1]} : vector<2x8xf32> to vector<2x1xf32>
    %192 = vector.shape_cast %191 : vector<2x1xf32> to vector<2x1x1xf32>
    %193 = vector.broadcast %186 : vector<2x1x1xf32> to vector<2x32x32xf32>
    %194 = arith.mulf %193, %176 : vector<2x32x32xf32>
    %195 = vector.broadcast %188 : vector<2x1x1xf32> to vector<2x32x32xf32>
    %196 = arith.addf %194, %195 : vector<2x32x32xf32>
    %cst_164 = arith.constant 1.000000e+00 : f32
    %197 = vector.broadcast %cst_164 : f32 to vector<2x32x32xf32>
    %198 = arith.addf %196, %197 : vector<2x32x32xf32>
    %cst_165 = arith.constant 3.200000e+01 : f32
    %199 = vector.broadcast %cst_165 : f32 to vector<2x32x32xf32>
    %200 = arith.mulf %198, %199 : vector<2x32x32xf32>
    %cst_166 = arith.constant 1.000000e+00 : f32
    %201 = vector.broadcast %cst_166 : f32 to vector<2x32x32xf32>
    %202 = arith.subf %200, %201 : vector<2x32x32xf32>
    %cst_167 = arith.constant 5.000000e-01 : f32
    %203 = vector.broadcast %cst_167 : f32 to vector<2x32x32xf32>
    %204 = arith.mulf %202, %203 : vector<2x32x32xf32>
    %205 = vector.broadcast %190 : vector<2x1x1xf32> to vector<2x32x32xf32>
    %206 = arith.mulf %205, %184 : vector<2x32x32xf32>
    %207 = vector.broadcast %192 : vector<2x1x1xf32> to vector<2x32x32xf32>
    %208 = arith.addf %206, %207 : vector<2x32x32xf32>
    %cst_168 = arith.constant 1.000000e+00 : f32
    %209 = vector.broadcast %cst_168 : f32 to vector<2x32x32xf32>
    %210 = arith.addf %208, %209 : vector<2x32x32xf32>
    %cst_169 = arith.constant 3.200000e+01 : f32
    %211 = vector.broadcast %cst_169 : f32 to vector<2x32x32xf32>
    %212 = arith.mulf %210, %211 : vector<2x32x32xf32>
    %cst_170 = arith.constant 1.000000e+00 : f32
    %213 = vector.broadcast %cst_170 : f32 to vector<2x32x32xf32>
    %214 = arith.subf %212, %213 : vector<2x32x32xf32>
    %cst_171 = arith.constant 5.000000e-01 : f32
    %215 = vector.broadcast %cst_171 : f32 to vector<2x32x32xf32>
    %216 = arith.mulf %214, %215 : vector<2x32x32xf32>
    %217 = arith.subf %204, %164 : vector<2x32x32xf32>
    %218 = math.absf %217 : vector<2x32x32xf32>
    %cst_172 = arith.constant 1.000000e+00 : f32
    %219 = vector.broadcast %cst_172 : f32 to vector<2x32x32xf32>
    %220 = arith.subf %219, %218 : vector<2x32x32xf32>
    %cst_173 = arith.constant 0.000000e+00 : f32
    %221 = vector.broadcast %cst_173 : f32 to vector<2x32x32xf32>
    %222 = arith.maximumf %220, %221 : vector<2x32x32xf32>
    %223 = arith.subf %216, %168 : vector<2x32x32xf32>
    %224 = math.absf %223 : vector<2x32x32xf32>
    %cst_174 = arith.constant 1.000000e+00 : f32
    %225 = vector.broadcast %cst_174 : f32 to vector<2x32x32xf32>
    %226 = arith.subf %225, %224 : vector<2x32x32xf32>
    %cst_175 = arith.constant 0.000000e+00 : f32
    %227 = vector.broadcast %cst_175 : f32 to vector<2x32x32xf32>
    %228 = arith.maximumf %226, %227 : vector<2x32x32xf32>
    "tpu.trace_start"() <{level = 10 : i32, message = "bmw,bwv->bmv"}> : () -> ()
    %cst_176 = arith.constant dense<0.000000e+00> : vector<2x32x32xf32>
    %229 = tpu.matmul %160, %222, %cst_176 {dimension_numbers = #tpu.dot_dimension_numbers<[2], [1], [1], [2], [0, 0, 0, 1, 1, 2], [0], [0]>} : vector<2x32x32xf32>, vector<2x32x32xf32>, vector<2x32x32xf32> -> vector<2x32x32xf32>
    "tpu.trace_stop"() : () -> ()
    "tpu.trace_start"() <{level = 10 : i32, message = "bij,bjv->biv"}> : () -> ()
    %cst_177 = arith.constant dense<0.000000e+00> : vector<2x32x32xf32>
    %230 = tpu.matmul %228, %229, %cst_177 {dimension_numbers = #tpu.dot_dimension_numbers<[2], [1], [1], [2], [0, 0, 0, 1, 1, 2], [0], [0]>} : vector<2x32x32xf32>, vector<2x32x32xf32>, vector<2x32x32xf32> -> vector<2x32x32xf32>
    "tpu.trace_stop"() : () -> ()
    %c0_178 = arith.constant 0 : index
    %c0_179 = arith.constant 0 : index
    %c0_180 = arith.constant 0 : index
    %c0_181 = arith.constant 0 : index
    %231 = vector.load %arg19[%c0_178, %c0_179, %c0_180, %c0_181] : memref<2x3x32x32xf32, #tpu.memory_space<vmem>>, vector<2x1x32x32xf32>
    %232 = vector.shape_cast %231 : vector<2x1x32x32xf32> to vector<2x32x32xf32>
    %233 = vector.shape_cast %230 : vector<2x32x32xf32> to vector<2x1x32x32xf32>
    tpu.vector_store %arg19[%c0_178, %c0_179, %c0_180, %c0_181], %233 {strides = array<i32>} : memref<2x3x32x32xf32, #tpu.memory_space<vmem>>, vector<2x1x32x32xf32>,
    %234 = vector.extract_strided_slice %158 {offsets = [0, 4], sizes = [2, 1], strides = [1, 1]} : vector<2x8xf32> to vector<2x1xf32>
    %235 = vector.shape_cast %234 : vector<2x1xf32> to vector<2x1x1xf32>
    %236 = vector.extract_strided_slice %158 {offsets = [0, 5], sizes = [2, 1], strides = [1, 1]} : vector<2x8xf32> to vector<2x1xf32>
    %237 = vector.shape_cast %236 : vector<2x1xf32> to vector<2x1x1xf32>
    %238 = vector.extract_strided_slice %158 {offsets = [0, 6], sizes = [2, 1], strides = [1, 1]} : vector<2x8xf32> to vector<2x1xf32>
    %239 = vector.shape_cast %238 : vector<2x1xf32> to vector<2x1x1xf32>
    %240 = vector.extract_strided_slice %158 {offsets = [0, 7], sizes = [2, 1], strides = [1, 1]} : vector<2x8xf32> to vector<2x1xf32>
    %241 = vector.shape_cast %240 : vector<2x1xf32> to vector<2x1x1xf32>
    %242 = vector.broadcast %235 : vector<2x1x1xf32> to vector<2x32x32xf32>
    %243 = arith.mulf %242, %176 : vector<2x32x32xf32>
    %244 = vector.broadcast %237 : vector<2x1x1xf32> to vector<2x32x32xf32>
    %245 = arith.addf %243, %244 : vector<2x32x32xf32>
    %cst_182 = arith.constant 1.000000e+00 : f32
    %246 = vector.broadcast %cst_182 : f32 to vector<2x32x32xf32>
    %247 = arith.addf %245, %246 : vector<2x32x32xf32>
    %cst_183 = arith.constant 3.200000e+01 : f32
    %248 = vector.broadcast %cst_183 : f32 to vector<2x32x32xf32>
    %249 = arith.mulf %247, %248 : vector<2x32x32xf32>
    %cst_184 = arith.constant 1.000000e+00 : f32
    %250 = vector.broadcast %cst_184 : f32 to vector<2x32x32xf32>
    %251 = arith.subf %249, %250 : vector<2x32x32xf32>
    %cst_185 = arith.constant 5.000000e-01 : f32
    %252 = vector.broadcast %cst_185 : f32 to vector<2x32x32xf32>
    %253 = arith.mulf %251, %252 : vector<2x32x32xf32>
    %254 = vector.broadcast %239 : vector<2x1x1xf32> to vector<2x32x32xf32>
    %255 = arith.mulf %254, %184 : vector<2x32x32xf32>
    %256 = vector.broadcast %241 : vector<2x1x1xf32> to vector<2x32x32xf32>
    %257 = arith.addf %255, %256 : vector<2x32x32xf32>
    %cst_186 = arith.constant 1.000000e+00 : f32
    %258 = vector.broadcast %cst_186 : f32 to vector<2x32x32xf32>
    %259 = arith.addf %257, %258 : vector<2x32x32xf32>
    %cst_187 = arith.constant 3.200000e+01 : f32
    %260 = vector.broadcast %cst_187 : f32 to vector<2x32x32xf32>
    %261 = arith.mulf %259, %260 : vector<2x32x32xf32>
    %cst_188 = arith.constant 1.000000e+00 : f32
    %262 = vector.broadcast %cst_188 : f32 to vector<2x32x32xf32>
    %263 = arith.subf %261, %262 : vector<2x32x32xf32>
    %cst_189 = arith.constant 5.000000e-01 : f32
    %264 = vector.broadcast %cst_189 : f32 to vector<2x32x32xf32>
    %265 = arith.mulf %263, %264 : vector<2x32x32xf32>
    %266 = arith.subf %253, %164 : vector<2x32x32xf32>
    %267 = math.absf %266 : vector<2x32x32xf32>
    %cst_190 = arith.constant 1.000000e+00 : f32
    %268 = vector.broadcast %cst_190 : f32 to vector<2x32x32xf32>
    %269 = arith.subf %268, %267 : vector<2x32x32xf32>
    %cst_191 = arith.constant 0.000000e+00 : f32
    %270 = vector.broadcast %cst_191 : f32 to vector<2x32x32xf32>
    %271 = arith.maximumf %269, %270 : vector<2x32x32xf32>
    %272 = arith.subf %265, %168 : vector<2x32x32xf32>
    %273 = math.absf %272 : vector<2x32x32xf32>
    %cst_192 = arith.constant 1.000000e+00 : f32
    %274 = vector.broadcast %cst_192 : f32 to vector<2x32x32xf32>
    %275 = arith.subf %274, %273 : vector<2x32x32xf32>
    %cst_193 = arith.constant 0.000000e+00 : f32
    %276 = vector.broadcast %cst_193 : f32 to vector<2x32x32xf32>
    %277 = arith.maximumf %275, %276 : vector<2x32x32xf32>
    "tpu.trace_start"() <{level = 10 : i32, message = "bmw,bwv->bmv"}> : () -> ()
    %cst_194 = arith.constant dense<0.000000e+00> : vector<2x32x32xf32>
    %278 = tpu.matmul %160, %271, %cst_194 {dimension_numbers = #tpu.dot_dimension_numbers<[2], [1], [1], [2], [0, 0, 0, 1, 1, 2], [0], [0]>} : vector<2x32x32xf32>, vector<2x32x32xf32>, vector<2x32x32xf32> -> vector<2x32x32xf32>
    "tpu.trace_stop"() : () -> ()
    "tpu.trace_start"() <{level = 10 : i32, message = "bij,bjv->biv"}> : () -> ()
    %cst_195 = arith.constant dense<0.000000e+00> : vector<2x32x32xf32>
    %279 = tpu.matmul %277, %278, %cst_195 {dimension_numbers = #tpu.dot_dimension_numbers<[2], [1], [1], [2], [0, 0, 0, 1, 1, 2], [0], [0]>} : vector<2x32x32xf32>, vector<2x32x32xf32>, vector<2x32x32xf32> -> vector<2x32x32xf32>
    "tpu.trace_stop"() : () -> ()
    %c0_196 = arith.constant 0 : index
    %c1_197 = arith.constant 1 : index
    %c0_198 = arith.constant 0 : index
    %c0_199 = arith.constant 0 : index
    %280 = vector.load %arg19[%c0_196, %c1_197, %c0_198, %c0_199] : memref<2x3x32x32xf32, #tpu.memory_space<vmem>>, vector<2x1x32x32xf32>
    %281 = vector.shape_cast %280 : vector<2x1x32x32xf32> to vector<2x32x32xf32>
    %282 = vector.shape_cast %279 : vector<2x32x32xf32> to vector<2x1x32x32xf32>
    tpu.vector_store %arg19[%c0_196, %c1_197, %c0_198, %c0_199], %282 {strides = array<i32>} : memref<2x3x32x32xf32, #tpu.memory_space<vmem>>, vector<2x1x32x32xf32>,
    %c0_200 = arith.constant 0 : index
    %c0_201 = arith.constant 0 : index
    %c0_202 = arith.constant 0 : index
    %c0_203 = arith.constant 0 : index
    %283 = vector.load %arg1[%c0_200, %c0_201, %c0_202, %c0_203] : memref<2x1x32x32xf32, #tpu.memory_space<vmem>>, vector<2x1x32x32xf32>
    %c0_204 = arith.constant 0 : index
    %c2_205 = arith.constant 2 : index
    %c0_206 = arith.constant 0 : index
    %c0_207 = arith.constant 0 : index
    %284 = vector.load %arg19[%c0_204, %c2_205, %c0_206, %c0_207] : memref<2x3x32x32xf32, #tpu.memory_space<vmem>>, vector<2x1x32x32xf32>
    tpu.vector_store %arg19[%c0_204, %c2_205, %c0_206, %c0_207], %283 {strides = array<i32>} : memref<2x3x32x32xf32, #tpu.memory_space<vmem>>, vector<2x1x32x32xf32>,
    return
  }
  func.func @transform_0(%arg0: i32) -> (i32, i32, i32, i32) {
    %c0_i32 = arith.constant 0 : i32
    %c0_i32_0 = arith.constant 0 : i32
    %c0_i32_1 = arith.constant 0 : i32
    %c0_i32_2 = arith.constant 0 : i32
    return %arg0, %c0_i32, %c0_i32_0, %c0_i32_1 : i32, i32, i32, i32
  }
  func.func @transform_1(%arg0: i32) -> (i32, i32) {
    %c0_i32 = arith.constant 0 : i32
    %c0_i32_0 = arith.constant 0 : i32
    %c0_i32_1 = arith.constant 0 : i32
    return %c0_i32, %c0_i32_0 : i32, i32
  }
  func.func @transform_2(%arg0: i32) -> (i32, i32) {
    %c0_i32 = arith.constant 0 : i32
    %c0_i32_0 = arith.constant 0 : i32
    %c0_i32_1 = arith.constant 0 : i32
    return %c0_i32, %c0_i32_0 : i32, i32
  }
  func.func @transform_3(%arg0: i32) -> (i32, i32) {
    %c0_i32 = arith.constant 0 : i32
    %c0_i32_0 = arith.constant 0 : i32
    %c0_i32_1 = arith.constant 0 : i32
    return %c0_i32, %c0_i32_0 : i32, i32
  }
  func.func @transform_4(%arg0: i32) -> (i32, i32) {
    %c0_i32 = arith.constant 0 : i32
    %c0_i32_0 = arith.constant 0 : i32
    %c0_i32_1 = arith.constant 0 : i32
    return %c0_i32, %c0_i32_0 : i32, i32
  }
  func.func @transform_5(%arg0: i32) -> (i32, i32) {
    %c0_i32 = arith.constant 0 : i32
    %c0_i32_0 = arith.constant 0 : i32
    %c0_i32_1 = arith.constant 0 : i32
    return %c0_i32, %c0_i32_0 : i32, i32
  }
  func.func @transform_6(%arg0: i32) -> (i32, i32) {
    %c0_i32 = arith.constant 0 : i32
    %c0_i32_0 = arith.constant 0 : i32
    %c0_i32_1 = arith.constant 0 : i32
    return %c0_i32, %c0_i32_0 : i32, i32
  }
  func.func @transform_7(%arg0: i32) -> (i32, i32) {
    %c0_i32 = arith.constant 0 : i32
    %c0_i32_0 = arith.constant 0 : i32
    %c0_i32_1 = arith.constant 0 : i32
    return %c0_i32, %c0_i32_0 : i32, i32
  }
  func.func @transform_8(%arg0: i32) -> (i32, i32) {
    %c0_i32 = arith.constant 0 : i32
    %c0_i32_0 = arith.constant 0 : i32
    %c0_i32_1 = arith.constant 0 : i32
    return %c0_i32, %c0_i32_0 : i32, i32
  }
  func.func @transform_9(%arg0: i32) -> (i32, i32) {
    %c0_i32 = arith.constant 0 : i32
    %c0_i32_0 = arith.constant 0 : i32
    %c0_i32_1 = arith.constant 0 : i32
    return %c0_i32, %c0_i32_0 : i32, i32
  }
  func.func @transform_10(%arg0: i32) -> (i32, i32) {
    %c0_i32 = arith.constant 0 : i32
    %c0_i32_0 = arith.constant 0 : i32
    %c0_i32_1 = arith.constant 0 : i32
    return %c0_i32, %c0_i32_0 : i32, i32
  }
  func.func @transform_11(%arg0: i32) -> (i32, i32) {
    %c0_i32 = arith.constant 0 : i32
    %c0_i32_0 = arith.constant 0 : i32
    %c0_i32_1 = arith.constant 0 : i32
    return %c0_i32, %c0_i32_0 : i32, i32
  }
  func.func @transform_12(%arg0: i32) -> (i32, i32) {
    %c0_i32 = arith.constant 0 : i32
    %c0_i32_0 = arith.constant 0 : i32
    %c0_i32_1 = arith.constant 0 : i32
    return %c0_i32, %c0_i32_0 : i32, i32
  }
  func.func @transform_13(%arg0: i32) -> (i32, i32) {
    %c0_i32 = arith.constant 0 : i32
    %c0_i32_0 = arith.constant 0 : i32
    %c0_i32_1 = arith.constant 0 : i32
    return %c0_i32, %c0_i32_0 : i32, i32
  }
  func.func @transform_14(%arg0: i32) -> (i32, i32, i32) {
    %c0_i32 = arith.constant 0 : i32
    %c0_i32_0 = arith.constant 0 : i32
    %c0_i32_1 = arith.constant 0 : i32
    %c0_i32_2 = arith.constant 0 : i32
    return %c0_i32, %c0_i32_0, %c0_i32_1 : i32, i32, i32
  }
  func.func @transform_15(%arg0: i32) -> (i32, i32) {
    %c0_i32 = arith.constant 0 : i32
    %c0_i32_0 = arith.constant 0 : i32
    %c0_i32_1 = arith.constant 0 : i32
    return %c0_i32, %c0_i32_0 : i32, i32
  }
  func.func @transform_16(%arg0: i32) -> (i32, i32) {
    %c0_i32 = arith.constant 0 : i32
    %c0_i32_0 = arith.constant 0 : i32
    %c0_i32_1 = arith.constant 0 : i32
    return %c0_i32, %c0_i32_0 : i32, i32
  }
  func.func @transform_17(%arg0: i32) -> (i32, i32) {
    %c0_i32 = arith.constant 0 : i32
    %c0_i32_0 = arith.constant 0 : i32
    %c0_i32_1 = arith.constant 0 : i32
    return %c0_i32, %c0_i32_0 : i32, i32
  }
  func.func @transform_18(%arg0: i32) -> (i32, i32, i32, i32) {
    %c0_i32 = arith.constant 0 : i32
    %c0_i32_0 = arith.constant 0 : i32
    %c0_i32_1 = arith.constant 0 : i32
    %c0_i32_2 = arith.constant 0 : i32
    return %arg0, %c0_i32, %c0_i32_0, %c0_i32_1 : i32, i32, i32, i32
  }
}

</mosaic_0001>

<bundles_post_ra>
// kernel: stn_based_net_forward.1
= control target key start
LH: loop header
LB: loop body
LE: loop exit
PB: predicated region body
PF: predicated region fallthrough
CT: control target
= control target key end

     0   :  { %s7392_s0 = inlined_call_operand.vmem [shape: f32[2,1,32,32], index: 0, kind: input, shape index: {}]   ;;  %s7393_s1 = inlined_call_operand.vmem [shape: bf16[224,208], index: 1, kind: input, shape index: {}]   ;;  %s7394_s2 = inlined_call_operand.vmem [shape: f32[1,208], index: 2, kind: input, shape index: {}]   ;;  %s7395_s3 = inlined_call_operand.vmem [shape: f32[26,52], index: 3, kind: input, shape index: {}]   ;;  %s7396_s4 = inlined_call_operand.vmem [shape: f32[26,52], index: 4, kind: input, shape index: {}]   ;;  %s7397_s5 = inlined_call_operand.vmem [shape: f32[208,104], index: 5, kind: input, shape index: {}]   ;;  %s7398_s6 = inlined_call_operand.vmem [shape: f32[208,104], index: 6, kind: input, shape index: {}]   ;;  %s7399_s7 = inlined_call_operand.vmem [shape: bf16[520,144], index: 7, kind: input, shape index: {}]   ;;  %s7400_s8 = inlined_call_operand.vmem [shape: f32[1,144], index: 8, kind: input, shape index: {}]   ;;  %s7401_s9 = inlined_call_operand.vmem [shape: f32[8,18], index: 9, kind: input, shape index: {}]   ;;  %s7402_s10 = inlined_call_operand.vmem [shape: f32[8,18], index: 10, kind: input, shape index: {}]   ;;  %s7403_s11 = inlined_call_operand.vmem [shape: f32[144,64], index: 11, kind: input, shape index: {}]   ;;  %s7404_s12 = inlined_call_operand.vmem [shape: f32[144,64], index: 12, kind: input, shape index: {}]   ;;  %s7405_s13 = inlined_call_operand.vmem [shape: f32[8,8], index: 13, kind: input, shape index: {}]   ;;  %s7406_s14 = inlined_call_operand.vmem [shape: bf16[4,64,128], index: 14, kind: input, shape index: {}]   ;;  %s7407_s15 = inlined_call_operand.vmem [shape: f32[1,128], index: 15, kind: input, shape index: {}]   ;;  %s7408_s16 = inlined_call_operand.vmem [shape: f32[128,8], index: 16, kind: input, shape index: {}]   ;;  %s7409_s17 = inlined_call_operand.vmem [shape: f32[1,8], index: 17, kind: input, shape index: {}]   ;;  %s7410_s18 = inlined_call_operand.hbm [shape: f32[2,3,32,32], index: 18, kind: output, shape index: {}]  }
   0x1   :  { %7433 = sst [smem:[#allocation7_spill]] %s7392_s0 }
   0x2   :  { %7434 = sst [smem:[#allocation8_spill]] %s7393_s1 }
   0x3   :  { %7435 = sst [smem:[#allocation9_spill]] %s7394_s2 }
   0x4   :  { %s7436_s29 = sld [smem:[#allocation7_spill]]  ;;  %s5506_s22 = smov 64   ;;  %vm81_vm0 = vcmask 257024   ;;  %vm85_vm1 = vcmask 253952   ;;  %vm294_vm2 = vcmask 1040384   ;;  %vm295_vm3 = vcmask 1044484  }
   0x5   :  { %s5507_s2 = smov 32   ;;  %s5508_s27 = smov 96   ;;  %vm311_vm4 = vcmask 257025   ;;  %vm5838_vm5 = vmor %vm294_vm2, %vm295_vm3  ;;  %vm315_vm6 = vcmask 254976  }
   0x6   :  { %s7437_s1 = sld [smem:[#allocation8_spill]] }
   0xa   :  { %v121_v0 = vld [vmem:[%s7436_s29 + $0x2] sm:$0xff]  ;;  %v122_v2 = vld [vmem:[%s7436_s29 + $0xa] sm:$0xff]  ;;  %v90_v18 = vld [vmem:[%s7436_s29 + $0x19] sm:$0x3] }
   0xb   :  { %v87_v1 = vld [vmem:[%s7436_s29 + $0x1] sm:$0xff]  ;;  %v4644_v3 = vpack.c.bf16 %v121_v0, %v121_v0  ;;  %v88_v5 = vld [vmem:[%s7436_s29 + $0x9] sm:$0xff]  ;;  %v4645_v6 = vpack.c.bf16 %v122_v2, %v122_v2  ;;  %v89_v19 = vld [vmem:[%s7436_s29 + $0x11] sm:$0xff]  ;;  %v4643_v26 = vpack.c.bf16 %v90_v18, %v90_v18 }
   0xc   :  { %v4640_v4 = vpack.c.bf16 %v87_v1, %v87_v1  ;;  %v4641_v7 = vpack.c.bf16 %v88_v5, %v88_v5  ;;  %v214_v8 = vld [vmem:[%s7436_s29 + $0xd] sm:$0xff]  ;;  %v213_v9 = vld [vmem:[%s7436_s29 + $0x5] sm:$0xff]  ;;  %v4642_v27 = vpack.c.bf16 %v89_v19, %v89_v19  ;;  %v215_v32 = vld [vmem:[%s7436_s29 + $0x15] sm:$0xff] }
   0xd   :  { %137 = vrot.lane.b32.xlu1 %v4644_v3, %s5506_s22  ;;  %v4657_v10 = vpack.c.bf16 %v214_v8, %v214_v8  ;;  %v4656_v11 = vpack.c.bf16 %v213_v9, %v213_v9  ;;  %v156_v12 = vld [vmem:[%s7436_s29 + $0xb] sm:$0xff]  ;;  %v155_v13 = vld [vmem:[%s7436_s29 + $0x3] sm:$0xff]  ;;  %v5314_v25 = vld [vmem:[%s7437_s1 + $0x14] ss:$8 sps:$4 sm:$0xff]   ;;  %v4658_v39 = vpack.c.bf16 %v215_v32, %v215_v32 }
   0xe   :  { %103 = vrot.lane.b32.xlu0 %v4640_v4, %s5507_s2  ;;  %v4649_v14 = vpack.c.bf16 %v156_v12, %v156_v12  ;;  %v4648_v15 = vpack.c.bf16 %v155_v13, %v155_v13  ;;  %v246_v16 = vld [vmem:[%s7436_s29 + $0xe] sm:$0xff]  ;;  %v245_v17 = vld [vmem:[%s7436_s29 + $0x6] sm:$0xff]  ;;  %v124_v35 = vld [vmem:[%s7436_s29 + $0x1a] sm:$0x3] }
   0xf   :  { %v4661_v20 = vpack.c.bf16 %v246_v16, %v246_v16  ;;  %v4660_v21 = vpack.c.bf16 %v245_v17, %v245_v17  ;;  %v4326_v22 = vld [vmem:[%s7436_s29 + $0x21] sm:$0xff]  ;;  %v123_v28 = vld [vmem:[%s7436_s29 + $0x12] sm:$0xff]  ;;  %v4647_v40 = vpack.c.bf16 %v124_v35, %v124_v35  ;;  %v216_v42 = vld [vmem:[%s7436_s29 + $0x1d] sm:$0x3] }
  0x10   :  { %v5311_v23 = vld [vmem:[%s7437_s1 + $0x4] ss:$8 sps:$4 sm:$0xff]   ;;  %v5313_v24 = vld [vmem:[%s7437_s1] ss:$8 sps:$4 sm:$0xff]   ;;  %v4668_v29 = vpack.c.bf16 %v4326_v22, %v4326_v22  ;;  %v5316_v30 = vld [vmem:[%s7437_s1 + $0x10] ss:$8 sps:$4 sm:$0xff]   ;;  %v4646_v33 = vpack.c.bf16 %v123_v28, %v123_v28  ;;  %v4659_v49 = vpack.c.bf16 %v216_v42, %v216_v42 }
  0x11   :  { %139 = vrot.lane.b32.xlu1 %v4645_v6, %s5506_s22  ;;  %800 = vmatprep.subr.bf16.mxu0 %v5311_v23  ;;  %v5317_v31 = vld [vmem:[%s7437_s1 + $0x24] ss:$8 sps:$4 sm:$0xff]   ;;  %v5319_v37 = vld [vmem:[%s7437_s1 + $0x20] ss:$8 sps:$4 sm:$0xff]   ;;  %v5320_v38 = vld [vmem:[%s7437_s1 + $0x34] ss:$8 sps:$4 sm:$0xff]  }
  0x12   :  { %105 = vrot.lane.b32.xlu0 %v4641_v7, %s5507_s2  ;;  %801 = vmatpush1.bf16.msra.mxu0 %v5313_v24  ;;  %v5694_v34 = vrot.slane %v4668_v29, 7  ;;  %v4334_v36 = vld [vmem:[%s7436_s29 + $0x22] sm:$0xff]  ;;  %v5322_v45 = vld [vmem:[%s7437_s1 + $0x30] ss:$8 sps:$4 sm:$0xff]   ;;  %v5326_v60 = vld [vmem:[%s7437_s1 + $0x54] ss:$8 sps:$4 sm:$0xff]  }
  0x13   :  { %802 = vmatprep.subr.bf16.mxu0 %v5314_v25  ;;  %v4672_v41 = vpack.c.bf16 %v4334_v36, %v4334_v36  ;;  %v61_v43 = vld [vmem:[%s7436_s29] sm:$0xff]  ;;  %v62_v48 = vld [vmem:[%s7436_s29 + $0x8] sm:$0xff]  ;;  %v157_v57 = vld [vmem:[%s7436_s29 + $0x13] sm:$0xff] }
  0x14   :  { %v4358_v44 = vld [vmem:[%s7436_s29 + $0x25] sm:$0xff]  ;;  %v4636_v46 = vpack.c.bf16 %v61_v43, %v61_v43  ;;  %v4637_v50 = vpack.c.bf16 %v62_v48, %v62_v48  ;;  %v5750_v59 = vld [vmem:[%s7436_s29 + $0x16] sm:$0xff]  ;;  %v4650_v1 = vpack.c.bf16 %v157_v57, %v157_v57 }
  0x15   :  { %231 = vrot.lane.b32.xlu1 %v4657_v10, %s5507_s2  ;;  %v5323_v47 = vld [vmem:[%s7437_s1 + $0x44] ss:$8 sps:$4 sm:$0xff]   ;;  %v5738_v53 = vrot.slane %v4672_v41, 7  ;;  %v4684_v54 = vpack.c.bf16 %v4358_v44, %v4358_v44  ;;  %v5325_v58 = vld [vmem:[%s7437_s1 + $0x40] ss:$8 sps:$4 sm:$0xff]   ;;  %v63_v0 = vld [vmem:[%s7436_s29 + $0x10] sm:$0xff]  ;;  %v4662_v10 = vpack.c.bf16 %v5750_v59, %v5750_v59 }
  0x16   :  { %229 = vrot.lane.b32.xlu0 %v4656_v11, %s5507_s2  ;;  %803 = vmatpush1.bf16.msra.mxu0 %v5316_v30  ;;  %82 = vst.msk [vmem:[#allocation2] sm:$0xf] %vm81_vm0, %v4636_v46  ;;  %v190_v51 = vld [vmem:[%s7436_s29 + $0xc] sm:$0xff]  ;;  %v189_v52 = vld [vmem:[%s7436_s29 + $0x4] sm:$0xff]  ;;  %83 = vst.msk [vmem:[#allocation2 + $0x8] sm:$0xf] %vm81_vm0, %v4637_v50  ;;  %v4638_v6 = vpack.c.bf16 %v63_v0, %v63_v0 }
  0x17   :  { %804 = vmatprep.subr.bf16.mxu0 %v5317_v31  ;;  %v4653_v55 = vpack.c.bf16 %v190_v51, %v190_v51  ;;  %v4652_v56 = vpack.c.bf16 %v189_v52, %v189_v52  ;;  %v5760_v61 = vld [vmem:[%s7436_s29 + $0x1b] sm:$0x3]  ;;  %v5765_v62 = vld [vmem:[%s7436_s29 + $0x23] sm:$0xff]  ;;  %v64_v63 = vld [vmem:[%s7436_s29 + $0x18] sm:$0x3]  ;;  %v5776_v2 = vrot.slane %v4684_v54, 7 }
  0x18   :  { %v5781_v3 = vld [vmem:[%s7436_s29 + $0x29] sm:$0xff]  ;;  %v4639_v5 = vpack.c.bf16 %v64_v63, %v64_v63  ;;  %v4318_v8 = vld [vmem:[%s7436_s29 + $0x20] sm:$0xff]  ;;  %v191_v9 = vld [vmem:[%s7436_s29 + $0x14] sm:$0xff]  ;;  %84 = vst.msk [vmem:[#allocation2 + $0x10] sm:$0xf] %vm81_vm0, %v4638_v6  ;;  %v4651_v24 = vpack.c.bf16 %v5760_v61, %v5760_v61  ;;  %v4676_v25 = vpack.c.bf16 %v5765_v62, %v5765_v62  ;;  %v378_v63 = vrot.slane %v5738_v53, 4 }
  0x19   :  { %173 = vrot.lane.b32.xlu1 %v4649_v14, %s5508_s27  ;;  %210 = vst.msk [vmem:[#allocation2 + $0xc] sm:$0xf] %vm81_vm0, %v4653_v55  ;;  %209 = vst.msk [vmem:[#allocation2 + $0x4] sm:$0xf] %vm81_vm0, %v4652_v56  ;;  %v5328_v4 = vld [vmem:[%s7437_s1 + $0x50] ss:$8 sps:$4 sm:$0xff]   ;;  %v4664_v13 = vpack.c.bf16 %v4318_v8, %v4318_v8  ;;  %v4654_v14 = vpack.c.bf16 %v191_v9, %v191_v9 }
  0x1a   :  { %171 = vrot.lane.b32.xlu0 %v4648_v15, %s5508_s27  ;;  %805 = vmatpush1.bf16.msra.mxu0 %v5319_v37  ;;  %v5329_v7 = vld [vmem:[%s7437_s1 + $0x64] ss:$8 sps:$4 sm:$0xff]   ;;  %v5800_v11 = vld [vmem:[%s7436_s29 + $0x1e] sm:$0x3]  ;;  %86 = vst.msk [vmem:[#allocation2 + $0x18] sm:$0x1] %vm85_vm1, %v4639_v5 }
  0x1b   :  { %806 = vmatprep.subr.bf16.mxu0 %v5320_v38  ;;  %v5805_v12 = vld [vmem:[%s7436_s29 + $0x26] sm:$0xff]  ;;  %v192_v15 = vld [vmem:[%s7436_s29 + $0x1c] sm:$0x3]  ;;  %v4320_v23 = vld [vmem:[%s7436_s29 + $0x30] sm:$0xff]  ;;  %v297_v31 = vrot.slane %v4664_v13, 7  ;;  %v334_v38 = vrot.slane %v5694_v34, 4  ;;  %v4663_v43 = vpack.c.bf16 %v5800_v11, %v5800_v11 }
  0x1c   :  { %v4350_v16 = vld [vmem:[%s7436_s29 + $0x24] sm:$0xff]  ;;  %v5850_v28 = vld [vmem:[%s7437_s1 + $0x70] sm:$0xff]  ;;  %v589_v29 = vld [vmem:[%s7437_s1 + $0x78] sm:$0xff]  ;;  %211 = vst.msk [vmem:[#allocation2 + $0x14] sm:$0xf] %vm81_vm0, %v4654_v14  ;;  %v4666_v32 = vpack.c.bf16 %v4320_v23, %v4320_v23  ;;  %v4688_v44 = vpack.c.bf16 %v5805_v12, %v5805_v12 }
  0x1d   :  { %263 = vrot.lane.b32.xlu1 %v4661_v20, %s5506_s22  ;;  %v4319_v17 = vld [vmem:[%s7436_s29 + $0x28] sm:$0xff]  ;;  %v4655_v20 = vpack.c.bf16 %v192_v15, %v192_v15  ;;  %v5332_v30 = vld [vmem:[%s7437_s1 + $0x74] ss:$8 sps:$4 sm:$0xff]   ;;  %312 = vst.msk [vmem:[#allocation2 + $0x18] sm:$0xe] %vm311_vm4, %v297_v31  ;;  %v4396_v57 = vcombine.low %v5850_v28, %v589_v29  ;;  %v500_v15 = vrot.slane %v5776_v2, 4 }
  0x1e   :  { %261 = vrot.lane.b32.xlu0 %v4660_v21, %s5506_s22  ;;  %807 = vmatpush1.bf16.msra.mxu0 %v5322_v45  ;;  %v5821_v18 = vld [vmem:[%s7436_s29 + $0x2a] sm:$0xff]  ;;  %v4680_v21 = vpack.c.bf16 %v4350_v16, %v4350_v16  ;;  %v4665_v22 = vpack.c.bf16 %v4319_v17, %v4319_v17  ;;  %v5870_v41 = vrot.slane %v4666_v32, 7  ;;  %v4352_v59 = vld [vmem:[%s7436_s29 + $0x34] sm:$0xff]  ;;  %v5914_v0 = vrot.slane %v4688_v44, 7 }
  0x1f   :  { %808 = vmatprep.subr.bf16.mxu0 %v5323_v47  ;;  %v5331_v19 = vld [vmem:[%s7437_s1 + $0x60] ss:$8 sps:$4 sm:$0xff]   ;;  %212 = vst.msk [vmem:[#allocation2 + $0x1c] sm:$0x1] %vm85_vm1, %v4655_v20  ;;  %v4351_v37 = vld [vmem:[%s7436_s29 + $0x2c] sm:$0xff]  ;;  %v5882_v47 = vrot.slane %v4676_v25, 7  ;;  %v4673_v48 = vpack.c.bf16 %v5821_v18, %v5821_v18  ;;  %v4682_v62 = vpack.c.bf16 %v4352_v59, %v4352_v59 }
  0x20   :  { %v465_v35 = vrot.slane %v4680_v21, 7  ;;  %v299_v36 = vrot.slane %v4665_v22, 7  ;;  %v4681_v42 = vpack.c.bf16 %v4351_v37, %v4351_v37  ;;  %v591_v50 = vld [vmem:[%s7437_s1 + $0x88] sm:$0xff]  ;;  %v4360_v5 = vld [vmem:[%s7436_s29 + $0x35] sm:$0xff]  ;;  %v594_v21 = vld [vmem:[%s7437_s1 + $0xa0] sm:$0xff] }
  0x21   :  { %109 = vrot.lane.b32.xlu1 %v4643_v26, %s5507_s2  ;;  %v5334_v51 = vld [vmem:[%s7437_s1 + $0x84] ss:$8 sps:$4 sm:$0xff]   ;;  %v593_v6 = vld [vmem:[%s7437_s1 + $0x98] sm:$0xff]  ;;  %v5932_v9 = vrot.slane %v4682_v62, 7 }
  0x22   :  { %107 = vrot.lane.b32.xlu0 %v4642_v27, %s5507_s2  ;;  %809 = vmatpush1.bf16.msra.mxu0 %v5325_v58  ;;  %v5845_v27 = vld [vmem:[%s7436_s29 + $0x31] sm:$0xff]  ;;  %v466_v45 = vrot.slane %v465_v35, 4  ;;  %479 = vst.msk [vmem:[#allocation2 + $0x1c] sm:$0xe] %vm311_vm4, %v465_v35  ;;  %v301_v46 = vrot.slane %v299_v36, 4  ;;  %v467_v54 = vrot.slane %v4681_v42, 7 }
  0x23   :  { %810 = vmatprep.subr.bf16.mxu0 %v5326_v60  ;;  %v4670_v56 = vpack.c.bf16 %v5845_v27, %v5845_v27  ;;  %v4343_v60 = vld [vmem:[%s7436_s29 + $0x2b] sm:$0xff]  ;;  %v4686_v27 = vpack.c.bf16 %v4360_v5, %v4360_v5  ;;  %v4321_v29 = vld [vmem:[%s7436_s29 + $0x38] sm:$0x3]  ;;  %v4361_v37 = vld [vmem:[%s7436_s29 + $0x3d] sm:$0x3] }
  0x24   :  { %v303_v58 = vsel %vm5838_vm5, %v301_v46, %v5870_v41  ;;  %v468_v61 = vsel %vm5838_vm5, %v466_v45, %v467_v54  ;;  %v469_v8 = vrot.slane %v467_v54, 4  ;;  %v4677_v17 = vpack.c.bf16 %v4343_v60, %v4343_v60  ;;  %v4367_v18 = vld [vmem:[%s7436_s29 + $0x2e] sm:$0xff] }
  0x25   :  { %141 = vrot.lane.b32.xlu1 %v4646_v33, %s5506_s22  ;;  %v4669_v33 = vpack.c.bf16 %v5781_v3, %v5781_v3  ;;  %314 = vst.msk [vmem:[#allocation2 + $0x28] sm:$0xf] %vm81_vm0, %v303_v58  ;;  %480 = vst.msk [vmem:[#allocation2 + $0x24] sm:$0xf] %vm81_vm0, %v468_v61  ;;  %v379_v3 = vrot.slane %v4673_v48, 7  ;;  %v5936_v12 = vrot.slane %v4670_v56, 7  ;;  %v4667_v32 = vpack.c.bf16 %v4321_v29, %v4321_v29 }
  0x26   :  { %343 = vrot.lane.b32.xlu0 %v5694_v34, %s5507_s2  ;;  %811 = vmatpush1.bf16.msra.mxu0 %v5328_v4  ;;  %v4336_v34 = vld [vmem:[%s7436_s29 + $0x32] sm:$0xff]  ;;  %v471_v14 = vsel %vm5838_vm5, %v469_v8, %v5932_v9  ;;  %v595_v22 = vld [vmem:[%s7437_s1 + $0xa8] sm:$0xff]  ;;  %v6002_v45 = vrot.slane %v4686_v27, 7  ;;  %v4353_v48 = vld [vmem:[%s7436_s29 + $0x3c] sm:$0x3]  ;;  %v4687_v60 = vpack.c.bf16 %v4361_v37, %v4361_v37 }
  0x27   :  { %812 = vmatprep.subr.bf16.mxu0 %v5329_v7  ;;  %v335_v55 = vrot.slane %v4669_v33, 7  ;;  %v4674_v4 = vpack.c.bf16 %v4336_v34, %v4336_v34  ;;  %v5336_v7 = vld [vmem:[%s7437_s1 + $0x94] ss:$8 sps:$4 sm:$0xff]   ;;  %481 = vst.msk [vmem:[#allocation2 + $0x2c] sm:$0xf] %vm81_vm0, %v471_v14  ;;  %v381_v20 = vrot.slane %v379_v3, 4 }
  0x28   :  { %v5338_v23 = vld [vmem:[%s7437_s1 + $0xa4] ss:$8 sps:$4 sm:$0xff]   ;;  %v422_v33 = vrot.slane %v5882_v47, 4  ;;  %v596_v42 = vld [vmem:[%s7437_s1 + $0xb0] sm:$0xff]  ;;  %v4369_v56 = vld [vmem:[%s7436_s29 + $0x3e] sm:$0x3] }
  0x29   :  { %233 = vrot.lane.b32.xlu1 %v4658_v39, %s5507_s2  ;;  %v4359_v39 = vld [vmem:[%s7436_s29 + $0x2d] sm:$0xff]  ;;  %v337_v11 = vrot.slane %v335_v55, 4  ;;  %v5968_v25 = vrot.slane %v4674_v4, 7  ;;  %v598_v61 = vld [vmem:[%s7437_s1 + $0xc0] sm:$0xff]  ;;  %v4691_v14 = vpack.c.bf16 %v4369_v56, %v4369_v56 }
  0x2a   :  { %143 = vrot.lane.b32.xlu0 %v4647_v40, %s5506_s22  ;;  %v298_v40 = vrot.slane %v297_v31, 4  ;;  %813 = vmatpush1.bf16.msra.mxu0 %v5331_v19  ;;  %v380_v19 = vsel %vm5838_vm5, %v378_v63, %v379_v3  ;;  %v4368_v31 = vld [vmem:[%s7436_s29 + $0x36] sm:$0xff]  ;;  %v599_v62 = vld [vmem:[%s7437_s1 + $0xc8] sm:$0xff] }
  0x2b   :  { %814 = vmatprep.subr.bf16.mxu0 %v5332_v30  ;;  %v4329_v30 = vld [vmem:[%s7436_s29 + $0x39] sm:$0x3]  ;;  %v5340_v44 = vld [vmem:[%s7437_s1 + $0xb4] ss:$8 sps:$4 sm:$0xff]   ;;  %v383_v34 = vsel %vm5838_vm5, %v381_v20, %v5968_v25  ;;  %v5342_v63 = vld [vmem:[%s7437_s1 + $0xc4] ss:$8 sps:$4 sm:$0xff]   ;;  %v4406_v20 = vcombine.low %v598_v61, %v599_v62 }
  0x2c   :  { %v300_v52 = vsel %vm5838_vm5, %v298_v40, %v299_v36  ;;  %v423_v36 = vrot.slane %v4677_v17, 7  ;;  %v4689_v40 = vpack.c.bf16 %v4367_v18, %v4367_v18  ;;  %v4671_v54 = vpack.c.bf16 %v4329_v30, %v4329_v30  ;;  %v5344_v17 = vld [vmem:[%s7437_s1 + $0xd4] ss:$8 sps:$4 sm:$0xff]  }
  0x2d   :  { %387 = vrot.lane.b32.xlu1 %v5738_v53, %s5506_s22  ;;  %313 = vst.msk [vmem:[#allocation2 + $0x20] sm:$0xf] %vm81_vm0, %v300_v52  ;;  %v592_v53 = vld [vmem:[%s7437_s1 + $0x90] sm:$0xff]  ;;  %v542_v52 = vrot.slane %v5914_v0, 4 }
  0x2e   :  { %235 = vrot.lane.b32.xlu0 %v4659_v49, %s5507_s2  ;;  %v590_v49 = vld [vmem:[%s7437_s1 + $0x80] sm:$0xff]  ;;  %815 = vmatpush1.bf16.msra.mxu0 %v4396_v57  ;;  %v4400_v28 = vcombine.low %v592_v53, %v593_v6  ;;  %v472_v57 = vrot.slane %v5932_v9, 4  ;;  %v424_v58 = vsel %vm5838_vm5, %v422_v33, %v423_v36  ;;  %v425_v59 = vrot.slane %v423_v36, 4 }
  0x2f   :  { %v4398_v13 = vcombine.low %v590_v49, %v591_v50  ;;  %816 = vmatprep.subr.bf16.mxu0 %v5334_v51  ;;  %v4337_v49 = vld [vmem:[%s7436_s29 + $0x3a] sm:$0x3]  ;;  %v4683_v51 = vpack.c.bf16 %v4353_v48, %v4353_v48  ;;  %v543_v3 = vrot.slane %v4689_v40, 7  ;;  %v340_v53 = vrot.slane %v5936_v12, 4 }
  0x31   :  { %175 = vrot.lane.b32.xlu1 %v4650_v1, %s5508_s27  ;;  %v4685_v1 = vpack.c.bf16 %v4359_v39, %v4359_v39  ;;  %v545_v8 = vrot.slane %v543_v3, 4  ;;  %v544_v18 = vsel %vm5838_vm5, %v542_v52, %v543_v3 }
  0x32   :  { %509 = vrot.lane.b32.xlu0 %v5776_v2, %s5507_s2  ;;  %v4344_v2 = vld [vmem:[%s7436_s29 + $0x33] sm:$0xff]  ;;  %817 = vmatpush1.bf16.msra.mxu0 %v4398_v13  ;;  %v507_v13 = vrot.slane %v4687_v60, 7 }
  0x33   :  { %v5942_v16 = vrot.slane %v4685_v1, 7  ;;  %818 = vmatprep.subr.bf16.mxu0 %v5336_v7  ;;  %v4678_v46 = vpack.c.bf16 %v4344_v2, %v4344_v2  ;;  %v341_v7 = vrot.slane %v4671_v54, 7  ;;  %v384_v2 = vrot.slane %v5968_v25, 4 }
  0x35   :  { %265 = vrot.lane.b32.xlu1 %v4662_v10, %s5506_s22  ;;  %v336_v10 = vsel %vm5838_vm5, %v334_v38, %v335_v55  ;;  %v502_v35 = vsel %vm5838_vm5, %v500_v15, %v5942_v16  ;;  %v304_v38 = vrot.slane %v5870_v41, 4  ;;  %v503_v39 = vrot.slane %v5942_v16, 4  ;;  %v600_v15 = vld [vmem:[%s7437_s1 + $0xd0] sm:$0xff]  ;;  %v601_v16 = vld [vmem:[%s7437_s1 + $0xd8] sm:$0xff] }
  0x36   :  { %177 = vrot.lane.b32.xlu0 %v4651_v24, %s5508_s27  ;;  %v339_v24 = vsel %vm5838_vm5, %v337_v11, %v5936_v12  ;;  %v305_v41 = vrot.slane %v4667_v32, 7  ;;  %819 = vmatpush1.bf16.msra.mxu0 %v4400_v28  ;;  %v4690_v55 = vpack.c.bf16 %v4368_v31, %v4368_v31  ;;  %v426_v4 = vrot.slane %v4678_v46, 7  ;;  %v4345_v11 = vld [vmem:[%s7436_s29 + $0x3b] sm:$0x3] }
  0x37   :  { %820 = vmatprep.subr.bf16.mxu0 %v5338_v23  ;;  %v505_v1 = vsel %vm5838_vm5, %v503_v39, %v6002_v45  ;;  %v506_v12 = vrot.slane %v6002_v45, 4  ;;  %v549_v23 = vrot.slane %v4691_v14, 7  ;;  %v342_v27 = vsel %vm5838_vm5, %v340_v53, %v341_v7 }
  0x38   :  { %v306_v50 = vsel %vm5838_vm5, %v304_v38, %v305_v41  ;;  %v546_v9 = vrot.slane %v4690_v55, 7  ;;  %v4408_v29 = vcombine.low %v600_v15, %v601_v16  ;;  %v428_v25 = vrot.slane %v426_v4, 4 }
  0x39   :  { %431 = vrot.lane.b32.xlu1 %v5882_v47, %s5508_s27  ;;  %v4402_v47 = vcombine.low %v594_v21, %v595_v22  ;;  %316 = vst.msk [vmem:[#allocation2 + $0x30] sm:$0x3] %vm315_vm6, %v306_v50  ;;  %v508_v31 = vsel %vm5838_vm5, %v506_v12, %v507_v13 }
  0x3a   :  { %267 = vrot.lane.b32.xlu0 %v4663_v43, %s5506_s22  ;;  %v597_v43 = vld [vmem:[%s7437_s1 + $0xb8] sm:$0xff]  ;;  %v548_v22 = vrot.slane %v546_v9, 4  ;;  %v547_v28 = vsel %vm5838_vm5, %v545_v8, %v546_v9 }
  0x3b   :  { %821 = vmatpush1.bf16.msra.mxu0 %v4402_v47  ;;  %v4404_v5 = vcombine.low %v596_v42, %v597_v43 }
  0x3c   :  { %822 = vmatprep.subr.bf16.mxu0 %v5340_v44 }
  0x3d   :  { %345 = vrot.lane.b32.xlu1 %v336_v10, %s5507_s2  ;;  %v4675_v10 = vpack.c.bf16 %v4337_v49, %v4337_v49 }
  0x3e   :  { %551 = vrot.lane.b32.xlu0 %v5914_v0, %s5506_s22  ;;  %v473_v0 = vrot.slane %v4683_v51, 7 }
  0x3f   :  { %823 = vmatpush1.bf16.msra.mxu0 %v4404_v5  ;;  %v385_v21 = vrot.slane %v4675_v10, 7 }
  0x40   :  { %v474_v6 = vsel %vm5838_vm5, %v472_v57, %v473_v0  ;;  %824 = vmatprep.subr.bf16.mxu0 %v5342_v63 }
  0x41   :  { %389 = vrot.lane.b32.xlu1 %v380_v19, %s5506_s22  ;;  %482 = vst.msk [vmem:[#allocation2 + $0x34] sm:$0x3] %vm315_vm6, %v474_v6  ;;  %v427_v19 = vsel %vm5838_vm5, %v425_v59, %v426_v4  ;;  %v386_v32 = vsel %vm5838_vm5, %v384_v2, %v385_v21 }
  0x42   :  { %347 = vrot.lane.b32.xlu0 %v339_v24, %s5507_s2  ;;  %v4679_v24 = vpack.c.bf16 %v4345_v11, %v4345_v11 }
  0x43   :  { %825 = vmatpush1.bf16.msra.mxu0 %v4406_v20 }
  0x44   :  { %826 = vmatprep.subr.bf16.mxu0 %v5344_v17  ;;  %v429_v30 = vrot.slane %v4679_v24, 7 }
  0x45   :  { %511 = vrot.lane.b32.xlu1 %v502_v35, %s5507_s2 }
  0x46   :  { %391 = vrot.lane.b32.xlu0 %v383_v34, %s5506_s22 }
  0x47   :  { %827 = vmatpush1.bf16.msra.mxu0 %v4408_v29 }
  0x49   :  { %433 = vrot.lane.b32.xlu1 %v424_v58, %s5508_s27 }
  0x4a   :  { %513 = vrot.lane.b32.xlu0 %v505_v1, %s5507_s2 }
  0x4d   :  { %553 = vrot.lane.b32.xlu1 %v544_v18, %s5506_s22 }
  0x4e   :  { %435 = vrot.lane.b32.xlu0 %v427_v19, %s5508_s27 }
  0x51   :  { %349 = vrot.lane.b32.xlu1 %v342_v27, %s5507_s2 }
  0x52   :  { %555 = vrot.lane.b32.xlu0 %v547_v28, %s5506_s22 }
  0x55   :  { %515 = vrot.lane.b32.xlu1 %v508_v31, %s5507_s2 }
  0x56   :  { %393 = vrot.lane.b32.xlu0 %v386_v32, %s5506_s22 }
  0x57   :  { %23 = vsyncpa [#allocation5], 0  ;;  %v550_v33 = vsel %vm5838_vm5, %v548_v22, %v549_v23  ;;  %v430_v35 = vsel %vm5838_vm5, %v428_v25, %v429_v30  ;;  %vm115_vm7 = vcmask 519424   ;;  %vm149_vm8 = vcmask 781824   ;;  %v1221_v23 = vld [vmem:[%s7398_s6] sm:$0xff]  ;;  %v1222_v27 = vld [vmem:[%s7398_s6 + $0x8] sm:$0xff] }
  0x58   :  { %vm183_vm9 = vcmask 1044224   ;;  %vm119_vm10 = vcmask 516352   ;;  %vm355_vm11 = vcmask 519425   ;;  %vm787_vm12 = vcmask 785408   ;;  %v1223_v29 = vld [vmem:[%s7398_s6 + $0x10] sm:$0xff]  ;;  %v1224_v25 = vld [vmem:[%s7398_s6 + $0x18] sm:$0xff] }
  0x59   :  { %557 = vrot.lane.b32.xlu1 %v550_v33, %s5506_s22  ;;  %vm153_vm13 = vcmask 778752   ;;  %vm399_vm14 = vcmask 781825   ;;  %vm187_vm15 = vcmask 1041152   ;;  %vm443_vm0 = vcmask 1044225   ;;  %v1225_v31 = vld [vmem:[%s7398_s6 + $0x20] sm:$0xff]  ;;  %v1226_v32 = vld [vmem:[%s7398_s6 + $0x28] sm:$0xff] }
  0x5a   :  { %437 = vrot.lane.b32.xlu0 %v430_v35, %s5508_s27  ;;  %vm359_vm1 = vcmask 517376   ;;  %vm403_vm2 = vcmask 779776   ;;  %vm447_vm3 = vcmask 1042176   ;;  %v5509_v22 = vmov 0.0   ;;  %v1227_v35 = vld [vmem:[%s7398_s6 + $0x30] sm:$0xff]  ;;  %s7440_s19 = sld [smem:[#allocation9_spill]] }
  0x5b   :  { %959 = vmatprep.mubr.f32.mxu1 %v5509_v22  ;;  %v5510_v24 = vmov 0.0|0.0   ;;  %v5065_v28 = vpack.c.bf16 %v1222_v27, %v1221_v23  ;;  %v5068_v30 = vpack.c.bf16 %v1224_v25, %v1223_v29  ;;  %v5071_v33 = vpack.c.bf16 %v1226_v32, %v1225_v31  ;;  %v871_v31 = vld [vmem:[%s7395_s3] sm:$0xff]  ;;  %v872_v32 = vld [vmem:[%s7395_s3 + $0x8] sm:$0xff]  ;;  %s5512_s20 = smov 80   ;;  %s5513_s23 = smov 56  }
  0x5c   :  { %5064 = vmatprep.subr.bf16.mxu0 %v5510_v24  ;;  %vm7413_vm4 = vcmask 1043456   ;;  %vm875_vm6 = vcmask 424960  }
  0x7f   :  { %v138_v36 = vpop.permute.xlu1 %137 }
  0x80   :  { %v104_v37 = vpop.permute.xlu0 %103 }
  0x81   :  { %116 = vst.msk [vmem:[#allocation2] sm:$0xf] %vm115_vm7, %v104_v37 }
  0x82   :  { %150 = vst.msk [vmem:[#allocation2] sm:$0xf] %vm149_vm8, %v138_v36  ;;  %v1228_v36 = vld [vmem:[%s7398_s6 + $0x38] sm:$0xff] }
  0x83   :  { %v140_v38 = vpop.permute.xlu1 %139  ;;  %v5074_v37 = vpack.c.bf16 %v1228_v36, %v1227_v35  ;;  %v874_v35 = vld [vmem:[%s7395_s3 + $0x18] sm:$0x3]  ;;  %v1097_v36 = vld [vmem:[%s7397_s5] sm:$0xff] }
  0x84   :  { %v106_v39 = vpop.permute.xlu0 %105 }
  0x85   :  { %117 = vst.msk [vmem:[#allocation2 + $0x8] sm:$0xf] %vm115_vm7, %v106_v39  ;;  %v1230_v39 = vld [vmem:[%s7398_s6 + $0x48] sm:$0xff] }
  0x86   :  { %151 = vst.msk [vmem:[#allocation2 + $0x8] sm:$0xf] %vm149_vm8, %v140_v38  ;;  %v1229_v38 = vld [vmem:[%s7398_s6 + $0x40] sm:$0xff] }
  0x87   :  { %v232_v40 = vpop.permute.xlu1 %231 }
  0x88   :  { %v230_v42 = vpop.permute.xlu0 %229  ;;  %242 = vst.msk [vmem:[#allocation2 + $0xc] sm:$0xf] %vm115_vm7, %v232_v40  ;;  %v5077_v40 = vpack.c.bf16 %v1230_v39, %v1229_v38  ;;  %v984_v38 = vld [vmem:[%s7396_s4] sm:$0xff] }
  0x89   :  { %241 = vst.msk [vmem:[#allocation2 + $0x4] sm:$0xf] %vm115_vm7, %v230_v42  ;;  %v1231_v42 = vld [vmem:[%s7398_s6 + $0x50] sm:$0xff] }
  0x8b   :  { %v174_v43 = vpop.permute.xlu1 %173 }
  0x8c   :  { %v172_v44 = vpop.permute.xlu0 %171  ;;  %185 = vst.msk [vmem:[#allocation2 + $0x8] sm:$0xf] %vm183_vm9, %v174_v43  ;;  %v1232_v43 = vld [vmem:[%s7398_s6 + $0x58] sm:$0xff] }
  0x8d   :  { %184 = vst.msk [vmem:[#allocation2] sm:$0xf] %vm183_vm9, %v172_v44  ;;  %v5080_v44 = vpack.c.bf16 %v1232_v43, %v1231_v42  ;;  %v1100_v42 = vld [vmem:[%s7397_s5 + $0x18] sm:$0xff]  ;;  %v985_v43 = vld [vmem:[%s7396_s4 + $0x8] sm:$0xff] }
  0x8f   :  { %v264_v41 = vpop.permute.xlu1 %263 }
  0x90   :  { %v262_v34 = vpop.permute.xlu0 %261  ;;  %274 = vst.msk [vmem:[#allocation2 + $0xc] sm:$0xf] %vm149_vm8, %v264_v41  ;;  %v604_v41 = vlaneseq }
  0x91   :  { %273 = vst.msk [vmem:[#allocation2 + $0x4] sm:$0xf] %vm149_vm8, %v262_v34  ;;  %v1233_v34 = vld [vmem:[%s7398_s6 + $0x60] sm:$0xff] }
  0x93   :  { %v110_v45 = vpop.permute.xlu1 %109 }
  0x94   :  { %v108_v46 = vpop.permute.xlu0 %107  ;;  %120 = vst.msk [vmem:[#allocation2 + $0x18] sm:$0x1] %vm119_vm10, %v110_v45  ;;  %v5346_v49 = vld [vmem:[#allocation2] ss:$8 sps:$4 sm:$0xff]  }
  0x95   :  { %118 = vst.msk [vmem:[#allocation2 + $0x10] sm:$0xf] %vm115_vm7, %v108_v46  ;;  %v1234_v45 = vld [vmem:[%s7398_s6 + $0x68] sm:$0xff] }
  0x96   :  { %v5083_v46 = vpack.c.bf16 %v1234_v45, %v1233_v34  ;;  %v1101_v34 = vld [vmem:[%s7397_s5 + $0x20] sm:$0xff]  ;;  %v1102_v45 = vld [vmem:[%s7397_s5 + $0x28] sm:$0xff] }
  0x97   :  { %v142_v47 = vpop.permute.xlu1 %141 }
  0x98   :  { %v344_v48 = vpop.permute.xlu0 %343  ;;  %152 = vst.msk [vmem:[#allocation2 + $0x10] sm:$0xf] %vm149_vm8, %v142_v47  ;;  %v5348_v50 = vld [vmem:[#allocation2 + $0x4] ss:$8 sps:$4 sm:$0xff]   ;;  %v6165_v47 = vshrl.u32 %v604_v41, 7 }
  0x99   :  { %356 = vst.msk [vmem:[#allocation2 + $0x18] sm:$0xe] %vm355_vm11, %v344_v48  ;;  %4410 = vmatprep.mubr.msk.bf16.mxu0 %vm787_vm12, %v5348_v50  ;;  %v1235_v48 = vld [vmem:[%s7398_s6 + $0x70] sm:$0xff] }
  0x9a   :  { %833 = vmatmul.mubr.bf16.vlgmr.msra.gmra.mrb[0].mxu0 %v5346_v49  ;;  %v1236_v49 = vld [vmem:[%s7398_s6 + $0x78] sm:$0xff] }
  0x9b   :  { %v234_v51 = vpop.permute.xlu1 %233  ;;  %5066 = vmatpush1.bf16.msra.mxu0 %v5065_v28  ;;  %v5086_v50 = vpack.c.bf16 %v1236_v49, %v1235_v48  ;;  %v5032_v48 = vpack.c.bf16 %v1102_v45, %v1101_v34  ;;  %v1103_v49 = vld [vmem:[%s7397_s5 + $0x30] sm:$0xff] }
  0x9c   :  { %v144_v52 = vpop.permute.xlu0 %143  ;;  %243 = vst.msk [vmem:[#allocation2 + $0x14] sm:$0xf] %vm115_vm7, %v234_v51  ;;  %5067 = vmatprep.subr.bf16.mxu0 %v5510_v24  ;;  %v6175_v51 = vsub.s32 0, %v6165_v47 }
  0x9d   :  { %154 = vst.msk [vmem:[#allocation2 + $0x18] sm:$0x1] %vm153_vm13, %v144_v52  ;;  %v602_v52 = vld [vmem:[%s7440_s19] sm:$0x3] }
  0x9f   :  { %v388_v54 = vpop.permute.xlu1 %387  ;;  %5069 = vmatpush1.bf16.msra.mxu0 %v5068_v30 }
  0xa0   :  { %v236_v55 = vpop.permute.xlu0 %235  ;;  %400 = vst.msk [vmem:[#allocation2 + $0x18] sm:$0xe] %vm399_vm14, %v388_v54  ;;  %5070 = vmatprep.subr.bf16.mxu0 %v5510_v24  ;;  %v610_v54 = vsub.s32 1, %v6165_v47 }
  0xa1   :  { %244 = vst.msk [vmem:[#allocation2 + $0x1c] sm:$0x1] %vm119_vm10, %v236_v55  ;;  %v607_v55 = vrot.slane %v602_v52, %v6175_v51  ;;  %vm1356_vm10 = vsmask.f32 3328 }
  0xa3   :  { %v176_v56 = vpop.permute.xlu1 %175  ;;  %5072 = vmatpush1.bf16.msra.mxu0 %v5071_v33  ;;  %v873_v33 = vld [vmem:[%s7395_s3 + $0x10] sm:$0xff] }
  0xa4   :  { %v510_v57 = vpop.permute.xlu0 %509  ;;  %186 = vst.msk [vmem:[#allocation2 + $0x10] sm:$0xf] %vm183_vm9, %v176_v56  ;;  %5073 = vmatprep.subr.bf16.mxu0 %v5510_v24 }
  0xa5   :  { %521 = vst.msk [vmem:[#allocation2 + $0x1c] sm:$0xe] %vm355_vm11, %v510_v57  ;;  %v611_v57 = vrot.slane %v602_v52, %v610_v54  ;;  %v987_v52 = vld [vmem:[%s7396_s4 + $0x18] sm:$0x3]  ;;  %vm1402_vm11 = vcmask 1046532  }
  0xa7   :  { %v266_v58 = vpop.permute.xlu1 %265  ;;  %5075 = vmatpush1.bf16.msra.mxu0 %v5074_v37  ;;  %v1098_v37 = vld [vmem:[%s7397_s5 + $0x8] sm:$0xff] }
  0xa8   :  { %v178_v59 = vpop.permute.xlu0 %177  ;;  %275 = vst.msk [vmem:[#allocation2 + $0x14] sm:$0xf] %vm149_vm8, %v266_v58  ;;  %5076 = vmatprep.subr.bf16.mxu0 %v5510_v24  ;;  %v5026_v39 = vpack.c.bf16 %v1098_v37, %v1097_v36 }
  0xa9   :  { %188 = vst.msk [vmem:[#allocation2 + $0x18] sm:$0x1] %vm187_vm15, %v178_v59  ;;  %vm1468_vm15 = vcmask 1045508  }
  0xab   :  { %v432_v60 = vpop.permute.xlu1 %431  ;;  %5078 = vmatpush1.bf16.msra.mxu0 %v5077_v40  ;;  %v1099_v40 = vld [vmem:[%s7397_s5 + $0x10] sm:$0xff] }
  0xac   :  { %v268_v61 = vpop.permute.xlu0 %267  ;;  %444 = vst.msk [vmem:[#allocation2 + $0x18] sm:$0xe] %vm443_vm0, %v432_v60  ;;  %5079 = vmatprep.subr.bf16.mxu0 %v5510_v24  ;;  %vm1350_vm0 = vcmask 843776  }
  0xad   :  { %276 = vst.msk [vmem:[#allocation2 + $0x1c] sm:$0x1] %vm153_vm13, %v268_v61  ;;  %vm1351_vm13 = vsmask.f32 256 }
  0xaf   :  { %v346_v62 = vpop.permute.xlu1 %345  ;;  %v569_v5 = vld [vmem:[#allocation2 + $0x10] sm:$0xff]  ;;  %5081 = vmatpush1.bf16.msra.mxu0 %v5080_v44  ;;  %v5029_v44 = vpack.c.bf16 %v1100_v42, %v1099_v40 }
  0xb0   :  { %v552_v63 = vpop.permute.xlu0 %551  ;;  %357 = vst.msk [vmem:[#allocation2 + $0x20] sm:$0xf] %vm115_vm7, %v346_v62  ;;  %5082 = vmatprep.subr.bf16.mxu0 %v5510_v24 }
  0xb1   :  { %563 = vst.msk [vmem:[#allocation2 + $0x1c] sm:$0xe] %vm399_vm14, %v552_v63  ;;  %vm7414_vm14 = vcmask 1041408  }
  0xb3   :  { %v390_v0 = vpop.permute.xlu1 %389  ;;  %5084 = vmatpush1.bf16.msra.mxu0 %v5083_v46  ;;  %v986_v46 = vld [vmem:[%s7396_s4 + $0x10] sm:$0xff]  ;;  %s5511_s4 = smov 104  }
  0xb4   :  { %v348_v1 = vpop.permute.xlu0 %347  ;;  %401 = vst.msk [vmem:[#allocation2 + $0x20] sm:$0xf] %vm149_vm8, %v390_v0  ;;  %5085 = vmatprep.subr.bf16.mxu0 %v5510_v24 }
  0xb5   :  { %358 = vst.msk [vmem:[#allocation2 + $0x28] sm:$0xf] %vm115_vm7, %v348_v1 }
  0xb7   :  { %v512_v3 = vpop.permute.xlu1 %511  ;;  %5087 = vmatpush1.bf16.msra.mxu0 %v5086_v50  ;;  %v1104_v50 = vld [vmem:[%s7397_s5 + $0x38] sm:$0xff] }
  0xb8   :  { %v392_v4 = vpop.permute.xlu0 %391  ;;  %v570_v53 = vld [vmem:[#allocation2 + $0x18] sm:$0xff]  ;;  %522 = vst.msk [vmem:[#allocation2 + $0x24] sm:$0xf] %vm115_vm7, %v512_v3  ;;  %5088 = vmatprep.subr.bf16.mxu0 %v5510_v24 }
  0xb9   :  { %v5349_v6 = vld [vmem:[#allocation2 + $0x14] ss:$8 sps:$4 sm:$0xff]   ;;  %402 = vst.msk [vmem:[#allocation2 + $0x28] sm:$0xf] %vm149_vm8, %v392_v4  ;;  %v4376_v7 = vcombine.low %v569_v5, %v570_v53 }
  0xba   :  { %4411 = vmatprep.mubr.msk.bf16.mxu0 %vm787_vm12, %v5349_v6 }
  0xbb   :  { %843 = vmatmul.mubr.bf16.gmra.mrb[4].mxu0 %v4376_v7  ;;  %v434_v8 = vpop.permute.xlu1 %433 }
  0xbc   :  { %v514_v9 = vpop.permute.xlu0 %513  ;;  %445 = vst.msk [vmem:[#allocation2 + $0x20] sm:$0xf] %vm183_vm9, %v434_v8 }
  0xbd   :  { %523 = vst.msk [vmem:[#allocation2 + $0x2c] sm:$0xf] %vm115_vm7, %v514_v9  ;;  %vm7426_vm7 = vcmask 654336  }
  0xbf   :  { %v554_v10 = vpop.permute.xlu1 %553 }
  0xc0   :  { %v436_v11 = vpop.permute.xlu0 %435  ;;  %564 = vst.msk [vmem:[#allocation2 + $0x24] sm:$0xf] %vm149_vm8, %v554_v10 }
  0xc1   :  { %446 = vst.msk [vmem:[#allocation2 + $0x28] sm:$0xf] %vm183_vm9, %v436_v11  ;;  %vm1348_vm9 = vcmask 846848  }
  0xc3   :  { %v350_v12 = vpop.permute.xlu1 %349 }
  0xc4   :  { %v556_v13 = vpop.permute.xlu0 %555  ;;  %360 = vst.msk [vmem:[#allocation2 + $0x30] sm:$0x3] %vm359_vm1, %v350_v12 }
  0xc5   :  { %565 = vst.msk [vmem:[#allocation2 + $0x2c] sm:$0xf] %vm149_vm8, %v556_v13  ;;  %vm1401_vm8 = vcmask 1042432  }
  0xc7   :  { %v516_v14 = vpop.permute.xlu1 %515 }
  0xc8   :  { %v394_v15 = vpop.permute.xlu0 %393  ;;  %524 = vst.msk [vmem:[#allocation2 + $0x34] sm:$0x3] %vm359_vm1, %v516_v14  ;;  %v5353_v19 = vld [vmem:[#allocation2 + $0x20] ss:$8 sps:$4 sm:$0xff]   ;;  %vm1519_vm1 = vsmask.f32 1280 }
  0xc9   :  { %404 = vst.msk [vmem:[#allocation2 + $0x30] sm:$0x3] %vm403_vm2, %v394_v15 }
  0xcb   :  { %v558_v16 = vpop.permute.xlu1 %557 }
  0xcc   :  { %v438_v17 = vpop.permute.xlu0 %437  ;;  %v5351_v18 = vld [vmem:[#allocation2 + $0x24] ss:$8 sps:$4 sm:$0xff]   ;;  %566 = vst.msk [vmem:[#allocation2 + $0x34] sm:$0x3] %vm403_vm2, %v558_v16  ;;  %vm1520_vm2 = vsmask.f32 5392 }
  0xcd   :  { %448 = vst.msk [vmem:[#allocation2 + $0x30] sm:$0x3] %vm447_vm3, %v438_v17  ;;  %4412 = vmatprep.mubr.msk.bf16.mxu0 %vm787_vm12, %v5351_v18  ;;  %vm1432_vm3 = vsmask.f32 2304 }
  0xce   :  { %853 = vmatmul.mubr.bf16.gmra.mrb[8].mxu0 %v5353_v19 }
  0xd4   :  { %v573_v20 = vld [vmem:[#allocation2 + $0x30] sm:$0x33] }
  0xd5   :  { %v4381_v2 = vcombine.high %v573_v20, %v573_v20  ;;  %v4380_v21 = vcombine.low %v573_v20, %v573_v20 }
  0xd7   :  { %4413 = vmatprep.mubr.msk.bf16.mxu0 %vm787_vm12, %v4381_v2  ;;  %vm1357_vm12 = vsmask.f32 7440 }
  0xd8   :  { %863 = vmatmul.mubr.bf16.gmra.mrb[12].mxu0 %v4380_v21 }
 0x16d   :  { %v834_v56 = vpop.f32.mrb[0].mxu0 }
 0x16e   :  { %v836_v58 = vpop.f32.mrb[1].mxu0  ;;  %v835_v60 = vadd.f32 %v834_v56, %v607_v55  ;;  %v1105_v56 = vld [vmem:[%s7397_s5 + $0x40] sm:$0xff] }
 0x16f   :  { %v838_v59 = vpop.f32.mrb[2].mxu0  ;;  %v837_v63 = vadd.f32 %v836_v58, %v611_v57 }
 0x170   :  { %v839_v61 = vadd.f32 %v838_v59, %v607_v55  ;;  %v840_v62 = vpop.f32.mrb[3].mxu0  ;;  %v1107_v59 = vld [vmem:[%s7397_s5 + $0x50] sm:$0xff] }
 0x171   :  { %v841_v0 = vadd.f32 %v840_v62, %v611_v57  ;;  %v1109_v62 = vld [vmem:[%s7397_s5 + $0x60] sm:$0xff] }
 0x172   :  { %v5003_v1 = vpack.c.bf16 %v839_v61, %v835_v60  ;;  %v1108_v60 = vld [vmem:[%s7397_s5 + $0x58] sm:$0xff] }
 0x173   :  { %v5001_v3 = vpack.c.bf16 %v841_v0, %v837_v63  ;;  %v5041_v61 = vpack.c.bf16 %v1108_v60, %v1107_v59  ;;  %v1110_v63 = vld [vmem:[%s7397_s5 + $0x68] sm:$0xff] }
 0x174   :  { %v5044_v0 = vpack.c.bf16 %v1110_v63, %v1109_v62 }
 0x175   :  { %5002 = vmatprep.subr.bf16.mxu1 %v5001_v3 }
 0x176   :  { %5004 = vmatpush1.bf16.msra.mxu1 %v5003_v1 }
 0x18e   :  { %v844_v4 = vpop.f32.mrb[4].mxu0 }
 0x18f   :  { %v846_v5 = vpop.f32.mrb[5].mxu0  ;;  %v845_v6 = vadd.f32 %v844_v4, %v607_v55 }
 0x190   :  { %v848_v53 = vpop.f32.mrb[6].mxu0  ;;  %v847_v9 = vadd.f32 %v846_v5, %v611_v57  ;;  %v1113_v5 = vld [vmem:[%s7397_s5 + $0x80] sm:$0xff] }
 0x191   :  { %v849_v7 = vadd.f32 %v848_v53, %v607_v55  ;;  %v850_v8 = vpop.f32.mrb[7].mxu0  ;;  %v1114_v53 = vld [vmem:[%s7397_s5 + $0x88] sm:$0xff] }
 0x192   :  { %v851_v10 = vadd.f32 %v850_v8, %v611_v57  ;;  %v1238_v8 = vld [vmem:[%s7398_s6 + $0x88] sm:$0xff] }
 0x193   :  { %v5007_v11 = vpack.c.bf16 %v849_v7, %v845_v6  ;;  %v1237_v6 = vld [vmem:[%s7398_s6 + $0x80] sm:$0xff]  ;;  %v5050_v7 = vpack.c.bf16 %v1114_v53, %v1113_v5  ;;  %v5359_v5 = vld [vmem:[%s7399_s7 + $0x10] ss:$8 sps:$4 sm:$0xff]  }
 0x194   :  { %v5005_v12 = vpack.c.bf16 %v851_v10, %v847_v9  ;;  %v5089_v9 = vpack.c.bf16 %v1238_v8, %v1237_v6  ;;  %v1115_v10 = vld [vmem:[%s7397_s5 + $0x90] sm:$0xff]  ;;  %v5364_v53 = vld [vmem:[%s7399_s7 + $0x24] ss:$8 sps:$4 sm:$0xff]   ;;  %v5362_v6 = vld [vmem:[%s7399_s7 + $0x20] ss:$8 sps:$4 sm:$0xff]  }
 0x195   :  { %v5365_v8 = vld [vmem:[%s7399_s7 + $0x30] ss:$8 sps:$4 sm:$0xff]  }
 0x196   :  { %5006 = vmatprep.subr.bf16.mxu1 %v5005_v12  ;;  %5090 = vmatpush1.bf16.msra.mxu0 %v5089_v9  ;;  %v5370_v9 = vld [vmem:[%s7399_s7 + $0x44] ss:$8 sps:$4 sm:$0xff]  }
 0x197   :  { %5008 = vmatpush1.bf16.msra.mxu1 %v5007_v11  ;;  %5091 = vmatprep.subr.bf16.mxu0 %v5510_v24 }
 0x1a1   :  { %v854_v13 = vpop.f32.mrb[8].mxu0 }
 0x1a2   :  { %v856_v14 = vpop.f32.mrb[9].mxu0  ;;  %v855_v16 = vadd.f32 %v854_v13, %v607_v55 }
 0x1a3   :  { %v858_v15 = vpop.f32.mrb[10].mxu0  ;;  %v857_v19 = vadd.f32 %v856_v14, %v611_v57  ;;  %v1240_v14 = vld [vmem:[%s7398_s6 + $0x98] sm:$0xff] }
 0x1a4   :  { %v859_v17 = vadd.f32 %v858_v15, %v607_v55  ;;  %v860_v18 = vpop.f32.mrb[11].mxu0 }
 0x1a5   :  { %v861_v20 = vadd.f32 %v860_v18, %v611_v57  ;;  %v1241_v18 = vld [vmem:[%s7398_s6 + $0xa0] sm:$0xff] }
 0x1a6   :  { %v5011_v2 = vpack.c.bf16 %v859_v17, %v855_v16  ;;  %v1117_v16 = vld [vmem:[%s7397_s5 + $0xa0] sm:$0xff]  ;;  %v1118_v17 = vld [vmem:[%s7397_s5 + $0xa8] sm:$0xff] }
 0x1a7   :  { %v5009_v21 = vpack.c.bf16 %v861_v20, %v857_v19  ;;  %v5056_v19 = vpack.c.bf16 %v1118_v17, %v1117_v16  ;;  %v1242_v20 = vld [vmem:[%s7398_s6 + $0xa8] sm:$0xff] }
 0x1a9   :  { %5010 = vmatprep.subr.bf16.mxu1 %v5009_v21 }
 0x1aa   :  { %5012 = vmatpush1.bf16.msra.mxu1 %v5011_v2 }
 0x1ab   :  { %v864_v23 = vpop.f32.mrb[12].mxu0 }
 0x1ac   :  { %v866_v27 = vpop.f32.mrb[13].mxu0  ;;  %v865_v25 = vadd.f32 %v864_v23, %v607_v55  ;;  %v5035_v55 = vpack.c.bf16 %v1104_v50, %v1103_v49  ;;  %v1120_v23 = vld [vmem:[%s7397_s5 + $0xb8] sm:$0xff] }
 0x1ad   :  { %v867_v28 = vadd.f32 %v866_v27, %v611_v57  ;;  %v868_v29 = vpop.f32.mrb[14].mxu0  ;;  %v1106_v57 = vld [vmem:[%s7397_s5 + $0x48] sm:$0xff]  ;;  %v1243_v27 = vld [vmem:[%s7398_s6 + $0xb0] sm:$0xff] }
 0x1ae   :  { %v869_v30 = vpop.f32.mrb[15].mxu0  ;;  %v5038_v58 = vpack.c.bf16 %v1106_v57, %v1105_v56  ;;  %v1244_v29 = vld [vmem:[%s7398_s6 + $0xb8] sm:$0xff] }
 0x1af   :  { %4414 = vmatprep.subr.msk.mxu1 %vm7413_vm4, %v867_v28  ;;  %v1121_v30 = vld [vmem:[%s7397_s5 + $0xc0] sm:$0xff] }
 0x1b0   :  { %4415 = vmatpush1.msk.msra.mxu1 %vm7413_vm4, %v865_v25 }
 0x1b1   :  { %4416 = vmatmul.mubr.msk.f32.vlgmr.msra.gmra.mrb[0].mxu1 %vm875_vm6, %v871_v31  ;;  %5014 = vmatprep.subr.bf16.mxu1 %v5001_v3  ;;  %v1112_v3 = vld [vmem:[%s7397_s5 + $0x78] sm:$0xff]  ;;  %v1122_v31 = vld [vmem:[%s7397_s5 + $0xc8] sm:$0xff] }
 0x1b2   :  { %5016 = vmatpush1.bf16.msra.mxu1 %v5003_v1  ;;  %965 = vmatprep.mubr.f32.mxu1 %v5509_v22  ;;  %v1111_v1 = vld [vmem:[%s7397_s5 + $0x70] sm:$0xff] }
 0x1b3   :  { %5018 = vmatprep.subr.bf16.mxu1 %v5005_v12  ;;  %v5047_v4 = vpack.c.bf16 %v1112_v3, %v1111_v1  ;;  %v1239_v12 = vld [vmem:[%s7398_s6 + $0x90] sm:$0xff]  ;;  %v5356_v1 = vld [vmem:[%s7399_s7] ss:$8 sps:$4 sm:$0xff]   ;;  %v5358_v3 = vld [vmem:[%s7399_s7 + $0x4] ss:$8 sps:$4 sm:$0xff]  }
 0x1b4   :  { %v5092_v15 = vpack.c.bf16 %v1240_v14, %v1239_v12  ;;  %v5371_v12 = vld [vmem:[%s7399_s7 + $0x50] ss:$8 sps:$4 sm:$0xff]  }
 0x1b5   :  { %4417 = vmatmul.mubr.msk.f32.gmra.mrb[2].mxu1 %vm875_vm6, %v872_v32  ;;  %v1245_v32 = vld [vmem:[%s7398_s6 + $0xc0] sm:$0xff] }
 0x1b6   :  { %5020 = vmatpush1.bf16.msra.mxu1 %v5007_v11  ;;  %971 = vmatprep.mubr.f32.mxu1 %v5509_v22  ;;  %v1116_v11 = vld [vmem:[%s7397_s5 + $0x98] sm:$0xff] }
 0x1b7   :  { %5022 = vmatprep.subr.bf16.mxu1 %v5009_v21  ;;  %v5053_v13 = vpack.c.bf16 %v1116_v11, %v1115_v10  ;;  %5093 = vmatpush1.bf16.msra.mxu0 %v5092_v15  ;;  %v1119_v21 = vld [vmem:[%s7397_s5 + $0xb0] sm:$0xff]  ;;  %v5368_v10 = vld [vmem:[%s7399_s7 + $0x40] ss:$8 sps:$4 sm:$0xff]  }
 0x1b8   :  { %5094 = vmatprep.subr.bf16.mxu0 %v5510_v24  ;;  %v5373_v11 = vld [vmem:[%s7399_s7 + $0x54] ss:$8 sps:$4 sm:$0xff]  }
 0x1b9   :  { %4418 = vmatmul.mubr.msk.f32.gmra.mrb[4].mxu1 %vm875_vm6, %v873_v33  ;;  %v5062_v33 = vpack.c.bf16 %v1122_v31, %v1121_v30 }
 0x1ba   :  { %5024 = vmatpush1.bf16.msra.mxu1 %v5011_v2  ;;  %977 = vmatprep.mubr.f32.mxu1 %v5509_v22  ;;  %v5095_v2 = vpack.c.bf16 %v1242_v20, %v1241_v18 }
 0x1bb   :  { %4420 = vmatprep.subr.msk.mxu1 %vm7413_vm4, %v867_v28  ;;  %v5059_v28 = vpack.c.bf16 %v1120_v23, %v1119_v21  ;;  %v5376_v21 = vld [vmem:[%s7399_s7 + $0x64] ss:$8 sps:$4 sm:$0xff]  }
 0x1bc   :  { %5096 = vmatpush1.bf16.msra.mxu0 %v5095_v2  ;;  %v5374_v2 = vld [vmem:[%s7399_s7 + $0x60] ss:$8 sps:$4 sm:$0xff]  }
 0x1bd   :  { %4419 = vmatmul.mubr.msk.f32.gmra.mrb[6].mxu1 %vm875_vm6, %v874_v35  ;;  %5097 = vmatprep.subr.bf16.mxu0 %v5510_v24  ;;  %v1246_v35 = vld [vmem:[%s7398_s6 + $0xc8] sm:$0xff] }
 0x1be   :  { %4421 = vmatpush1.msk.msra.mxu1 %vm7413_vm4, %v865_v25  ;;  %1064 = vmatprep.mubr.f32.mxu1 %v5509_v22  ;;  %v5098_v25 = vpack.c.bf16 %v1244_v29, %v1243_v27  ;;  %v5101_v36 = vpack.c.bf16 %v1246_v35, %v1245_v32  ;;  %vm6425_vm4 = vmor %vm1401_vm8, %vm1402_vm11 }
 0x1bf   :  { %5025 = vmatprep.subr.bf16.mxu1 %v5510_v24  ;;  %vm1358_vm8 = vmor %vm1356_vm10, %vm1357_vm12  ;;  %vm1433_vm12 = vsmask.f32 6416 }
 0x1c0   :  { %5099 = vmatpush1.bf16.msra.mxu0 %v5098_v25  ;;  %vm6455_vm10 = vmor %vm7414_vm14, %vm1468_vm15  ;;  %vm7422_vm14 = vcmask 1040832  }
 0x1c1   :  { %4422 = vmatmul.mubr.msk.f32.vlgmr.msra.gmra.mrb[8].mxu1 %vm875_vm6, %v984_v38  ;;  %5100 = vmatprep.subr.bf16.mxu0 %v5510_v24  ;;  %vm1521_vm11 = vmor %vm1519_vm1, %vm1520_vm2  ;;  %vm7417_vm1 = vcmask 651268   ;;  %vm7419_vm2 = vsmask.f32 4352 }
 0x1c2   :  { %1070 = vmatprep.mubr.f32.mxu1 %v5509_v22  ;;  %5027 = vmatpush1.bf16.msra.mxu1 %v5026_v39 }
 0x1c3   :  { %5028 = vmatprep.subr.bf16.mxu1 %v5510_v24 }
 0x1c4   :  { %5102 = vmatpush1.bf16.msra.mxu0 %v5101_v36 }
 0x1c5   :  { %4423 = vmatmul.mubr.msk.f32.gmra.mrb[10].mxu1 %vm875_vm6, %v985_v43 }
 0x1c6   :  { %1076 = vmatprep.mubr.f32.mxu1 %v5509_v22  ;;  %5030 = vmatpush1.bf16.msra.mxu1 %v5029_v44 }
 0x1c7   :  { %5031 = vmatprep.subr.bf16.mxu1 %v5510_v24 }
 0x1c9   :  { %4424 = vmatmul.mubr.msk.f32.gmra.mrb[12].mxu1 %vm875_vm6, %v986_v46 }
 0x1ca   :  { %1082 = vmatprep.mubr.f32.mxu1 %v5509_v22  ;;  %5033 = vmatpush1.bf16.msra.mxu1 %v5032_v48 }
 0x1cb   :  { %5034 = vmatprep.subr.bf16.mxu1 %v5510_v24 }
 0x1cd   :  { %4425 = vmatmul.mubr.msk.f32.gmra.mrb[14].mxu1 %vm875_vm6, %v987_v52  ;;  %vm1597_vm6 = vsmask.f32 4368 }
 0x1ce   :  { %5036 = vmatpush1.bf16.msra.mxu1 %v5035_v55  ;;  %vm6483_vm15 = vmor %vm1351_vm13, %vm1597_vm6 }
 0x1cf   :  { %5037 = vmatprep.subr.bf16.mxu1 %v5510_v24  ;;  %vm1396_vm6 = vmand %vm7417_vm1, %vm7419_vm2 }
 0x1d2   :  { %5039 = vmatpush1.bf16.msra.mxu1 %v5038_v58 }
 0x1d3   :  { %5040 = vmatprep.subr.bf16.mxu1 %v5510_v24 }
 0x1d6   :  { %5042 = vmatpush1.bf16.msra.mxu1 %v5041_v61 }
 0x1d7   :  { %5043 = vmatprep.subr.bf16.mxu1 %v5510_v24 }
 0x1da   :  { %5045 = vmatpush1.bf16.msra.mxu1 %v5044_v0 }
 0x1db   :  { %5046 = vmatprep.subr.bf16.mxu1 %v5510_v24 }
 0x1de   :  { %5048 = vmatpush1.bf16.msra.mxu1 %v5047_v4  ;;  %v5361_v4 = vld [vmem:[%s7399_s7 + $0x14] ss:$8 sps:$4 sm:$0xff]  }
 0x1df   :  { %5049 = vmatprep.subr.bf16.mxu1 %v5510_v24 }
 0x1e2   :  { %5051 = vmatpush1.bf16.msra.mxu1 %v5050_v7  ;;  %v5367_v7 = vld [vmem:[%s7399_s7 + $0x34] ss:$8 sps:$4 sm:$0xff]  }
 0x1e3   :  { %5052 = vmatprep.subr.bf16.mxu1 %v5510_v24 }
 0x1e6   :  { %5054 = vmatpush1.bf16.msra.mxu1 %v5053_v13 }
 0x1e7   :  { %5055 = vmatprep.subr.bf16.mxu1 %v5510_v24 }
 0x1ea   :  { %5057 = vmatpush1.bf16.msra.mxu1 %v5056_v19 }
 0x1eb   :  { %5058 = vmatprep.subr.bf16.mxu1 %v5510_v24 }
 0x1ee   :  { %5060 = vmatpush1.bf16.msra.mxu1 %v5059_v28 }
 0x1ef   :  { %5061 = vmatprep.subr.bf16.mxu1 %v5510_v24 }
 0x1f2   :  { %5063 = vmatpush1.bf16.msra.mxu1 %v5062_v33 }
 0x1f3   :  { %2121 = vmatprep.subr.bf16.mxu1 %v5358_v3 }
 0x284   :  { %v961_v37 = vpop.f32.mrb[0].mxu1 }
 0x285   :  { %v963_v38 = vpop.f32.mrb[1].mxu1 }
 0x288   :  { %v967_v39 = vpop.f32.mrb[2].mxu1 }
 0x289   :  { %v969_v40 = vpop.f32.mrb[3].mxu1 }
 0x28c   :  { %v973_v42 = vpop.f32.mrb[4].mxu1 }
 0x28d   :  { %v975_v43 = vpop.f32.mrb[5].mxu1 }
 0x290   :  { %v979_v44 = vpop.f32.mrb[6].mxu1 }
 0x291   :  { %v981_v34 = vpop.f32.mrb[7].mxu1 }
 0x294   :  { %v1066_v45 = vpop.f32.mrb[8].mxu1 }
 0x295   :  { %v1089_v46 = vmax.f32 %v961_v37, %v1066_v45  ;;  %v1068_v48 = vpop.f32.mrb[9].mxu1 }
 0x296   :  { %v1090_v49 = vmax.f32 %v963_v38, %v1068_v48 }
 0x298   :  { %v1072_v50 = vpop.f32.mrb[10].mxu1  ;;  %4426 = vmatprep.mubr.msk.f32.mxu1 %vm7426_vm7, %v1090_v49  ;;  %4430 = vmatprep.mubr.msk.f32.mxu0 %vm7426_vm7, %v1090_v49 }
 0x299   :  { %v1091_v52 = vmax.f32 %v967_v39, %v1072_v50  ;;  %v1074_v55 = vpop.f32.mrb[11].mxu1  ;;  %1201 = vmatmul.mubr.f32.vlgmr.msra.gmra.mrb[16].mxu1 %v1089_v46  ;;  %1312 = vmatmul.mubr.f32.vlgmr.msra.gmra.mrb[16].mxu0 %v1089_v46 }
 0x29a   :  { %v1092_v56 = vmax.f32 %v969_v40, %v1074_v55  ;;  %2122 = vmatpush1.bf16.msra.mxu1 %v5356_v1 }
 0x29b   :  { %2123 = vmatprep.subr.bf16.mxu1 %v5361_v4 }
 0x29c   :  { %v1078_v57 = vpop.f32.mrb[12].mxu1  ;;  %4427 = vmatprep.mubr.msk.f32.mxu1 %vm7426_vm7, %v1092_v56  ;;  %4431 = vmatprep.mubr.msk.f32.mxu0 %vm7426_vm7, %v1092_v56 }
 0x29d   :  { %v1093_v58 = vmax.f32 %v973_v42, %v1078_v57  ;;  %v1080_v59 = vpop.f32.mrb[13].mxu1  ;;  %1206 = vmatmul.mubr.f32.gmra.mrb[18].mxu1 %v1091_v52  ;;  %1317 = vmatmul.mubr.f32.gmra.mrb[18].mxu0 %v1091_v52 }
 0x29e   :  { %v1094_v60 = vmax.f32 %v975_v43, %v1080_v59  ;;  %2124 = vmatpush1.bf16.msra.mxu1 %v5359_v5 }
 0x29f   :  { %2125 = vmatprep.subr.bf16.mxu1 %v5364_v53  ;;  %v5379_v53 = vld [vmem:[%s7399_s7 + $0x74] ss:$8 sps:$4 sm:$0xff]  }
 0x2a0   :  { %v1084_v61 = vpop.f32.mrb[14].mxu1  ;;  %4428 = vmatprep.mubr.msk.f32.mxu1 %vm7426_vm7, %v1094_v60  ;;  %4432 = vmatprep.mubr.msk.f32.mxu0 %vm7426_vm7, %v1094_v60 }
 0x2a1   :  { %v1095_v62 = vmax.f32 %v979_v44, %v1084_v61  ;;  %v1086_v63 = vpop.f32.mrb[15].mxu1  ;;  %1211 = vmatmul.mubr.f32.gmra.mrb[20].mxu1 %v1093_v58  ;;  %1322 = vmatmul.mubr.f32.gmra.mrb[20].mxu0 %v1093_v58 }
 0x2a2   :  { %v1096_v0 = vmax.f32 %v981_v34, %v1086_v63  ;;  %2126 = vmatpush1.bf16.msra.mxu1 %v5362_v6 }
 0x2a3   :  { %2127 = vmatprep.subr.bf16.mxu1 %v5367_v7 }
 0x2a4   :  { %4429 = vmatprep.mubr.msk.f32.mxu1 %vm7426_vm7, %v1096_v0  ;;  %4433 = vmatprep.mubr.msk.f32.mxu0 %vm7426_vm7, %v1096_v0  ;;  %v5377_v0 = vld [vmem:[%s7399_s7 + $0x70] ss:$8 sps:$4 sm:$0xff]  }
 0x2a5   :  { %1216 = vmatmul.mubr.f32.gmra.mrb[22].mxu1 %v1095_v62  ;;  %1327 = vmatmul.mubr.f32.gmra.mrb[22].mxu0 %v1095_v62 }
 0x2a6   :  { %2350 = vmatprep.mubr.f32.mxu0 %v5509_v22  ;;  %2128 = vmatpush1.bf16.msra.mxu1 %v5365_v8 }
 0x2a7   :  { %2129 = vmatprep.subr.bf16.mxu1 %v5370_v9 }
 0x2aa   :  { %2130 = vmatpush1.bf16.msra.mxu1 %v5368_v10 }
 0x2ab   :  { %2131 = vmatprep.subr.bf16.mxu1 %v5373_v11 }
 0x2ae   :  { %2132 = vmatpush1.bf16.msra.mxu1 %v5371_v12 }
 0x2af   :  { %2133 = vmatprep.subr.bf16.mxu1 %v5376_v21 }
 0x2b2   :  { %2134 = vmatpush1.bf16.msra.mxu1 %v5374_v2  ;;  %v5380_v2 = vld [vmem:[%s7399_s7 + $0x80] ss:$8 sps:$4 sm:$0xff]  }
 0x2b3   :  { %2135 = vmatprep.subr.bf16.mxu1 %v5379_v53  ;;  %v5514_v53 = vmov 0  }
 0x2b4   :  { %5296 = vset.pattern.permute.xlu0 %v5514_v53 }
 0x2b6   :  { %2136 = vmatpush1.bf16.msra.mxu1 %v5377_v0  ;;  %v5395_v0 = vld [vmem:[%s7399_s7 + $0xd0] ss:$8 sps:$4 sm:$0xff]  }
 0x36c   :  { %v1202_v13 = vpop.f32.mrb[16].mxu1  ;;  %v1313_v14 = vpop.f32.mrb[16].mxu0 }
 0x36d   :  { %v1332_v15 = vmax.f32 %v1202_v13, %v1313_v14  ;;  %v1204_v16 = vpop.f32.mrb[17].mxu1  ;;  %v1315_v17 = vpop.f32.mrb[17].mxu0 }
 0x36f   :  { %v1336_v18 = vmax.f32 %v1332_v15, 0.0  ;;  %v5382_v15 = vld [vmem:[%s7399_s7 + $0x84] ss:$8 sps:$4 sm:$0xff]  }
 0x370   :  { %v1207_v19 = vpop.f32.mrb[18].mxu1  ;;  %v1318_v20 = vpop.f32.mrb[18].mxu0  ;;  %2137 = vmatprep.subr.bf16.mxu1 %v5382_v15 }
 0x371   :  { %v6405_v23 = vpack.c.bf16 %v1336_v18, %v1336_v18  ;;  %v1333_v27 = vmax.f32 %v1207_v19, %v1318_v20  ;;  %v1209_v28 = vpop.f32.mrb[19].mxu1  ;;  %v1320_v29 = vpop.f32.mrb[19].mxu0  ;;  %2138 = vmatpush1.bf16.msra.mxu1 %v5380_v2 }
 0x372   :  { %v1353_v29 = vld [vmem:[#allocation3 + $0x14] sm:$0x1] }
 0x373   :  { %v1337_v25 = vmax.f32 %v1333_v27, 0.0  ;;  %v1360_v30 = vshrl.u32 %v6405_v23, 16  ;;  %v1363_v31 = vshll.u32 %v6405_v23, 16  ;;  %1349 = vst.msk [vmem:[#allocation3] sm:$0xf] %vm1348_vm9, %v6405_v23  ;;  %v4437_v42 = vrot.slane %v6405_v23, 9 }
 0x374   :  { %v1212_v32 = vpop.f32.mrb[20].mxu1  ;;  %v1323_v33 = vpop.f32.mrb[20].mxu0  ;;  %v4438_v28 = vrot.slane %v6405_v23, 10 }
 0x375   :  { %v6411_v35 = vpack.c.bf16 %v1337_v25, %v1337_v25  ;;  %v1334_v36 = vmax.f32 %v1212_v32, %v1323_v33  ;;  %v1214_v37 = vpop.f32.mrb[21].mxu1  ;;  %v1325_v38 = vpop.f32.mrb[21].mxu0  ;;  %v1362_v39 = vrot.slane %v1360_v30, 4  ;;  %v1365_v40 = vrot.slane %v1363_v31, 5 }
 0x376   :  { %v6414_v43 = vrot.slane %v1360_v30, 5  ;;  %v1436_v57 = vrot.slane %v1363_v31, 6 }
 0x377   :  { %v1338_v44 = vmax.f32 %v1334_v36, 0.0  ;;  %v6417_v34 = vshrl.u32 %v6411_v35, 16  ;;  %v1406_v45 = vrot.slane %v6411_v35, 5  ;;  %v1366_v46 = vor.u32 %v1365_v40, %v1362_v39  ;;  %v5385_v36 = vld [vmem:[%s7399_s7 + $0x94] ss:$8 sps:$4 sm:$0xff]  }
 0x378   :  { %v1217_v48 = vpop.f32.mrb[22].mxu1  ;;  %v1328_v49 = vpop.f32.mrb[22].mxu0  ;;  %v6421_v50 = vshll.u32 %v6411_v35, 16  ;;  %v4442_v55 = vrot.slane %v6411_v35, 11  ;;  %v1472_v56 = vrot.slane %v6411_v35, 6  ;;  %v1437_v27 = vor.u32 %v1436_v57, %v6414_v43  ;;  %2139 = vmatprep.subr.bf16.mxu1 %v5385_v36 }
 0x379   :  { %v6431_v58 = vpack.c.bf16 %v1338_v44, %v1338_v44  ;;  %v1335_v59 = vmax.f32 %v1217_v48, %v1328_v49  ;;  %1379 = vrot.lane.b32.xlu0 %v6417_v34, %s5511_s4  ;;  %v1525_v60 = vrot.slane %v6417_v34, 6  ;;  %v1219_v61 = vpop.f32.mrb[23].mxu1  ;;  %v1330_v62 = vpop.f32.mrb[23].mxu0  ;;  %v1408_v63 = vrot.slane %v1406_v45, 4  ;;  %v5383_v43 = vld [vmem:[%s7399_s7 + $0x90] ss:$8 sps:$4 sm:$0xff]  }
 0x37a   :  { %v1439_v1 = vrot.slane %v6417_v34, 5  ;;  %v1367_v3 = vrot.slane %v1366_v46, 4  ;;  %v1371_v4 = vrot.slane %v6421_v50, 5  ;;  %v1528_v5 = vrot.slane %v6421_v50, 7  ;;  %v5388_v49 = vld [vmem:[%s7399_s7 + $0xa4] ss:$8 sps:$4 sm:$0xff]   ;;  %2140 = vmatpush1.bf16.msra.mxu1 %v5383_v43 }
 0x37b   :  { %v1339_v6 = vmax.f32 %v1335_v59, 0.0  ;;  %1411 = vrot.lane.b32.xlu1 %v1408_v63, %s5512_s20  ;;  %v1532_v7 = vshrl.u32 %v6431_v58, 16  ;;  %v1535_v8 = vshll.u32 %v6431_v58, 16  ;;  %v1407_v9 = vsel %vm6425_vm4, %v4437_v42, %v1406_v45  ;;  %vm6466_vm4 = vmand %vm1350_vm0, %vm1351_vm13  ;;  %2141 = vmatprep.subr.bf16.mxu1 %v5388_v49  ;;  %v5391_v59 = vld [vmem:[%s7399_s7 + $0xb4] ss:$8 sps:$4 sm:$0xff]  }
 0x37c   :  { %v1443_v10 = vrot.slane %v1439_v1, 4  ;;  %v1372_v11 = vsel %vm1358_vm8, %v1367_v3, %v1371_v4  ;;  %v1529_v12 = vor.u32 %v1528_v5, %v1525_v60  ;;  %v1566_v13 = vrot.slane %v6431_v58, 7  ;;  %v5389_v60 = vld [vmem:[%s7399_s7 + $0xb0] ss:$8 sps:$4 sm:$0xff]   ;;  %v5397_v63 = vld [vmem:[%s7399_s7 + $0xd4] ss:$8 sps:$4 sm:$0xff]  }
 0x37d   :  { %v6462_v16 = vpack.c.bf16 %v1339_v6, %v1339_v6  ;;  %v1534_v17 = vrot.slane %v1532_v7, 6  ;;  %v1537_v18 = vrot.slane %v1535_v8, 7  ;;  %v1602_v19 = vrot.slane %v1532_v7, 7  ;;  %v5398_v3 = vld [vmem:[%s7399_s7 + $0xe0] ss:$8 sps:$4 sm:$0xff]  }
 0x37e   :  { %1446 = vrot.lane.b32.xlu0 %v1443_v10, %s5513_s23  ;;  %v1567_v21 = vsel %vm5838_vm5, %v4442_v55, %v1566_v13  ;;  %v1530_v30 = vrot.slane %v1529_v12, 4  ;;  %v1440_v26 = vrot.slane %v6421_v50, 6  ;;  %v1473_v23 = vsel %vm6455_vm10, %v4438_v28, %v1472_v56  ;;  %vm6496_vm5 = vmor %vm1432_vm3, %vm1433_vm12  ;;  %v5386_v50 = vld [vmem:[%s7399_s7 + $0xa0] ss:$8 sps:$4 sm:$0xff]   ;;  %v5401_v4 = vld [vmem:[%s7399_s7 + $0xf0] ss:$8 sps:$4 sm:$0xff]  }
 0x37f   :  { %v1608_v25 = vshll.u32 %v6462_v16, 16  ;;  %v1538_v31 = vor.u32 %v1537_v18, %v1534_v17  ;;  %v1606_v33 = vrot.slane %v1602_v19, 4  ;;  %v4441_v39 = vrot.slane %v6411_v35, 10  ;;  %2142 = vmatpush1.bf16.msra.mxu1 %v5386_v50  ;;  %v5409_v5 = vld [vmem:[%s7399_s7 + $0x104] ss:$8 sps:$4 sm:$0xff]  }
 0x380   :  { %v1506_v40 = vrot.slane %v6431_v58, 6  ;;  %v1354_v42 = vsel %vm6466_vm4, %v6411_v35, %v1353_v29  ;;  %v1438_v44 = vrot.slane %v1437_v27, 4  ;;  %v1441_v34 = vor.u32 %v1440_v26, %v1439_v1  ;;  %2143 = vmatprep.subr.bf16.mxu1 %v5391_v59  ;;  %v5394_v35 = vld [vmem:[%s7399_s7 + $0xc4] ss:$8 sps:$4 sm:$0xff]   ;;  %v5407_v27 = vld [vmem:[%s7399_s7 + $0x100] ss:$8 sps:$4 sm:$0xff]  }
 0x381   :  { %v1539_v37 = vsel %vm1521_vm11, %v1530_v30, %v1538_v31  ;;  %v1610_v45 = vsel %vm6483_vm15, %v1606_v33, %v1608_v25  ;;  %1355 = vst [vmem:[#allocation3 + $0x14] sm:$0x1] %v1354_v42  ;;  %v1605_v55 = vor.u32 %v1602_v19, %v1535_v8  ;;  %v1474_v57 = vrot.slane %v1472_v56, 4  ;;  %v5392_v56 = vld [vmem:[%s7399_s7 + $0xc0] ss:$8 sps:$4 sm:$0xff]  }
 0x382   :  { %1377 = vrot.lane.b32.xlu0 %v1372_v11, %s5511_s4  ;;  %1541 = vrot.lane.b32.xlu1 %v1539_v37, %s5511_s4  ;;  %v6514_v46 = vsel %vm6455_vm10, %v4441_v39, %v1506_v40  ;;  %v1442_v48 = vsel %vm6496_vm5, %v1438_v44, %v1441_v34  ;;  %v1508_v52 = vrot.slane %v1506_v40, 4  ;;  %v1568_v61 = vrot.slane %v1566_v13, 4  ;;  %v5400_v1 = vld [vmem:[%s7399_s7 + $0xe4] ss:$8 sps:$4 sm:$0xff]  }
 0x383   :  { %v1540_v62 = vrot.slane %v1538_v31, 4  ;;  %2144 = vmatpush1.bf16.msra.mxu1 %v5389_v60  ;;  %vm7428_vm8 = vcmask 850944   ;;  %vm7415_vm4 = vcmask 1041024   ;;  %vm7416_vm11 = vcmask 454660   ;;  %v5433_v60 = vld [vmem:[%s7399_s7 + $0x170] ss:$8 sps:$4 sm:$0xff]  }
 0x384   :  { %1518 = vst.msk [vmem:[#allocation3 + $0x28] sm:$0x1] %vm1350_vm0, %v1508_v52  ;;  %2145 = vmatprep.subr.bf16.mxu1 %v5394_v35  ;;  %vm7418_vm0 = vcmask 1041216   ;;  %vm6581_vm12 = vmand %vm7415_vm4, %vm1351_vm13  ;;  %vm7421_vm5 = vcmask 1044288  }
 0x385   :  { %vm1393_vm3 = vmand %vm7418_vm0, %vm1351_vm13  ;;  %vm1420_vm0 = vcmask 1044096  }
 0x386   :  { %1409 = vrot.lane.b32.xlu0 %v1407_v9, %s5512_s20  ;;  %1569 = vrot.lane.b32.xlu1 %v1567_v21, %s5512_s20  ;;  %vm1397_vm10 = vmor %vm1396_vm6, %vm1393_vm3  ;;  %vm7420_vm3 = vcmask 654340   ;;  %vm7424_vm6 = vsmask.f32 7938 }
 0x387   :  { %2146 = vmatpush1.bf16.msra.mxu1 %v5392_v56  ;;  %vm6587_vm15 = vmand %vm7416_vm11, %vm7419_vm2  ;;  %vm7423_vm11 = vcmask 258052   ;;  %vm1421_vm2 = vcmask 457732  }
 0x388   :  { %2147 = vmatprep.subr.bf16.mxu1 %v5397_v63  ;;  %v1398_v9 = vld [vmem:[#allocation3 + $0x14] sm:$0x11]  ;;  %vm6597_vm4 = vmor %vm7420_vm3, %vm7421_vm5 }
 0x389   :  { %vm6603_vm1 = vmand %vm1348_vm9, %vm7424_vm6  ;;  %vm7461_vm9 = vsmask.f32 4352 }
 0x38a   :  { %1611 = vrot.lane.b32.xlu0 %v1605_v55, %s5513_s23  ;;  %1477 = vrot.lane.b32.xlu1 %v1474_v57, %s5507_s2  ;;  %vm6610_vm3 = vmand %vm7422_vm14, %vm1351_vm13  ;;  %vm7427_vm14 = vsmask.f32 7954 }
 0x38b   :  { %2148 = vmatpush1.bf16.msra.mxu1 %v5395_v0  ;;  %vm6622_vm5 = vmand %vm7423_vm11, %vm7461_vm9 }
 0x38c   :  { %2149 = vmatprep.subr.bf16.mxu1 %v5400_v1  ;;  %vm6658_vm11 = vmand %vm1420_vm0, %vm7424_vm6 }
 0x38e   :  { %1571 = vrot.lane.b32.xlu0 %v1568_v61, %s5512_s20  ;;  %1543 = vrot.lane.b32.xlu1 %v1540_v62, %s5511_s4  ;;  %v5436_v62 = vld [vmem:[%s7399_s7 + $0x180] ss:$8 sps:$4 sm:$0xff]  }
 0x38f   :  { %2150 = vmatpush1.bf16.msra.mxu1 %v5398_v3 }
 0x392   :  { %1633 = vrot.lane.b32.xlu0 %v6431_v58, %s5507_s2  ;;  %1444 = vrot.lane.b32.xlu1 %v1442_v48, %s5513_s23  ;;  %v5403_v58 = vld [vmem:[%s7399_s7 + $0xf4] ss:$8 sps:$4 sm:$0xff]   ;;  %v7472_v48 = vmov 0 }
 0x393   :  { %2151 = vmatprep.subr.bf16.mxu1 %v5403_v58 }
 0x394   :  { %2152 = vmatpush1.bf16.msra.mxu1 %v5401_v4  ;;  %v5448_v4 = vld [vmem:[%s7399_s7 + $0x1c0] ss:$8 sps:$4 sm:$0xff]  }
 0x395   :  { %2172 = vmatprep.subr.bf16.mxu1 %v5409_v5 }
 0x396   :  { %1613 = vrot.lane.b32.xlu0 %v1610_v45, %s5513_s23  ;;  %1475 = vrot.lane.b32.xlu1 %v1473_v23, %s5507_s2 }
 0x39a   :  { %1635 = vrot.lane.b32.xlu1 %v6462_v16, %s5507_s2 }
 0x3eb   :  { %v1380_v6 = vpop.permute.xlu0 %1379 }
 0x3ec   :  { %v1382_v7 = vrot.slane %v1380_v6, 4 }
 0x3ed   :  { %v1412_v13 = vpop.permute.xlu1 %1411 }
 0x3ee   :  { %v1385_v8 = vsel %vm7428_vm8, %v1382_v7, %v1380_v6  ;;  %v1414_v15 = vrot.slane %v1412_v13, 4 }
 0x3ef   :  { %v1399_v10 = vsel %vm1397_vm10, %v1385_v8, %v1398_v9  ;;  %vm1428_vm10 = vmor %vm6587_vm15, %vm6581_vm12  ;;  %vm7464_vm15 = vcmask 1044288  }
 0x3f0   :  { %1400 = vst [vmem:[#allocation3 + $0x14] sm:$0x11] %v1399_v10  ;;  %v1447_v14 = vpop.permute.xlu0 %1446  ;;  %v1417_v2 = vsel %vm7426_vm7, %v1414_v15, %v1412_v13  ;;  %vm1422_vm12 = vmor %vm1421_vm2, %vm1420_vm0  ;;  %vm7474_vm0 = vcmask 1041216  }
 0x3f1   :  { %v1449_v38 = vrot.slane %v1447_v14, 4 }
 0x3f4   :  { %v1378_v17 = vpop.permute.xlu0 %1377  ;;  %v1542_v18 = vpop.permute.xlu1 %1541 }
 0x3f5   :  { %v1381_v20 = vrot.slane %v1378_v17, 4  ;;  %v1545_v39 = vrot.slane %v1542_v18, 4 }
 0x3f7   :  { %v1429_v21 = vld [vmem:[#allocation3 + $0x18] sm:$0x11]  ;;  %v1384_v28 = vsel %vm7428_vm8, %v1381_v20, %v1378_v17  ;;  %v1514_v29 = vld [vmem:[#allocation3 + $0x14] sm:$0xf]  ;;  %v1547_v45 = vsel %vm7428_vm8, %v1545_v39, %v1542_v18 }
 0x3f8   :  { %v1430_v25 = vsel %vm1428_vm10, %v1417_v2, %v1429_v21  ;;  %1391 = vst.msk [vmem:[#allocation3] sm:$0xff] %vm6597_vm4, %v1384_v28  ;;  %v1515_v31 = vsel %vm6603_vm1, %v6514_v46, %v1514_v29  ;;  %v1410_v32 = vpop.permute.xlu0 %1409  ;;  %v1570_v26 = vpop.permute.xlu1 %1569  ;;  %vm6635_vm10 = vmand %vm7464_vm15, %vm7424_vm6  ;;  %vm7467_vm4 = vcmask 654340   ;;  %vm7425_vm1 = vcmask 457728  }
 0x3f9   :  { %1431 = vst [vmem:[#allocation3 + $0x18] sm:$0x11] %v1430_v25  ;;  %1516 = vst [vmem:[#allocation3 + $0x14] sm:$0xf] %v1515_v31  ;;  %v1413_v33 = vrot.slane %v1410_v32, 4  ;;  %v1452_v44 = vsel %vm7425_vm1, %v1449_v38, %v1447_v14  ;;  %vm1455_vm6 = vcmask 1043904  }
 0x3fa   :  { %vm6641_vm9 = vmand %vm7467_vm4, %vm7427_vm14  ;;  %vm7432_vm1 = vcmask 261124   ;;  %v1573_v0 = vrot.slane %v1570_v26, 4  ;;  %v5416_v38 = vld [vmem:[%s7399_s7 + $0x124] ss:$8 sps:$4 sm:$0xff]  }
 0x3fb   :  { %v1416_v37 = vsel %vm7426_vm7, %v1413_v33, %v1410_v32  ;;  %vm1463_vm15 = vmor %vm6622_vm5, %vm6610_vm3  ;;  %vm7431_vm3 = vcmask 1040640   ;;  %vm7476_vm7 = vcmask 1041024  }
 0x3fc   :  { %1423 = vst.msk [vmem:[#allocation3 + $0x4] sm:$0xff] %vm1422_vm12, %v1416_v37  ;;  %v6646_v40 = vpop.permute.xlu0 %1611  ;;  %v1478_v42 = vpop.permute.xlu1 %1477  ;;  %vm1556_vm4 = vmor %vm6641_vm9, %vm6635_vm10  ;;  %vm7430_vm12 = vcmask 61444   ;;  %vm7475_vm10 = vcmask 651268   ;;  %v5411_v37 = vld [vmem:[%s7399_s7 + $0x110] ss:$8 sps:$4 sm:$0xff]  }
 0x3fd   :  { %vm6666_vm5 = vmand %vm1421_vm2, %vm7427_vm14  ;;  %vm7477_vm2 = vcmask 454660   ;;  %v1480_v1 = vrot.slane %v1478_v42, 4  ;;  %v1615_v2 = vrot.slane %v6646_v40, 4 }
 0x3fe   :  { %v7473_v48 = vsel %vm6666_vm5, 4294967295, %v7472_v48  ;;  %vm1562_vm9 = vmor %vm7475_vm10, %vm7474_vm0  ;;  %vm7484_vm0 = vcmask 654336  }
 0x3ff   :  { %vm1589_vm14 = vmor %vm7477_vm2, %vm7476_vm7  ;;  %vm1481_vm2 = vcmask 261120  }
 0x400   :  { %v1464_v34 = vld [vmem:[#allocation3 + $0x1c] sm:$0x11]  ;;  %v1557_v46 = vld [vmem:[#allocation3 + $0x14] sm:$0xff]  ;;  %v1572_v49 = vpop.permute.xlu0 %1571  ;;  %v1544_v50 = vpop.permute.xlu1 %1543  ;;  %vm6676_vm8 = vmand %vm7431_vm3, %vm1351_vm13  ;;  %vm7485_vm13 = vnez %v7473_v48  ;;  %vm7488_vm3 = vcmask 258052   ;;  %v1483_v10 = vsel %vm1481_vm2, %v1480_v1, %v1478_v42 }
 0x401   :  { %v1465_v52 = vsel %vm1463_vm15, %v1452_v44, %v1464_v34  ;;  %v1558_v55 = vsel %vm1556_vm4, %v1547_v45, %v1557_v46  ;;  %v1574_v57 = vrot.slane %v1572_v49, 4  ;;  %v1546_v59 = vrot.slane %v1544_v50, 4  ;;  %vm1457_vm7 = vmor %vm7432_vm1, %vm1455_vm6  ;;  %v5414_v42 = vld [vmem:[%s7399_s7 + $0x120] ss:$8 sps:$4 sm:$0xff]   ;;  %v5420_v34 = vld [vmem:[%s7399_s7 + $0x134] ss:$8 sps:$4 sm:$0xff]  }
 0x402   :  { %1466 = vst [vmem:[#allocation3 + $0x1c] sm:$0x11] %v1465_v52  ;;  %1559 = vst [vmem:[#allocation3 + $0x14] sm:$0xff] %v1558_v55  ;;  %vm7480_vm15 = vcmask 850944   ;;  %vm7481_vm4 = vsmask.f32 4352 }
 0x403   :  { %v1548_v61 = vsel %vm7480_vm15, %v1546_v59, %v1544_v50  ;;  %vm6683_vm5 = vmand %vm7430_vm12, %vm7481_vm4  ;;  %v1576_v35 = vsel %vm7484_vm0, %v1574_v57, %v1572_v49  ;;  %vm1486_vm15 = vcmask 1043712   ;;  %vm1487_vm4 = vcmask 64516   ;;  %v5418_v45 = vld [vmem:[%s7399_s7 + $0x130] ss:$8 sps:$4 sm:$0xff]   ;;  %v5423_v46 = vld [vmem:[%s7399_s7 + $0x144] ss:$8 sps:$4 sm:$0xff]  }
 0x404   :  { %1563 = vst.msk [vmem:[#allocation3 + $0x28] sm:$0x11] %vm1562_vm9, %v1548_v61  ;;  %v6688_v56 = vpop.permute.xlu0 %1633  ;;  %v1445_v63 = vpop.permute.xlu1 %1444  ;;  %vm1583_vm10 = vmor %vm7485_vm13, %vm6658_vm11  ;;  %vm7486_vm0 = vcmask 457728   ;;  %vm7487_vm12 = vcmask 1040832   ;;  %vm7500_vm11 = vcmask 1040640  }
 0x405   :  { %v1448_v3 = vrot.slane %v1445_v63, 4  ;;  %1590 = vst.msk [vmem:[#allocation3 + $0x2c] sm:$0x11] %vm1589_vm14, %v1576_v35  ;;  %vm1494_vm9 = vmor %vm6683_vm5, %vm6676_vm8  ;;  %vm7491_vm14 = vcmask 654336   ;;  %vm7492_vm5 = vsmask.f32 7938 }
 0x406   :  { %vm6703_vm1 = vmor %vm7488_vm3, %vm7487_vm12  ;;  %v1575_v7 = vsel %vm7491_vm14, %v1573_v0, %v1570_v26  ;;  %v5413_v26 = vld [vmem:[%s7399_s7 + $0x114] ss:$8 sps:$4 sm:$0xff]   ;;  %v1637_v36 = vrot.slane %v6688_v56, 4  ;;  %v5421_v48 = vld [vmem:[%s7399_s7 + $0x140] ss:$8 sps:$4 sm:$0xff]  }
 0x407   :  { %v1451_v58 = vsel %vm7486_vm0, %v1448_v3, %v1445_v63  ;;  %vm1488_vm8 = vmor %vm1487_vm4, %vm1486_vm15  ;;  %v5429_v50 = vld [vmem:[%s7399_s7 + $0x154] ss:$8 sps:$4 sm:$0xff]   ;;  %v5427_v52 = vld [vmem:[%s7399_s7 + $0x150] ss:$8 sps:$4 sm:$0xff]  }
 0x408   :  { %1458 = vst.msk [vmem:[#allocation3 + $0x8] sm:$0xff] %vm1457_vm7, %v1451_v58  ;;  %v1614_v5 = vpop.permute.xlu0 %1613  ;;  %v1476_v6 = vpop.permute.xlu1 %1475  ;;  %vm6718_vm3 = vmand %vm1455_vm6, %vm7492_vm5  ;;  %vm7496_vm7 = vsmask.f32 7954  ;;  %vm7501_vm6 = vcmask 61444   ;;  %v1639_v39 = vsel %vm1481_vm2, %v1637_v36, %v6688_v56  ;;  %v5432_v55 = vld [vmem:[%s7399_s7 + $0x164] ss:$8 sps:$4 sm:$0xff]  }
 0x409   :  { %v1584_v8 = vld [vmem:[#allocation3 + $0x18] sm:$0xff]  ;;  %v1495_v9 = vld [vmem:[#allocation3 + $0x20] sm:$0x11]  ;;  %v1616_v11 = vrot.slane %v1614_v5, 4  ;;  %v1479_v12 = vrot.slane %v1476_v6, 4  ;;  %vm7495_vm12 = vmmov %vm7486_vm0  ;;  %vm7497_vm0 = vcmask 261124  }
 0x40a   :  { %v1585_v13 = vsel %vm1583_vm10, %v1575_v7, %v1584_v8  ;;  %v1496_v14 = vsel %vm1494_vm9, %v1483_v10, %v1495_v9  ;;  %vm6726_vm14 = vmand %vm7497_vm0, %vm7496_vm7  ;;  %v5404_v30 = vld [vmem:[#allocation3] ss:$20 sps:$4 sm:$0xff]   ;;  %v5430_v57 = vld [vmem:[%s7399_s7 + $0x160] ss:$8 sps:$4 sm:$0xff]   ;;  %vm2275_vm0 = vcmask 146432  }
 0x40b   :  { %1586 = vst [vmem:[#allocation3 + $0x18] sm:$0xff] %v1585_v13  ;;  %1497 = vst [vmem:[#allocation3 + $0x20] sm:$0x11] %v1496_v14  ;;  %v1618_v16 = vsel %vm7495_vm12, %v1616_v11, %v1614_v5  ;;  %v1482_v17 = vsel %vm1481_vm2, %v1479_v12, %v1476_v6  ;;  %v5435_v59 = vld [vmem:[%s7399_s7 + $0x174] ss:$8 sps:$4 sm:$0xff]   ;;  %v1728_v10 = vld [vmem:[%s7399_s7 + $0x200] sm:$0xff] }
 0x40c   :  { %1632 = vst.msk [vmem:[#allocation3 + $0x30] sm:$0x11] %vm6703_vm1, %v1618_v16  ;;  %v1636_v19 = vpop.permute.xlu1 %1635  ;;  %vm1653_vm13 = vmor %vm7501_vm6, %vm7500_vm11  ;;  %v1661_v28 = vld [vmem:[#allocation3 + $0x28] sm:$0x11]  ;;  %v5441_v35 = vld [vmem:[%s7399_s7 + $0x194] ss:$8 sps:$4 sm:$0xff]   ;;  %v4520_v12 = vcombine.high %v1728_v10, %v1728_v10  ;;  %v4519_v13 = vcombine.low %v1728_v10, %v1728_v10 }
 0x40d   :  { %1489 = vst.msk [vmem:[#allocation3 + $0xc] sm:$0xff] %vm1488_vm8, %v1482_v17  ;;  %v1638_v20 = vrot.slane %v1636_v19, 4  ;;  %vm1625_vm10 = vmor %vm6726_vm14, %vm6718_vm3  ;;  %v4451_v23 = vcombine.high %v1661_v28, %v1661_v28  ;;  %v4450_v44 = vcombine.low %v1661_v28, %v1661_v28  ;;  %v5438_v61 = vld [vmem:[%s7399_s7 + $0x184] ss:$8 sps:$4 sm:$0xff]   ;;  %v5439_v56 = vld [vmem:[%s7399_s7 + $0x190] ss:$8 sps:$4 sm:$0xff]  }
 0x40e   :  { %vm7502_vm1 = vmmov %vm7495_vm12  ;;  %v5444_v63 = vld [vmem:[%s7399_s7 + $0x1a4] ss:$8 sps:$4 sm:$0xff]   ;;  %v5442_v0 = vld [vmem:[%s7399_s7 + $0x1a0] ss:$8 sps:$4 sm:$0xff]   ;;  %vm7509_vm14 = vcmask 1041408  }
 0x40f   :  { %v1640_v21 = vsel %vm1481_vm2, %v1638_v20, %v1636_v19  ;;  %v1617_v29 = vsel %vm7502_vm1, %v1615_v2, %v6646_v40  ;;  %vm7503_vm9 = vmmov %vm7492_vm5  ;;  %v5447_v1 = vld [vmem:[%s7399_s7 + $0x1b4] ss:$8 sps:$4 sm:$0xff]   ;;  %v5445_v3 = vld [vmem:[%s7399_s7 + $0x1b0] ss:$8 sps:$4 sm:$0xff]   ;;  %vm5515_vm1 = vmmov 0  }
 0x410   :  { %1654 = vst.msk [vmem:[#allocation3 + $0x34] sm:$0x11] %vm1653_vm13, %v1640_v21  ;;  %vm6750_vm8 = vmand %vm1486_vm15, %vm7503_vm9  ;;  %v5450_v58 = vld [vmem:[%s7399_s7 + $0x1c4] ss:$8 sps:$4 sm:$0xff]   ;;  %v5453_v5 = vld [vmem:[%s7399_s7 + $0x1d4] ss:$8 sps:$4 sm:$0xff]  }
 0x411   :  { %vm7506_vm5 = vmmov %vm7496_vm7  ;;  %v5451_v6 = vld [vmem:[%s7399_s7 + $0x1d0] ss:$8 sps:$4 sm:$0xff]   ;;  %v5456_v7 = vld [vmem:[%s7399_s7 + $0x1e4] ss:$8 sps:$4 sm:$0xff]   ;;  %vm2108_vm7 = vcmask 64512   ;;  %vm2734_vm9 = vcmask 523264  }
 0x412   :  { %v1626_v25 = vld [vmem:[#allocation3 + $0x1c] sm:$0xff]  ;;  %v5406_v32 = vld [vmem:[#allocation3 + $0x4] ss:$20 sps:$4 sm:$0xff]   ;;  %vm1646_vm3 = vmand %vm1487_vm4, %vm7506_vm5  ;;  %vm7507_vm4 = vcmask 1043456  }
 0x413   :  { %v1627_v31 = vsel %vm1625_vm10, %v1617_v29, %v1626_v25  ;;  %2153 = vmatprep.mubr.bf16.mxu1 %v5406_v32  ;;  %vm1647_vm15 = vmor %vm1646_vm3, %vm6750_vm8  ;;  %v5454_v8 = vld [vmem:[%s7399_s7 + $0x1e0] ss:$8 sps:$4 sm:$0xff]   ;;  %v5459_v9 = vld [vmem:[%s7399_s7 + $0x1f4] ss:$8 sps:$4 sm:$0xff]   ;;  %vm2452_vm10 = vcmask 130048  }
 0x414   :  { %1628 = vst [vmem:[#allocation3 + $0x1c] sm:$0xff] %v1627_v31  ;;  %2154 = vmatmul.mubr.bf16.vlgmr.msra.gmra.mrb[24].mxu1 %v5404_v30  ;;  %v5457_v11 = vld [vmem:[%s7399_s7 + $0x1f0] ss:$8 sps:$4 sm:$0xff]   ;;  %vm7508_vm12 = vmmov %vm7507_vm4  ;;  %v1729_v2 = vld [vmem:[%s7400_s8] sm:$0x3] }
 0x415   :  { %2173 = vmatpush1.bf16.msra.mxu1 %v5407_v27  ;;  %2163 = vmatprep.mubr.bf16.mxu1 %v4451_v23  ;;  %v2116_v16 = vsel %vm7508_vm12, %v4519_v13, 0  ;;  %v1734_v21 = vrot.slane %v1729_v2, %v6175_v51  ;;  %v1738_v28 = vrot.slane %v1729_v2, %v610_v54  ;;  %v2274_v54 = vld [vmem:[%s7401_s9] sm:$0xff]  ;;  %vm7510_vm11 = vmmov %vm7509_vm14  ;;  %v2529_v2 = vld [vmem:[%s7404_s12 + $0x18] sm:$0xff] }
 0x416   :  { %2174 = vmatprep.subr.bf16.mxu1 %v5413_v26  ;;  %vm7511_vm6 = vmmov %vm7510_vm11  ;;  %v2526_v13 = vld [vmem:[%s7404_s12] sm:$0xff] }
 0x417   :  { %v1662_v14 = vld [vmem:[#allocation3 + $0x30] sm:$0x11]  ;;  %v5465_v20 = vld [vmem:[#allocation3 + $0x38] ss:$0 sps:$4 sm:$0x11]   ;;  %vm7512_vm13 = vmmov %vm7511_vm6 }
 0x418   :  { %v4453_v17 = vcombine.high %v1662_v14, %v1662_v14  ;;  %v4452_v18 = vcombine.low %v1662_v14, %v1662_v14  ;;  %v2527_v14 = vld [vmem:[%s7404_s12 + $0x8] sm:$0xff] }
 0x419   :  { %2175 = vmatpush1.bf16.msra.mxu1 %v5411_v37 }
 0x41a   :  { %2176 = vmatprep.subr.bf16.mxu1 %v5416_v38 }
 0x41b   :  { %v1648_v40 = vld [vmem:[#allocation3 + $0x20] sm:$0xff]  ;;  %v5424_v15 = vld [vmem:[#allocation3 + $0x8] ss:$20 sps:$4 sm:$0xff]  }
 0x41c   :  { %v1649_v43 = vsel %vm1647_vm15, %v1639_v39, %v1648_v40  ;;  %2164 = vmatmul.mubr.bf16.gmra.mrb[28].mxu1 %v4450_v44  ;;  %v2434_v44 = vld [vmem:[%s7403_s11] sm:$0xff] }
 0x41d   :  { %1650 = vst [vmem:[#allocation3 + $0x20] sm:$0xff] %v1649_v43  ;;  %2177 = vmatpush1.bf16.msra.mxu1 %v5414_v42 }
 0x41e   :  { %2178 = vmatprep.subr.bf16.mxu1 %v5420_v34  ;;  %v2435_v34 = vld [vmem:[%s7403_s11 + $0x8] sm:$0xff] }
 0x421   :  { %2179 = vmatpush1.bf16.msra.mxu1 %v5418_v45  ;;  %v2357_v45 = vld [vmem:[%s7402_s10] sm:$0xff] }
 0x422   :  { %2180 = vmatprep.subr.bf16.mxu1 %v5423_v46  ;;  %v5112_v46 = vpack.c.bf16 %v2435_v34, %v2434_v44  ;;  %v2542_v44 = vld [vmem:[%s7404_s12 + $0x80] sm:$0xff]  ;;  %v2543_v34 = vld [vmem:[%s7404_s12 + $0x88] sm:$0xff] }
 0x424   :  { %v5426_v49 = vld [vmem:[#allocation3 + $0xc] ss:$20 sps:$4 sm:$0xff]   ;;  %v5464_v19 = vld [vmem:[#allocation3 + $0x10] ss:$20 sps:$4 sm:$0xff]  }
 0x425   :  { %2204 = vmatprep.mubr.bf16.mxu1 %v5426_v49  ;;  %2181 = vmatpush1.bf16.msra.mxu1 %v5421_v48  ;;  %v2436_v48 = vld [vmem:[%s7403_s11 + $0x10] sm:$0xff]  ;;  %v2437_v49 = vld [vmem:[%s7403_s11 + $0x18] sm:$0xff] }
 0x426   :  { %2182 = vmatprep.subr.bf16.mxu1 %v5429_v50  ;;  %v5115_v50 = vpack.c.bf16 %v2437_v49, %v2436_v48 }
 0x429   :  { %2183 = vmatpush1.bf16.msra.mxu1 %v5427_v52  ;;  %v2438_v52 = vld [vmem:[%s7403_s11 + $0x20] sm:$0xff] }
 0x42a   :  { %2184 = vmatprep.subr.bf16.mxu1 %v5432_v55  ;;  %v2439_v55 = vld [vmem:[%s7403_s11 + $0x28] sm:$0xff] }
 0x42d   :  { %2185 = vmatpush1.bf16.msra.mxu1 %v5430_v57  ;;  %v5118_v57 = vpack.c.bf16 %v2439_v55, %v2438_v52 }
 0x42e   :  { %2186 = vmatprep.subr.bf16.mxu1 %v5435_v59  ;;  %v2440_v59 = vld [vmem:[%s7403_s11 + $0x30] sm:$0xff] }
 0x431   :  { %2187 = vmatpush1.bf16.msra.mxu1 %v5433_v60  ;;  %v2441_v60 = vld [vmem:[%s7403_s11 + $0x38] sm:$0xff] }
 0x432   :  { %2188 = vmatprep.subr.bf16.mxu1 %v5438_v61  ;;  %v5121_v61 = vpack.c.bf16 %v2441_v60, %v2440_v59  ;;  %v2616_v59 = vld [vmem:[%s7405_s13] sm:$0xff] }
 0x433   :  { %v5466_v60 = vld [vmem:[%s7406_s14 + $0x20] sm:$0xff]  }
 0x435   :  { %2189 = vmatpush1.bf16.msra.mxu1 %v5436_v62  ;;  %v2442_v62 = vld [vmem:[%s7403_s11 + $0x40] sm:$0xff] }
 0x436   :  { %2190 = vmatprep.subr.bf16.mxu1 %v5441_v35  ;;  %v2443_v35 = vld [vmem:[%s7403_s11 + $0x48] sm:$0xff] }
 0x439   :  { %2191 = vmatpush1.bf16.msra.mxu1 %v5439_v56  ;;  %v5124_v56 = vpack.c.bf16 %v2443_v35, %v2442_v62  ;;  %v5469_v62 = vld [vmem:[%s7406_s14 + $0x30] sm:$0xff]   ;;  %v5470_v35 = vld [vmem:[%s7406_s14 + $0x48] sm:$0xff]  }
 0x43a   :  { %2192 = vmatprep.subr.bf16.mxu1 %v5444_v63  ;;  %v2444_v63 = vld [vmem:[%s7403_s11 + $0x50] sm:$0xff] }
 0x43d   :  { %2193 = vmatpush1.bf16.msra.mxu1 %v5442_v0  ;;  %v2445_v0 = vld [vmem:[%s7403_s11 + $0x58] sm:$0xff] }
 0x43e   :  { %2194 = vmatprep.subr.bf16.mxu1 %v5447_v1  ;;  %v5127_v1 = vpack.c.bf16 %v2445_v0, %v2444_v63  ;;  %v5472_v63 = vld [vmem:[%s7406_s14 + $0x50] sm:$0xff]   ;;  %v5474_v0 = vld [vmem:[%s7406_s14 + $0x58] sm:$0xff]  }
 0x441   :  { %2195 = vmatpush1.bf16.msra.mxu1 %v5445_v3  ;;  %v2446_v3 = vld [vmem:[%s7403_s11 + $0x60] sm:$0xff] }
 0x442   :  { %2196 = vmatprep.subr.bf16.mxu1 %v5450_v58  ;;  %v2447_v58 = vld [vmem:[%s7403_s11 + $0x68] sm:$0xff] }
 0x445   :  { %2197 = vmatpush1.bf16.msra.mxu1 %v5448_v4  ;;  %v5130_v4 = vpack.c.bf16 %v2447_v58, %v2446_v3 }
 0x446   :  { %2198 = vmatprep.subr.bf16.mxu1 %v5453_v5  ;;  %v2448_v5 = vld [vmem:[%s7403_s11 + $0x70] sm:$0xff] }
 0x449   :  { %2199 = vmatpush1.bf16.msra.mxu1 %v5451_v6  ;;  %v2449_v6 = vld [vmem:[%s7403_s11 + $0x78] sm:$0xff] }
 0x44a   :  { %2200 = vmatprep.subr.bf16.mxu1 %v5456_v7  ;;  %v5133_v7 = vpack.c.bf16 %v2449_v6, %v2448_v5 }
 0x44d   :  { %2201 = vmatpush1.bf16.msra.mxu1 %v5454_v8  ;;  %v2450_v8 = vld [vmem:[%s7403_s11 + $0x80] sm:$0xff] }
 0x44e   :  { %2202 = vmatprep.subr.bf16.mxu1 %v5459_v9  ;;  %v2451_v9 = vld [vmem:[%s7403_s11 + $0x88] sm:$0xff] }
 0x44f   :  { %v5136_v10 = vpack.c.bf16 %v2451_v9, %v2450_v8  ;;  %v5476_v8 = vld [vmem:[%s7406_s14 + $0x10] sm:$0xff]   ;;  %v5477_v9 = vld [vmem:[%s7406_s14 + $0x18] sm:$0xff]  }
 0x451   :  { %2203 = vmatpush1.bf16.msra.mxu1 %v5457_v11 }
 0x452   :  { %4521 = vmatprep.subr.msk.bf16.mxu1 %vm7507_vm4, %v4520_v12 }
 0x454   :  { %2205 = vmatmul.mubr.bf16.vlgmr.msra.gmra.mrb[24].mxu1 %v5424_v15 }
 0x455   :  { %2214 = vmatprep.mubr.bf16.mxu1 %v4453_v17  ;;  %2224 = vmatpush1.bf16.msra.mxu1 %v2116_v16 }
 0x456   :  { %4830 = vmatprep.subr.bf16.mxu1 %v5509_v22 }
 0x45c   :  { %2215 = vmatmul.mubr.bf16.gmra.mrb[28].mxu1 %v4452_v18 }
 0x45d   :  { %2255 = vmatprep.mubr.bf16.mxu1 %v5514_v53 }
 0x464   :  { %4522 = vmatmul.mubr.msk.bf16.vlgmr.msra.gmra.mrb[24].mxu1 %vm2108_vm7, %v5464_v19  ;;  %v5139_v19 = vpack.c.bf16 %v2527_v14, %v2526_v13  ;;  %v5481_v13 = vld [vmem:[%s7406_s14 + $0x78] sm:$0xff]  }
 0x465   :  { %2265 = vmatprep.mubr.bf16.mxu1 %v5514_v53 }
 0x46c   :  { %4523 = vmatmul.mubr.msk.bf16.gmra.mrb[28].mxu1 %vm2108_vm7, %v5465_v20  ;;  %v2528_v20 = vld [vmem:[%s7404_s12 + $0x10] sm:$0xff] }
 0x46d   :  { %4838 = vmatprep.mubr.msk.bf16.mxu1 %vm5515_vm1, %v5509_v22 }
 0x537   :  { %v2257_v27 = vpop.f32.mrb[24].mxu1 }
 0x538   :  { %v2259_v29 = vpop.f32.mrb[25].mxu1  ;;  %v5253_v30 = vadd.f32 %v2257_v27, %v1734_v21  ;;  %v2530_v27 = vld [vmem:[%s7404_s12 + $0x20] sm:$0xff] }
 0x539   :  { %v2261_v25 = vpop.f32.mrb[26].mxu1  ;;  %v5254_v26 = vadd.f32 %v2259_v29, %v1738_v28 }
 0x53a   :  { %v5255_v31 = vadd.f32 %v2261_v25, %v1734_v21  ;;  %v2263_v32 = vpop.f32.mrb[27].mxu1  ;;  %v2532_v25 = vld [vmem:[%s7404_s12 + $0x30] sm:$0xff] }
 0x53b   :  { %v5256_v33 = vadd.f32 %v2263_v32, %v1738_v28  ;;  %v2534_v32 = vld [vmem:[%s7404_s12 + $0x40] sm:$0xff] }
 0x53c   :  { %v5105_v23 = vpack.c.bf16 %v5255_v31, %v5253_v30  ;;  %v2533_v30 = vld [vmem:[%s7404_s12 + $0x38] sm:$0xff] }
 0x53d   :  { %v5103_v36 = vpack.c.bf16 %v5256_v33, %v5254_v26  ;;  %v5148_v31 = vpack.c.bf16 %v2533_v30, %v2532_v25  ;;  %v2535_v26 = vld [vmem:[%s7404_s12 + $0x48] sm:$0xff]  ;;  %v3018_v25 = vld [vmem:[%s7408_s16 + $0x40] sm:$0xff] }
 0x53e   :  { %v5151_v33 = vpack.c.bf16 %v2535_v26, %v2534_v32  ;;  %v3019_v30 = vld [vmem:[%s7408_s16 + $0x48] sm:$0xff]  ;;  %v3020_v32 = vld [vmem:[%s7408_s16 + $0x50] sm:$0xff]  ;;  %v3021_v26 = vld [vmem:[%s7408_s16 + $0x58] sm:$0xff] }
 0x53f   :  { %v2267_v37 = vpop.f32.mrb[28].mxu1  ;;  %5104 = vmatprep.subr.bf16.mxu0 %v5103_v36 }
 0x540   :  { %v2269_v38 = vpop.f32.mrb[29].mxu1  ;;  %5106 = vmatpush1.bf16.msra.mxu0 %v5105_v23  ;;  %v5257_v42 = vadd.f32 %v2267_v37, %v1734_v21  ;;  %v5142_v21 = vpack.c.bf16 %v2529_v2, %v2528_v20  ;;  %v3014_v20 = vld [vmem:[%s7408_s16 + $0x20] sm:$0xff]  ;;  %v3015_v2 = vld [vmem:[%s7408_s16 + $0x28] sm:$0xff] }
 0x541   :  { %v5258_v39 = vadd.f32 %v2269_v38, %v1738_v28  ;;  %v2271_v40 = vpop.f32.mrb[30].mxu1  ;;  %v2531_v28 = vld [vmem:[%s7404_s12 + $0x28] sm:$0xff]  ;;  %v2538_v38 = vld [vmem:[%s7404_s12 + $0x60] sm:$0xff] }
 0x542   :  { %v2272_v43 = vpop.f32.mrb[31].mxu1  ;;  %v5145_v29 = vpack.c.bf16 %v2531_v28, %v2530_v27  ;;  %v3016_v27 = vld [vmem:[%s7408_s16 + $0x30] sm:$0xff]  ;;  %v3017_v28 = vld [vmem:[%s7408_s16 + $0x38] sm:$0xff] }
 0x543   :  { %4524 = vmatprep.subr.msk.mxu0 %vm7509_vm14, %v5258_v39  ;;  %v2541_v43 = vld [vmem:[%s7404_s12 + $0x78] sm:$0xff] }
 0x544   :  { %4525 = vmatpush1.msk.msra.mxu0 %vm7510_vm11, %v5257_v42 }
 0x545   :  { %5108 = vmatprep.subr.bf16.mxu0 %v5103_v36  ;;  %4526 = vmatmul.mubr.msk.f32.vlgmr.msra.gmra.mrb[24].mxu0 %vm2275_vm0, %v2274_v54  ;;  %v2537_v36 = vld [vmem:[%s7404_s12 + $0x58] sm:$0xff] }
 0x546   :  { %5110 = vmatpush1.bf16.msra.mxu0 %v5105_v23  ;;  %2425 = vmatprep.mubr.f32.mxu0 %v5509_v22  ;;  %v2536_v23 = vld [vmem:[%s7404_s12 + $0x50] sm:$0xff] }
 0x547   :  { %4527 = vmatprep.subr.msk.mxu0 %vm7511_vm6, %v5258_v39  ;;  %v5154_v37 = vpack.c.bf16 %v2537_v36, %v2536_v23  ;;  %v2539_v39 = vld [vmem:[%s7404_s12 + $0x68] sm:$0xff]  ;;  %v3022_v23 = vld [vmem:[%s7408_s16 + $0x60] sm:$0xff] }
 0x548   :  { %v5157_v40 = vpack.c.bf16 %v2539_v39, %v2538_v38  ;;  %v3023_v36 = vld [vmem:[%s7408_s16 + $0x68] sm:$0xff]  ;;  %v3024_v38 = vld [vmem:[%s7408_s16 + $0x70] sm:$0xff]  ;;  %v3025_v39 = vld [vmem:[%s7408_s16 + $0x78] sm:$0xff] }
 0x54a   :  { %4528 = vmatpush1.msk.msra.mxu0 %vm7512_vm13, %v5257_v42  ;;  %v2540_v42 = vld [vmem:[%s7404_s12 + $0x70] sm:$0xff] }
 0x54b   :  { %4529 = vmatmul.mubr.msk.f32.vlgmr.msra.gmra.mrb[26].mxu0 %vm2275_vm0, %v2357_v45  ;;  %5111 = vmatprep.subr.bf16.mxu0 %v5510_v24  ;;  %v5160_v54 = vpack.c.bf16 %v2541_v43, %v2540_v42  ;;  %v5163_v45 = vpack.c.bf16 %v2543_v34, %v2542_v44 }
 0x54c   :  { %5113 = vmatpush1.bf16.msra.mxu0 %v5112_v46  ;;  %v5468_v46 = vld [vmem:[%s7406_s14 + $0x40] sm:$0xff]  }
 0x54d   :  { %5114 = vmatprep.subr.bf16.mxu0 %v5510_v24  ;;  %4831 = vmatpush3.bf16.msra.mxu1 %v5468_v46 }
 0x54e   :  { %4832 = vmatprep.subr.bf16.mxu1 %v5509_v22 }
 0x550   :  { %5116 = vmatpush1.bf16.msra.mxu0 %v5115_v50 }
 0x551   :  { %5117 = vmatprep.subr.bf16.mxu0 %v5510_v24  ;;  %4833 = vmatpush3.bf16.msra.mxu1 %v5470_v35 }
 0x552   :  { %4834 = vmatprep.subr.bf16.mxu1 %v5509_v22 }
 0x554   :  { %5119 = vmatpush1.bf16.msra.mxu0 %v5118_v57 }
 0x555   :  { %5120 = vmatprep.subr.bf16.mxu0 %v5510_v24  ;;  %4835 = vmatpush3.bf16.msra.mxu1 %v5472_v63 }
 0x556   :  { %4836 = vmatprep.subr.bf16.mxu1 %v5509_v22 }
 0x558   :  { %5122 = vmatpush1.bf16.msra.mxu0 %v5121_v61  ;;  %v5467_v61 = vld [vmem:[%s7406_s14 + $0x28] sm:$0xff]  }
 0x559   :  { %5123 = vmatprep.subr.bf16.mxu0 %v5510_v24  ;;  %4837 = vmatpush3.bf16.msra.mxu1 %v5474_v0 }
 0x55a   :  { %5165 = vmatprep.subr.bf16.mxu1 %v5510_v24 }
 0x55c   :  { %5125 = vmatpush1.bf16.msra.mxu0 %v5124_v56  ;;  %v5471_v56 = vld [vmem:[%s7406_s14 + $0x38] sm:$0xff]  }
 0x55d   :  { %5126 = vmatprep.subr.bf16.mxu0 %v5510_v24 }
 0x560   :  { %5128 = vmatpush1.bf16.msra.mxu0 %v5127_v1 }
 0x561   :  { %5129 = vmatprep.subr.bf16.mxu0 %v5510_v24 }
 0x564   :  { %5131 = vmatpush1.bf16.msra.mxu0 %v5130_v4  ;;  %v5473_v4 = vld [vmem:[%s7406_s14] sm:$0xff]  }
 0x565   :  { %5132 = vmatprep.subr.bf16.mxu0 %v5510_v24 }
 0x568   :  { %5134 = vmatpush1.bf16.msra.mxu0 %v5133_v7  ;;  %v5475_v7 = vld [vmem:[%s7406_s14 + $0x8] sm:$0xff]  }
 0x569   :  { %5135 = vmatprep.subr.bf16.mxu0 %v5510_v24 }
 0x56c   :  { %5137 = vmatpush1.bf16.msra.mxu0 %v5136_v10  ;;  %v5478_v10 = vld [vmem:[%s7406_s14 + $0x60] sm:$0xff]  }
 0x56d   :  { %5138 = vmatprep.subr.bf16.mxu0 %v5510_v24 }
 0x618   :  { %v2352_v11 = vpop.f32.mrb[24].mxu0 }
 0x619   :  { %v2354_v12 = vpop.f32.mrb[25].mxu0 }
 0x61e   :  { %v2427_v15 = vpop.f32.mrb[26].mxu0 }
 0x61f   :  { %v2432_v16 = vmax.f32 %v2352_v11, %v2427_v15  ;;  %v2429_v17 = vpop.f32.mrb[27].mxu0  ;;  %v5479_v11 = vld [vmem:[%s7406_s14 + $0x68] sm:$0xff]   ;;  %v3010_v15 = vld [vmem:[%s7408_s16] sm:$0xff] }
 0x620   :  { %v2433_v18 = vmax.f32 %v2354_v12, %v2429_v17  ;;  %v5480_v12 = vld [vmem:[%s7406_s14 + $0x70] sm:$0xff]  }
 0x622   :  { %4530 = vmatprep.mubr.msk.f32.mxu0 %vm2452_vm10, %v2433_v18 }
 0x623   :  { %2521 = vmatmul.mubr.f32.vlgmr.msra.gmra.mrb[28].mxu0 %v2432_v16 }
 0x624   :  { %5140 = vmatpush1.bf16.msra.mxu0 %v5139_v19  ;;  %4531 = vmatprep.mubr.msk.f32.mxu0 %vm2452_vm10, %v2433_v18  ;;  %v3012_v18 = vld [vmem:[%s7408_s16 + $0x10] sm:$0xff] }
 0x625   :  { %5141 = vmatprep.subr.bf16.mxu0 %v5510_v24 }
 0x628   :  { %5143 = vmatpush1.bf16.msra.mxu0 %v5142_v21  ;;  %v5172_v21 = vpack.c.bf16 %v3015_v2, %v3014_v20  ;;  %v7163_v20 = vld [vmem:[%s7436_s29 + $0x8] sm:$0xff]  ;;  %v7170_v2 = vld [vmem:[%s7436_s29 + $0x10] sm:$0xff] }
 0x629   :  { %5144 = vmatprep.subr.bf16.mxu0 %v5510_v24  ;;  %4267 = vst.msk [vmem:[#allocation4 + $0x48] sm:$0xff] %vm1481_vm2, %v7163_v20  ;;  %4268 = vst.msk [vmem:[#allocation4 + $0x50] sm:$0xff] %vm1481_vm2, %v7170_v2 }
 0x62c   :  { %5146 = vmatpush1.bf16.msra.mxu0 %v5145_v29  ;;  %v5175_v29 = vpack.c.bf16 %v3017_v28, %v3016_v27  ;;  %v7184_v27 = vld [vmem:[%s7436_s29 + $0x20] sm:$0xff]  ;;  %v7189_v28 = vld [vmem:[%s7436_s29 + $0x28] sm:$0xff] }
 0x62d   :  { %5147 = vmatprep.subr.bf16.mxu0 %v5510_v24  ;;  %4270 = vst.msk [vmem:[#allocation4 + $0xa0] sm:$0xff] %vm1481_vm2, %v7184_v27  ;;  %4271 = vst.msk [vmem:[#allocation4 + $0xa8] sm:$0xff] %vm1481_vm2, %v7189_v28 }
 0x630   :  { %5149 = vmatpush1.bf16.msra.mxu0 %v5148_v31  ;;  %v5178_v31 = vpack.c.bf16 %v3019_v30, %v3018_v25  ;;  %v7203_v25 = vld [vmem:[%s7436_s29 + $0x38] sm:$0xff]  ;;  %v3112_v30 = vand.u32 127, %v604_v41 }
 0x631   :  { %5150 = vmatprep.subr.bf16.mxu0 %v5510_v24  ;;  %4273 = vst.msk [vmem:[#allocation4 + $0xb8] sm:$0xff] %vm1481_vm2, %v7203_v25 }
 0x634   :  { %5152 = vmatpush1.bf16.msra.mxu0 %v5151_v33  ;;  %v5181_v33 = vpack.c.bf16 %v3021_v26, %v3020_v32 }
 0x635   :  { %5153 = vmatprep.subr.bf16.mxu0 %v5510_v24 }
 0x638   :  { %5155 = vmatpush1.bf16.msra.mxu0 %v5154_v37  ;;  %v5184_v37 = vpack.c.bf16 %v3023_v36, %v3022_v23 }
 0x639   :  { %5156 = vmatprep.subr.bf16.mxu0 %v5510_v24 }
 0x63c   :  { %5158 = vmatpush1.bf16.msra.mxu0 %v5157_v40  ;;  %v5187_v40 = vpack.c.bf16 %v3025_v39, %v3024_v38  ;;  %v3116_v38 = vadd.s32 8, %v6165_v47 }
 0x63d   :  { %5159 = vmatprep.subr.bf16.mxu0 %v5510_v24 }
 0x63e   :  { %v7219_v41 = vcvt.s32.f32 %v3116_v38 }
 0x640   :  { %5161 = vmatpush1.bf16.msra.mxu0 %v5160_v54 }
 0x641   :  { %5162 = vmatprep.subr.bf16.mxu0 %v5510_v24 }
 0x644   :  { %5164 = vmatpush1.bf16.msra.mxu0 %v5163_v45 }
 0x645   :  { %4801 = vmatprep.subr.mxu0 %v5509_v22 }
 0x647   :  { %2609 = vmatmul.mubr.f32.vlgmr.msra.gmra.mrb[30].mxu0 %v2432_v16  ;;  %v3011_v16 = vld [vmem:[%s7408_s16 + $0x8] sm:$0xff] }
 0x648   :  { %4803 = vmatprep.mubr.msk.f32.mxu0 %vm5515_vm1, %v5509_v22  ;;  %v5166_v17 = vpack.c.bf16 %v3011_v16, %v3010_v15  ;;  %v5518_v16 = vmov 2  }
 0x6f6   :  { %v2522_v48 = vpop.f32.mrb[28].mxu0 }
 0x6f7   :  { %v2524_v49 = vpop.f32.mrb[29].mxu0 }
 0x71a   :  { %v2610_v50 = vpop.f32.mrb[30].mxu0 }
 0x71b   :  { %v2614_v52 = vmax.f32 %v2522_v48, %v2610_v50  ;;  %v2612_v55 = vpop.f32.mrb[31].mxu0 }
 0x71d   :  { %v2615_v57 = vmax.f32 %v2614_v52, 0.0 }
 0x71f   :  { %4802 = vmatpush3.msra.mxu0 %v2615_v57 }
 0x720   :  { %4804 = vmatmul.mubr.msk.f32.vlgmr.msra.gmra.mrb[32].mxu0 %vm2108_vm7, %v2616_v59  ;;  %4806 = vmatprep.subr.bf16.mxu0 %v5509_v22 }
 0x721   :  { %4807 = vmatpush3.bf16.msra.mxu0 %v5466_v60  ;;  %4814 = vmatprep.mubr.msk.bf16.mxu0 %vm5515_vm1, %v5509_v22 }
 0x722   :  { %4808 = vmatprep.subr.bf16.mxu0 %v5509_v22 }
 0x725   :  { %4809 = vmatpush3.bf16.msra.mxu0 %v5467_v61 }
 0x726   :  { %4810 = vmatprep.subr.bf16.mxu0 %v5509_v22 }
 0x729   :  { %4811 = vmatpush3.bf16.msra.mxu0 %v5469_v62 }
 0x72a   :  { %4812 = vmatprep.subr.bf16.mxu0 %v5509_v22 }
 0x72d   :  { %4813 = vmatpush3.bf16.msra.mxu0 %v5471_v56 }
 0x72e   :  { %4818 = vmatprep.subr.bf16.mxu0 %v5509_v22 }
 0x7f3   :  { %v2686_v1 = vpop.f32.mrb[32].mxu0 }
 0x7f4   :  { %v2690_v3 = vpack.c.bf16 %v2686_v1, %v2686_v1  ;;  %v4805_v58 = vpop.f32.mrb[33].mxu0  ;;  %v5516_v1 = vmov 1  }
 0x7f5   :  { %5297 = vset.pattern.permute.xlu1 %v5516_v1 }
 0x7f6   :  { %v2709_v5 = vrot.slane %v2690_v3, 1  ;;  %v2854_v6 = vrot.slane %v2690_v3, 2  ;;  %v2932_v14 = vrot.slane %v2690_v3, 3 }
 0x7f8   :  { %4815 = vmatmul.mubr.msk.bf16.vlgmr.msra.gmra.mrb[36].mxu0 %vm2734_vm9, %v2709_v5  ;;  %4839 = vmatmul.mubr.msk.bf16.vlgmr.msra.gmra.mrb[32].mxu1 %vm2734_vm9, %v2854_v6  ;;  %v4578_v5 = vld [vmem:[%s7409_s17] ss:$0 sm:$0xff] }
 0x7f9   :  { %4819 = vmatpush3.bf16.msra.mxu0 %v5473_v4  ;;  %4826 = vmatprep.mubr.msk.bf16.mxu0 %vm5515_vm1, %v5509_v22 }
 0x7fa   :  { %4820 = vmatprep.subr.bf16.mxu0 %v5509_v22  ;;  %4886 = vmatprep.mubr.msk.f32.mxu1 %vm5515_vm1, %v5509_v22 }
 0x7fb   :  { %5167 = vmatpush3.bf16.msra.mxu1 %v5166_v17  ;;  %v5519_v17 = vmov 4  }
 0x7fc   :  { %5168 = vmatprep.subr.bf16.mxu1 %v5510_v24 }
 0x7fd   :  { %4821 = vmatpush3.bf16.msra.mxu0 %v5475_v7 }
 0x7fe   :  { %4822 = vmatprep.subr.bf16.mxu0 %v5509_v22 }
 0x801   :  { %4823 = vmatpush3.bf16.msra.mxu0 %v5476_v8 }
 0x802   :  { %4824 = vmatprep.subr.bf16.mxu0 %v5509_v22 }
 0x805   :  { %4825 = vmatpush3.bf16.msra.mxu0 %v5477_v9 }
 0x806   :  { %4842 = vmatprep.subr.bf16.mxu0 %v5509_v22 }
 0x808   :  { %4827 = vmatmul.mubr.msk.bf16.vlgmr.msra.gmra.mrb[40].mxu0 %vm2734_vm9, %v2690_v3  ;;  %v5517_v3 = vmov 1966171168  }
 0x809   :  { %4843 = vmatpush3.bf16.msra.mxu0 %v5478_v10  ;;  %4850 = vmatprep.mubr.msk.bf16.mxu0 %vm5515_vm1, %v5509_v22  ;;  %v3146_v58 = vunpack.c.l.s4 %v5517_v3 }
 0x80a   :  { %4844 = vmatprep.subr.bf16.mxu0 %v5509_v22 }
 0x80b   :  { %v3147_v4 = vunpack.c.0.s8 %v3146_v58 }
 0x80d   :  { %4845 = vmatpush3.bf16.msra.mxu0 %v5479_v11  ;;  %v3150_v6 = vsub.s32 %v3147_v4, %v6165_v47 }
 0x80e   :  { %4846 = vmatprep.subr.bf16.mxu0 %v5509_v22 }
 0x811   :  { %4847 = vmatpush3.bf16.msra.mxu0 %v5480_v12 }
 0x812   :  { %4848 = vmatprep.subr.bf16.mxu0 %v5509_v22  ;;  %v3013_v22 = vld [vmem:[%s7408_s16 + $0x18] sm:$0xff] }
 0x813   :  { %v5169_v19 = vpack.c.bf16 %v3013_v22, %v3012_v18  ;;  %v5520_v18 = vmov 5   ;;  %v5521_v22 = vmov 6  }
 0x815   :  { %4849 = vmatpush3.bf16.msra.mxu0 %v5481_v13  ;;  %5170 = vmatpush3.bf16.msra.mxu1 %v5169_v19  ;;  %v7154_v19 = vld [vmem:[%s7436_s29] sm:$0xff] }
 0x816   :  { %5171 = vmatprep.subr.bf16.mxu1 %v5510_v24  ;;  %4266 = vst.msk [vmem:[#allocation4 + $0x40] sm:$0xff] %vm1481_vm2, %v7154_v19 }
 0x818   :  { %4851 = vmatmul.mubr.msk.bf16.vlgmr.msra.gmra.mrb[44].mxu0 %vm2734_vm9, %v2932_v14 }
 0x819   :  { %5173 = vmatpush3.bf16.msra.mxu1 %v5172_v21  ;;  %4897 = vmatprep.mubr.msk.f32.mxu0 %vm1481_vm2, %v7154_v19  ;;  %v7175_v21 = vld [vmem:[%s7436_s29 + $0x18] sm:$0xff] }
 0x81a   :  { %5174 = vmatprep.subr.bf16.mxu1 %v5510_v24  ;;  %4269 = vst.msk [vmem:[#allocation4 + $0x58] sm:$0xff] %vm1481_vm2, %v7175_v21 }
 0x81d   :  { %5176 = vmatpush3.bf16.msra.mxu1 %v5175_v29  ;;  %v7198_v29 = vld [vmem:[%s7436_s29 + $0x30] sm:$0xff]  ;;  %s5524_s29 = smov [#allocation4]  }
 0x81e   :  { %5177 = vmatprep.subr.bf16.mxu1 %v5510_v24  ;;  %4272 = vst.msk [vmem:[#allocation4 + $0xb0] sm:$0xff] %vm1481_vm2, %v7198_v29  ;;  %s4279_s10 = sshll.u32 %s5524_s29, 4  ;;  %s4280_s10 = int_to_ptr.vmem [resolvable:$true] %s4279_s10 }
 0x81f   :  { %s5482_s27 = scalar_lea.vmem %s4280_s10, 3072  ;;  %p5487_p1 = scmp.lt.s32.totalorder %s4280_s10, %s4280_s10 }
 0x820   :  { %p5483_p0 = scmp.ne.s32.totalorder %s4280_s10, %s5482_s27  ;;  %p5488_p2 = scmp.lt.s32.totalorder %s5482_s27, %s5482_s27 }
 0x821   :  { %5179 = vmatpush3.bf16.msra.mxu1 %v5178_v31  ;;  %v7210_v31 = vcvt.s32.f32 %v3112_v30 }
 0x822   :  { %5180 = vmatprep.subr.bf16.mxu1 %v5510_v24  ;;  %p5489_p3 = por %p5488_p2, %p5487_p1 }
 0x823   :  { %v3123_v32 = vmul.f32 2.0, %v7210_v31 }
 0x824   :  { %p5490_p4 = pnand %p5489_p3, %p5483_p0 }
 0x825   :  { %5182 = vmatpush3.bf16.msra.mxu1 %v5181_v33  ;;  %v3124_v26 = vadd.f32 1.0, %v3123_v32 }
 0x826   :  { %5183 = vmatprep.subr.bf16.mxu1 %v5510_v24 }
 0x827   :  { %v3126_v33 = vmul.f32 0.03125, %v3124_v26 }
 0x829   :  { %5185 = vmatpush3.bf16.msra.mxu1 %v5184_v37  ;;  %v7213_v23 = vadd.f32 -1.0, %v3126_v33 }
 0x82a   :  { %5186 = vmatprep.subr.bf16.mxu1 %v5510_v24  ;;  %v4577_v24 = vld [vmem:[%s7407_s15] ss:$0 sm:$0xff] }
 0x82d   :  { %5188 = vmatpush3.bf16.msra.mxu1 %v5187_v40  ;;  %v3117_v40 = vadd.s32 16, %v6165_v47 }
 0x8cb   :  { %v2772_v42 = vpop.f32.mrb[36].mxu0  ;;  %v2916_v43 = vpop.f32.mrb[32].mxu1 }
 0x8cc   :  { %v4816_v54 = vpop.f32.mrb[37].mxu0  ;;  %v4840_v44 = vpop.f32.mrb[33].mxu1 }
 0x8cd   :  { %v2775_v34 = vpop.f32.mrb[38].mxu0  ;;  %v2919_v45 = vpop.f32.mrb[34].mxu1 }
 0x8ce   :  { %v4817_v46 = vpop.f32.mrb[39].mxu0  ;;  %v4841_v48 = vpop.f32.mrb[35].mxu1 }
 0x8cf   :  { %v7223_v46 = vcvt.s32.f32 %v6165_v47  ;;  %v7225_v48 = vcvt.s32.f32 %v3117_v40 }
 0x8db   :  { %v2839_v49 = vpop.f32.mrb[40].mxu0 }
 0x8dc   :  { %v2840_v50 = vadd.f32 %v2839_v49, %v2772_v42  ;;  %v4828_v52 = vpop.f32.mrb[41].mxu0 }
 0x8dd   :  { %v2842_v55 = vpop.f32.mrb[42].mxu0 }
 0x8de   :  { %v4829_v57 = vpop.f32.mrb[43].mxu0  ;;  %v2922_v59 = vadd.f32 %v2916_v43, %v2840_v50  ;;  %v3118_v43 = vadd.s32 24, %v6165_v47  ;;  %v3129_v55 = vmul.f32 2.0, %v7219_v41 }
 0x8e0   :  { %v7227_v52 = vcvt.s32.f32 %v3118_v43 }
 0x8eb   :  { %v2994_v60 = vpop.f32.mrb[44].mxu0 }
 0x8ec   :  { %v3000_v61 = vadd.f32 %v2994_v60, %v2922_v59  ;;  %v4852_v62 = vpop.f32.mrb[45].mxu0  ;;  %v3128_v60 = vmul.f32 2.0, %v7223_v46 }
 0x8ed   :  { %v2997_v35 = vpop.f32.mrb[46].mxu0 }
 0x8ee   :  { %v3008_v56 = vadd.f32 %v4577_v24, %v3000_v61  ;;  %v4853_v63 = vpop.f32.mrb[47].mxu0  ;;  %v3130_v24 = vmul.f32 2.0, %v7225_v48 }
 0x8ef   :  { %v3133_v63 = vadd.f32 1.0, %v3129_v55 }
 0x8f0   :  { %v3009_v0 = vmax.f32 %v3008_v56, 0.0  ;;  %v3131_v56 = vmul.f32 2.0, %v7227_v52 }
 0x8f2   :  { %4887 = vmatmul.mubr.f32.vlgmr.msra.gmra.mrb[36].mxu1 %v3009_v0 }
 0x9c5   :  { %v3099_v7 = vpop.f32.mrb[36].mxu1 }
 0x9c6   :  { %v3100_v8 = vadd.f32 %v4578_v5, %v3099_v7  ;;  %v4888_v9 = vpop.f32.mrb[37].mxu1  ;;  %v3134_v7 = vadd.f32 1.0, %v3130_v24 }
 0x9c8   :  { %v3151_v10 = vrot.slane %v3100_v8, %v3150_v6 }
 0x9ca   :  { %v3152_v11 = vcombine.high %v3151_v10, %v3151_v10  ;;  %v3159_v12 = vrot.slane %v3151_v10, %v3150_v6 }
 0x9cc   :  { %v3170_v13 = vrot.slane %v3159_v12, %v6175_v51  ;;  %v3166_v14 = vrot.slane %v3152_v11, %v3150_v6  ;;  %v3132_v6 = vadd.f32 1.0, %v3128_v60 }
 0x9ce   :  { %3186 = vperm.xlu1 %5297, %v3170_v13   ;;  %3176 = vperm.xlu0 %5296, %v3170_v13   ;;  %v3174_v15 = vrot.slane %v3166_v14, %v6175_v51  ;;  %v5522_v51 = vmov 7   ;;  %v3135_v14 = vadd.f32 1.0, %v3131_v56 }
 0x9d2   :  { %5298 = vset.pattern.permute.xlu1 %v5514_v53  ;;  %5299 = vset.pattern.permute.xlu0 %v5516_v1  ;;  %v5523_v53 = vmov 3  }
 0x9d3   :  { %3190 = vperm.xlu0 %5299, %v3174_v15   ;;  %3180 = vperm.xlu1 %5298, %v3174_v15  }
 0x9d7   :  { %5301 = vset.pattern.permute.xlu0 %v5518_v16  ;;  %5300 = vset.pattern.permute.xlu1 %v5519_v17 }
 0x9d8   :  { %3204 = vperm.xlu0 %5301, %v3170_v13   ;;  %3729 = vperm.xlu1 %5300, %v3170_v13  }
 0x9dc   :  { %5305 = vset.pattern.permute.xlu0 %v5520_v18  ;;  %5302 = vset.pattern.permute.xlu1 %v5520_v18 }
 0x9dd   :  { %3743 = vperm.xlu0 %5305, %v3174_v15   ;;  %3739 = vperm.xlu1 %5302, %v3170_v13  }
 0x9e1   :  { %5307 = vset.pattern.permute.xlu0 %v5521_v22  ;;  %5303 = vset.pattern.permute.xlu1 %v5519_v17  ;;  %v3137_v17 = vmul.f32 0.03125, %v3133_v63 }
 0x9e2   :  { %3757 = vperm.xlu0 %5307, %v3170_v13   ;;  %3733 = vperm.xlu1 %5303, %v3174_v15  }
 0x9e3   :  { %v4581_v55 = vadd.f32 -1.0, %v3137_v17 }
 0x9e6   :  { %5310 = vset.pattern.permute.xlu0 %v5522_v51  ;;  %5304 = vset.pattern.permute.xlu1 %v5518_v16 }
 0x9e7   :  { %3777 = vperm.xlu0 %5310, %v3174_v15   ;;  %3208 = vperm.xlu1 %5304, %v3174_v15  }
 0x9eb   :  { %5306 = vset.pattern.permute.xlu1 %v5523_v53  ;;  %v3138_v53 = vmul.f32 0.03125, %v3134_v7 }
 0x9ec   :  { %3220 = vperm.xlu1 %5306, %v3170_v13  }
 0x9ed   :  { %v4582_v60 = vadd.f32 -1.0, %v3138_v53 }
 0x9f0   :  { %3224 = vperm.xlu1 %5306, %v3174_v15  }
 0x9f4   :  { %5308 = vset.pattern.permute.xlu1 %v5521_v22 }
 0x9f5   :  { %3761 = vperm.xlu1 %5308, %v3174_v15  }
 0x9f9   :  { %5309 = vset.pattern.permute.xlu1 %v5522_v51 }
 0x9fa   :  { %3773 = vperm.xlu1 %5309, %v3170_v13  }
 0xa4d   :  { %v3187_v36 = vpop.permute.xlu1 %3186  ;;  %v3177_v37 = vpop.permute.xlu0 %3176 }
 0xa4e   :  { %v3183_v39 = vmul.f32 %v7213_v23, %v3177_v37 }
 0xa50   :  { %v3193_v42 = vadd.f32 %v3187_v36, %v3183_v39  ;;  %v3139_v39 = vmul.f32 0.03125, %v3135_v14 }
 0xa52   :  { %v3195_v54 = vadd.f32 1.0, %v3193_v42  ;;  %v3191_v44 = vpop.permute.xlu0 %3190  ;;  %v3181_v34 = vpop.permute.xlu1 %3180 }
 0xa53   :  { %v3184_v45 = vmul.f32 %v7213_v23, %v3181_v34 }
 0xa54   :  { %v3197_v49 = vmul.f32 32.0, %v3195_v54 }
 0xa55   :  { %v3194_v50 = vadd.f32 %v3191_v44, %v3184_v45 }
 0xa56   :  { %v4584_v57 = vadd.f32 -1.0, %v3197_v49 }
 0xa57   :  { %v3196_v59 = vadd.f32 1.0, %v3194_v50  ;;  %v7232_v61 = vpop.permute.xlu0 %3204  ;;  %v3730_v62 = vpop.permute.xlu1 %3729 }
 0xa58   :  { %v3201_v35 = vmul.f32 0.5, %v4584_v57  ;;  %v3736_v0 = vmul.f32 %v7213_v23, %v3730_v62 }
 0xa59   :  { %v3198_v47 = vmul.f32 32.0, %v3196_v59 }
 0xa5a   :  { %v3267_v1 = vsub.f32 %v3201_v35, %v7223_v46  ;;  %v3268_v3 = vsub.f32 %v3201_v35, %v7219_v41  ;;  %v3269_v58 = vsub.f32 %v3201_v35, %v7225_v48  ;;  %v3270_v4 = vsub.f32 %v3201_v35, %v7227_v52 }
 0xa5b   :  { %v4585_v5 = vadd.f32 -1.0, %v3198_v47  ;;  %v3136_v47 = vmul.f32 0.03125, %v3132_v6  ;;  %v3212_v6 = vmul.f32 %v4581_v55, %v7232_v61 }
 0xa5c   :  { %v7240_v8 = vpop.permute.xlu0 %3743  ;;  %v3740_v9 = vpop.permute.xlu1 %3739  ;;  %v3275_v10 = vand.u32 2147483647, %v3267_v1  ;;  %v3276_v11 = vand.u32 2147483647, %v3268_v3  ;;  %v3277_v12 = vand.u32 2147483647, %v3269_v58 }
 0xa5d   :  { %v3202_v13 = vmul.f32 0.5, %v4585_v5  ;;  %v7242_v15 = vadd.f32 %v3740_v9, %v3736_v0  ;;  %v3278_v16 = vand.u32 2147483647, %v3270_v4 }
 0xa5e   :  { %v3283_v18 = vsub.f32 1.0, %v3275_v10  ;;  %v3284_v22 = vsub.f32 1.0, %v3276_v11  ;;  %v3285_v51 = vsub.f32 1.0, %v3277_v12  ;;  %v7256_v10 = vadd.f32 -1.0, %v3136_v47 }
 0xa5f   :  { %v3286_v30 = vsub.f32 1.0, %v3278_v16  ;;  %v3271_v32 = vsub.f32 %v3202_v13, %v7223_v46  ;;  %v3272_v26 = vsub.f32 %v3202_v13, %v7219_v41  ;;  %v3273_v38 = vsub.f32 %v3202_v13, %v7225_v48 }
 0xa60   :  { %v3291_v33 = vmax.f32 %v3283_v18, 0.0  ;;  %v3292_v36 = vmax.f32 %v3284_v22, 0.0  ;;  %v3293_v37 = vmax.f32 %v3285_v51, 0.0  ;;  %v3274_v49 = vsub.f32 %v3202_v13, %v7227_v52 }
 0xa61   :  { %v3734_v40 = vpop.permute.xlu1 %3733  ;;  %v3294_v42 = vmax.f32 %v3286_v30, 0.0  ;;  %v3279_v43 = vand.u32 2147483647, %v3271_v32  ;;  %v3280_v54 = vand.u32 2147483647, %v3272_v26  ;;  %v7247_v44 = vpop.permute.xlu0 %3757  ;;  %v3213_v11 = vmul.f32 %v4582_v60, %v7232_v61 }
 0xa62   :  { %v7250_v34 = vmul.f32 %v7213_v23, %v3734_v40  ;;  %v5189_v45 = vpack.c.bf16 %v3292_v36, %v3291_v33  ;;  %v3281_v50 = vand.u32 2147483647, %v3273_v38  ;;  %v3282_v62 = vand.u32 2147483647, %v3274_v49 }
 0xa63   :  { %v3287_v57 = vsub.f32 1.0, %v3279_v43  ;;  %v3288_v59 = vsub.f32 1.0, %v3280_v54  ;;  %v5193_v24 = vpack.c.bf16 %v3294_v42, %v3293_v37  ;;  %v3765_v0 = vmul.f32 %v4581_v55, %v7247_v44 }
 0xa64   :  { %5190 = vmatprep.subr.bf16.mxu0 %v5189_v45  ;;  %v3289_v35 = vsub.f32 1.0, %v3281_v50  ;;  %v4583_v23 = vadd.f32 -1.0, %v3139_v39  ;;  %v3290_v3 = vsub.f32 1.0, %v3282_v62  ;;  %v3766_v58 = vmul.f32 %v4582_v60, %v7247_v44 }
 0xa65   :  { %5192 = vmatpush3.bf16.msra.mxu0 %v5189_v45  ;;  %v3295_v56 = vmax.f32 %v3287_v57, 0.0  ;;  %v3296_v63 = vmax.f32 %v3288_v59, 0.0  ;;  %v3211_v18 = vmul.f32 %v7256_v10, %v7232_v61 }
 0xa66   :  { %5194 = vmatprep.subr.bf16.mxu0 %v5193_v24  ;;  %v3209_v1 = vpop.permute.xlu1 %3208  ;;  %v3297_v5 = vmax.f32 %v3289_v35, 0.0  ;;  %v3298_v7 = vmax.f32 %v3290_v3, 0.0  ;;  %v3767_v9 = vmul.f32 %v4583_v23, %v7247_v44  ;;  %v3214_v12 = vmul.f32 %v4583_v23, %v7232_v61  ;;  %v7276_v49 = vpop.permute.xlu0 %3777 }
 0xa67   :  { %v5197_v4 = vpack.c.bf16 %v3296_v63, %v3295_v56  ;;  %v3215_v51 = vmul.f32 %v7256_v10, %v3209_v1  ;;  %v3216_v53 = vmul.f32 %v4581_v55, %v3209_v1  ;;  %v3217_v30 = vmul.f32 %v4582_v60, %v3209_v1 }
 0xa68   :  { %v5201_v17 = vpack.c.bf16 %v3298_v7, %v3297_v5  ;;  %v3218_v32 = vmul.f32 %v4583_v23, %v3209_v1 }
 0xa69   :  { %5196 = vmatpush3.bf16.msra.mxu0 %v5193_v24 }
 0xa6a   :  { %5198 = vmatprep.subr.bf16.mxu0 %v5197_v4 }
 0xa6b   :  { %v3221_v13 = vpop.permute.xlu1 %3220 }
 0xa6c   :  { %v3228_v14 = vadd.f32 %v3221_v13, %v3212_v6  ;;  %v3229_v16 = vadd.f32 %v3221_v13, %v3213_v11  ;;  %4898 = vmatmul.mubr.msk.f32.vlgmr.msra.gmra.mrb[34].mxu0 %vm1481_vm2, %v7163_v20  ;;  %v3230_v22 = vadd.f32 %v3221_v13, %v3214_v12  ;;  %v3227_v26 = vadd.f32 %v3221_v13, %v3211_v18 }
 0xa6d   :  { %5200 = vmatpush3.bf16.msra.mxu0 %v5197_v4  ;;  %4900 = vmatprep.mubr.msk.f32.mxu0 %vm1481_vm2, %v7170_v2 }
 0xa6e   :  { %5202 = vmatprep.subr.bf16.mxu0 %v5201_v17  ;;  %v3235_v39 = vadd.f32 1.0, %v3227_v26  ;;  %v3238_v26 = vadd.f32 1.0, %v3230_v22 }
 0xa6f   :  { %v3225_v33 = vpop.permute.xlu1 %3224 }
 0xa70   :  { %v3231_v36 = vadd.f32 %v3225_v33, %v3215_v51  ;;  %4901 = vmatmul.mubr.msk.f32.gmra.mrb[48].mxu0 %vm1481_vm2, %v7175_v21  ;;  %v3232_v37 = vadd.f32 %v3225_v33, %v3216_v53  ;;  %v3233_v38 = vadd.f32 %v3225_v33, %v3217_v30  ;;  %v3234_v61 = vadd.f32 %v3225_v33, %v3218_v32 }
 0xa71   :  { %5204 = vmatpush3.bf16.msra.mxu0 %v5201_v17  ;;  %4911 = vmatprep.mubr.msk.f32.mxu0 %vm1481_vm2, %v7184_v27  ;;  %v3243_v54 = vmul.f32 32.0, %v3235_v39  ;;  %v3747_v17 = vadd.f32 %v7240_v8, %v7250_v34  ;;  %v3237_v53 = vadd.f32 1.0, %v3229_v16 }
 0xa72   :  { %v3239_v40 = vadd.f32 1.0, %v3231_v36 }
 0xa73   :  { %v3749_v30 = vadd.f32 1.0, %v3747_v17  ;;  %v3245_v36 = vmul.f32 32.0, %v3237_v53 }
 0xa74   :  { %4912 = vmatmul.mubr.msk.f32.vlgmr.msra.gmra.mrb[50].mxu0 %vm1481_vm2, %v7189_v28  ;;  %v3762_v42 = vpop.permute.xlu1 %3761  ;;  %v3247_v50 = vmul.f32 32.0, %v3239_v40 }
 0xa75   :  { %4914 = vmatprep.mubr.msk.f32.mxu0 %vm1481_vm2, %v7198_v29  ;;  %v3769_v43 = vmul.f32 %v4581_v55, %v3762_v42  ;;  %v3770_v45 = vmul.f32 %v4582_v60, %v3762_v42  ;;  %v3771_v57 = vmul.f32 %v4583_v23, %v3762_v42  ;;  %v4586_v55 = vadd.f32 -1.0, %v3243_v54 }
 0xa76   :  { %v4590_v60 = vadd.f32 -1.0, %v3247_v50  ;;  %v3751_v39 = vmul.f32 32.0, %v3749_v30  ;;  %v3241_v50 = vadd.f32 1.0, %v3233_v38 }
 0xa77   :  { %v7281_v59 = vadd.f32 %v7276_v49, %v3769_v43  ;;  %v7284_v62 = vadd.f32 %v7276_v49, %v3770_v45  ;;  %v7287_v35 = vadd.f32 %v7276_v49, %v3771_v57  ;;  %v3259_v23 = vmul.f32 0.5, %v4586_v55 }
 0xa78   :  { %4915 = vmatmul.mubr.msk.f32.gmra.mrb[52].mxu0 %vm1481_vm2, %v7203_v25  ;;  %v3263_v1 = vmul.f32 0.5, %v4590_v60  ;;  %v3246_v43 = vmul.f32 32.0, %v3238_v26  ;;  %v3240_v45 = vadd.f32 1.0, %v3232_v37  ;;  %v4611_v34 = vadd.f32 -1.0, %v3751_v39 }
 0xa79   :  { %v3774_v24 = vpop.permute.xlu1 %3773  ;;  %v3299_v3 = vsub.f32 %v3259_v23, %v7210_v31  ;;  %v3242_v57 = vadd.f32 1.0, %v3234_v61  ;;  %v3768_v37 = vmul.f32 %v7256_v10, %v3762_v42 }
 0xa7a   :  { %v7289_v47 = vadd.f32 %v3774_v24, %v3765_v0  ;;  %v7291_v56 = vadd.f32 %v3774_v24, %v3766_v58  ;;  %v7293_v63 = vadd.f32 %v3774_v24, %v3767_v9  ;;  %v3303_v4 = vsub.f32 %v3263_v1, %v7210_v31 }
 0xa7b   :  { %v3307_v5 = vand.u32 2147483647, %v3299_v3  ;;  %v3748_v0 = vadd.f32 1.0, %v7242_v15  ;;  %v3236_v9 = vadd.f32 1.0, %v3228_v14  ;;  %v3764_v15 = vmul.f32 %v7256_v10, %v7247_v44 }
 0xa7c   :  { %v3311_v7 = vand.u32 2147483647, %v3303_v4  ;;  %v4588_v14 = vadd.f32 -1.0, %v3245_v36  ;;  %v4589_v60 = vadd.f32 -1.0, %v3246_v43  ;;  %v3248_v1 = vmul.f32 32.0, %v3240_v45 }
 0xa7d   :  { %v3315_v6 = vsub.f32 1.0, %v3307_v5  ;;  %v3750_v58 = vmul.f32 32.0, %v3748_v0  ;;  %v3244_v51 = vmul.f32 32.0, %v3236_v9  ;;  %v3780_v16 = vadd.f32 %v3774_v24, %v3764_v15 }
 0xa7e   :  { %v3319_v11 = vsub.f32 1.0, %v3311_v7  ;;  %v3261_v3 = vmul.f32 0.5, %v4588_v14  ;;  %v3249_v4 = vmul.f32 32.0, %v3241_v50  ;;  %v3755_v44 = vmul.f32 0.5, %v4611_v34 }
 0xa7f   :  { %v3323_v12 = vmax.f32 %v3315_v6, 0.0  ;;  %v4610_v18 = vadd.f32 -1.0, %v3750_v58  ;;  %v4587_v33 = vadd.f32 -1.0, %v3244_v51  ;;  %v3788_v7 = vadd.f32 1.0, %v3780_v16 }
 0xa80   :  { %v3327_v13 = vmax.f32 %v3319_v11, 0.0  ;;  %v3250_v38 = vmul.f32 32.0, %v3242_v57  ;;  %v3262_v61 = vmul.f32 0.5, %v4589_v60  ;;  %v4592_v0 = vadd.f32 -1.0, %v3249_v4 }
 0xa81   :  { %4925 = vmatprep.mubr.msk.f32.mxu0 %vm1481_vm2, %v3323_v12  ;;  %v3754_v32 = vmul.f32 0.5, %v4610_v18  ;;  %v3260_v54 = vmul.f32 0.5, %v4587_v33  ;;  %v3784_v58 = vadd.f32 %v7276_v49, %v3768_v37  ;;  %v3301_v17 = vsub.f32 %v3261_v3, %v7210_v31 }
 0xa82   :  { %4939 = vmatprep.mubr.msk.f32.mxu1 %vm1481_vm2, %v3327_v13  ;;  %v4591_v13 = vadd.f32 -1.0, %v3248_v1  ;;  %v3796_v18 = vmul.f32 32.0, %v3788_v7  ;;  %v3824_v10 = vsub.f32 %v3755_v44, %v7223_v46  ;;  %v3825_v42 = vsub.f32 %v3755_v44, %v7219_v41 }
 0xa83   :  { %v3820_v40 = vsub.f32 %v3754_v32, %v7223_v46  ;;  %v3821_v8 = vsub.f32 %v3754_v32, %v7219_v41  ;;  %v3822_v22 = vsub.f32 %v3754_v32, %v7225_v48  ;;  %v3300_v23 = vsub.f32 %v3260_v54, %v7210_v31 }
 0xa84   :  { %v3823_v11 = vsub.f32 %v3754_v32, %v7227_v52  ;;  %v4593_v53 = vadd.f32 -1.0, %v3250_v38  ;;  %v3264_v39 = vmul.f32 0.5, %v4591_v13  ;;  %v3302_v43 = vsub.f32 %v3262_v61, %v7210_v31 }
 0xa85   :  { %v3828_v55 = vand.u32 2147483647, %v3820_v40  ;;  %v3829_v5 = vand.u32 2147483647, %v3821_v8  ;;  %v3830_v24 = vand.u32 2147483647, %v3822_v22  ;;  %v3826_v57 = vsub.f32 %v3755_v44, %v7225_v48 }
 0xa86   :  { %v3308_v12 = vand.u32 2147483647, %v3300_v23  ;;  %v3831_v32 = vand.u32 2147483647, %v3823_v11  ;;  %v3265_v49 = vmul.f32 0.5, %v4592_v0  ;;  %v3792_v54 = vadd.f32 1.0, %v3784_v58 }
 0xa87   :  { %v3836_v6 = vsub.f32 1.0, %v3828_v55  ;;  %v3837_v9 = vsub.f32 1.0, %v3829_v5  ;;  %v3838_v33 = vsub.f32 1.0, %v3830_v24  ;;  %v3309_v15 = vand.u32 2147483647, %v3301_v17 }
 0xa88   :  { %v3316_v36 = vsub.f32 1.0, %v3308_v12  ;;  %v4612_v14 = vadd.f32 -1.0, %v3796_v18  ;;  %v3832_v46 = vand.u32 2147483647, %v3824_v10  ;;  %v3833_v8 = vand.u32 2147483647, %v3825_v42 }
 0xa89   :  { %v3844_v26 = vmax.f32 %v3836_v6, 0.0  ;;  %v3845_v45 = vmax.f32 %v3837_v9, 0.0  ;;  %v3266_v41 = vmul.f32 0.5, %v4593_v53  ;;  %v3839_v16 = vsub.f32 1.0, %v3831_v32 }
 0xa8a   :  { %v3827_v55 = vsub.f32 %v3755_v44, %v7227_v52  ;;  %v3324_v22 = vmax.f32 %v3316_v36, 0.0  ;;  %v3304_v60 = vsub.f32 %v3264_v39, %v7210_v31  ;;  %v3310_v1 = vand.u32 2147483647, %v3302_v43 }
 0xa8b   :  { %v3800_v3 = vmul.f32 32.0, %v3792_v54  ;;  %v5221_v4 = vpack.c.bf16 %v3845_v45, %v3844_v26  ;;  %v3317_v37 = vsub.f32 1.0, %v3309_v15  ;;  %v3305_v5 = vsub.f32 %v3265_v49, %v7210_v31 }
 0xa8c   :  { %v3812_v7 = vmul.f32 0.5, %v4612_v14  ;;  %v3846_v6 = vmax.f32 %v3838_v33, 0.0  ;;  %v3840_v11 = vsub.f32 1.0, %v3832_v46  ;;  %v3841_v24 = vsub.f32 1.0, %v3833_v8 }
 0xa8d   :  { %v3847_v48 = vmax.f32 %v3839_v16, 0.0  ;;  %v3834_v52 = vand.u32 2147483647, %v3826_v57  ;;  %v3835_v44 = vand.u32 2147483647, %v3827_v55  ;;  %v3318_v0 = vsub.f32 1.0, %v3310_v1 }
 0xa8e   :  { %v3312_v12 = vand.u32 2147483647, %v3304_v60  ;;  %v3306_v58 = vsub.f32 %v3266_v41, %v7210_v31  ;;  %v3325_v9 = vmax.f32 %v3317_v37, 0.0  ;;  %v3313_v17 = vand.u32 2147483647, %v3305_v5 }
 0xa8f   :  { %v4616_v18 = vadd.f32 -1.0, %v3800_v3  ;;  %v3848_v42 = vmax.f32 %v3840_v11, 0.0  ;;  %v3849_v53 = vmax.f32 %v3841_v24, 0.0  ;;  %v5225_v26 = vpack.c.bf16 %v3847_v48, %v3846_v6 }
 0xa90   :  { %v3842_v32 = vsub.f32 1.0, %v3834_v52  ;;  %v3843_v33 = vsub.f32 1.0, %v3835_v44  ;;  %v3320_v36 = vsub.f32 1.0, %v3312_v12  ;;  %v3314_v43 = vand.u32 2147483647, %v3306_v58 }
 0xa91   :  { %v3321_v49 = vsub.f32 1.0, %v3313_v17  ;;  %v3816_v54 = vmul.f32 0.5, %v4616_v18  ;;  %v5229_v15 = vpack.c.bf16 %v3849_v53, %v3848_v42  ;;  %v3791_v60 = vadd.f32 1.0, %v7293_v63 }
 0xa92   :  { %v3850_v14 = vmax.f32 %v3842_v32, 0.0  ;;  %v3328_v46 = vmax.f32 %v3320_v36, 0.0  ;;  %v3322_v8 = vsub.f32 1.0, %v3314_v43  ;;  %v3793_v3 = vadd.f32 1.0, %v7281_v59 }
 0xa93   :  { %v3329_v41 = vmax.f32 %v3321_v49, 0.0  ;;  %v3856_v16 = vsub.f32 %v3816_v54, %v7210_v31 }
 0xb3f   :  { %v4899_v51 = vpop.f32.mrb[34].mxu0 }
 0xb40   :  { %v3410_v30 = vpop.f32.mrb[35].mxu0 }
 0xb41   :  { %v5205_v40 = vpack.c.bf16 %v4899_v51, %v3410_v30  ;;  %v3852_v51 = vsub.f32 %v3812_v7, %v7210_v31  ;;  %v3801_v7 = vmul.f32 32.0, %v3793_v3 }
 0xb43   :  { %v4902_v50 = vpop.f32.mrb[48].mxu0  ;;  %5206 = vmatprep.subr.bf16.mxu0 %v5205_v40  ;;  %v3860_v45 = vand.u32 2147483647, %v3852_v51  ;;  %v4617_v24 = vadd.f32 -1.0, %v3801_v7 }
 0xb44   :  { %v3420_v34 = vpop.f32.mrb[49].mxu0  ;;  %5208 = vmatpush3.bf16.msra.mxu0 %v5205_v40  ;;  %v3326_v40 = vmax.f32 %v3318_v0, 0.0 }
 0xb45   :  { %v5209_v23 = vpack.c.bf16 %v4902_v50, %v3420_v34  ;;  %v3851_v50 = vmax.f32 %v3843_v33, 0.0  ;;  %v3868_v34 = vsub.f32 1.0, %v3860_v45  ;;  %v3817_v0 = vmul.f32 0.5, %v4617_v24 }
 0xb47   :  { %v4913_v38 = vpop.f32.mrb[50].mxu0  ;;  %5210 = vmatprep.subr.bf16.mxu0 %v5209_v23  ;;  %v5233_v57 = vpack.c.bf16 %v3851_v50, %v3850_v14  ;;  %v3876_v55 = vmax.f32 %v3868_v34, 0.0  ;;  %v3857_v32 = vsub.f32 %v3817_v0, %v7210_v31 }
 0xb48   :  { %v3507_v61 = vpop.f32.mrb[51].mxu0  ;;  %5212 = vmatpush3.bf16.msra.mxu0 %v5209_v23 }
 0xb49   :  { %v5213_v13 = vpack.c.bf16 %v4913_v38, %v3507_v61  ;;  %5222 = vmatprep.subr.bf16.mxu0 %v5221_v4 }
 0xb4b   :  { %v4916_v10 = vpop.f32.mrb[52].mxu0  ;;  %4926 = vmatmul.mubr.msk.f32.vlgmr.msra.gmra.mrb[54].mxu0 %vm1481_vm2, %v3324_v22  ;;  %5214 = vmatprep.subr.bf16.mxu1 %v5213_v13  ;;  %v3864_v22 = vand.u32 2147483647, %v3856_v16 }
 0xb4c   :  { %v3517_v30 = vpop.f32.mrb[53].mxu0  ;;  %4928 = vmatprep.mubr.msk.f32.mxu0 %vm1481_vm2, %v3325_v9  ;;  %5216 = vmatpush3.bf16.msra.mxu1 %v5213_v13 }
 0xb4d   :  { %v5217_v39 = vpack.c.bf16 %v4916_v10, %v3517_v30  ;;  %5224 = vmatpush3.bf16.msra.mxu0 %v5221_v4 }
 0xb4e   :  { %5226 = vmatprep.subr.bf16.mxu0 %v5225_v26 }
 0xb4f   :  { %4929 = vmatmul.mubr.msk.f32.gmra.mrb[56].mxu0 %vm1481_vm2, %v3326_v40  ;;  %5218 = vmatprep.subr.bf16.mxu1 %v5217_v39 }
 0xb50   :  { %5220 = vmatpush3.bf16.msra.mxu1 %v5217_v39  ;;  %4953 = vmatprep.mubr.msk.f32.mxu0 %vm1481_vm2, %v7154_v19  ;;  %v3330_v19 = vmax.f32 %v3322_v8, 0.0 }
 0xb51   :  { %5228 = vmatpush3.bf16.msra.mxu0 %v5225_v26  ;;  %5230 = vmatprep.subr.bf16.mxu1 %v5229_v15 }
 0xb53   :  { %4940 = vmatmul.mubr.msk.f32.vlgmr.msra.gmra.mrb[38].mxu1 %vm1481_vm2, %v3328_v46 }
 0xb54   :  { %4954 = vmatmul.mubr.msk.f32.vlgmr.msra.gmra.mrb[58].mxu0 %vm1481_vm2, %v7163_v20  ;;  %4942 = vmatprep.mubr.msk.f32.mxu1 %vm1481_vm2, %v3329_v41  ;;  %v3872_v20 = vsub.f32 1.0, %v3864_v22 }
 0xb55   :  { %5232 = vmatpush3.bf16.msra.mxu1 %v5229_v15  ;;  %4956 = vmatprep.mubr.msk.f32.mxu0 %vm1481_vm2, %v7170_v2  ;;  %v3865_v15 = vand.u32 2147483647, %v3857_v32 }
 0xb56   :  { %5234 = vmatprep.subr.bf16.mxu1 %v5233_v57  ;;  %v3880_v2 = vmax.f32 %v3872_v20, 0.0 }
 0xb57   :  { %4943 = vmatmul.mubr.msk.f32.gmra.mrb[40].mxu1 %vm1481_vm2, %v3330_v19 }
 0xb58   :  { %4957 = vmatmul.mubr.msk.f32.gmra.mrb[60].mxu0 %vm1481_vm2, %v7175_v21  ;;  %4967 = vmatprep.mubr.msk.f32.mxu1 %vm1481_vm2, %v7184_v27  ;;  %v3789_v21 = vadd.f32 1.0, %v7289_v47  ;;  %v3790_v27 = vadd.f32 1.0, %v7291_v56  ;;  %v3795_v47 = vadd.f32 1.0, %v7287_v35 }
 0xb59   :  { %5236 = vmatpush3.bf16.msra.mxu1 %v5233_v57  ;;  %4981 = vmatprep.mubr.msk.f32.mxu0 %vm1481_vm2, %v3876_v55  ;;  %v3873_v55 = vsub.f32 1.0, %v3865_v15 }
 0xb5a   :  { %v3797_v23 = vmul.f32 32.0, %v3789_v21  ;;  %v3798_v1 = vmul.f32 32.0, %v3790_v27 }
 0xb5c   :  { %4968 = vmatmul.mubr.msk.f32.vlgmr.msra.gmra.mrb[42].mxu1 %vm1481_vm2, %v7189_v28  ;;  %v3799_v28 = vmul.f32 32.0, %v3791_v60  ;;  %v4613_v4 = vadd.f32 -1.0, %v3797_v23  ;;  %v4614_v37 = vadd.f32 -1.0, %v3798_v1 }
 0xb5d   :  { %4970 = vmatprep.mubr.msk.f32.mxu1 %vm1481_vm2, %v7198_v29  ;;  %v3794_v29 = vadd.f32 1.0, %v7284_v62  ;;  %v3803_v62 = vmul.f32 32.0, %v3795_v47 }
 0xb5e   :  { %v4615_v56 = vadd.f32 -1.0, %v3799_v28  ;;  %v3813_v63 = vmul.f32 0.5, %v4613_v4  ;;  %v3814_v6 = vmul.f32 0.5, %v4614_v37 }
 0xb5f   :  { %v3802_v38 = vmul.f32 32.0, %v3794_v29  ;;  %v4619_v9 = vadd.f32 -1.0, %v3803_v62 }
 0xb60   :  { %4971 = vmatmul.mubr.msk.f32.gmra.mrb[44].mxu1 %vm1481_vm2, %v7203_v25  ;;  %v3815_v61 = vmul.f32 0.5, %v4615_v56  ;;  %v3853_v48 = vsub.f32 %v3813_v63, %v7210_v31  ;;  %v3854_v44 = vsub.f32 %v3814_v6, %v7210_v31 }
 0xb61   :  { %4995 = vmatprep.mubr.msk.f32.mxu1 %vm1481_vm2, %v3880_v2  ;;  %v4618_v52 = vadd.f32 -1.0, %v3802_v38  ;;  %v3819_v36 = vmul.f32 0.5, %v4619_v9 }
 0xb62   :  { %v3855_v17 = vsub.f32 %v3815_v61, %v7210_v31  ;;  %v3861_v18 = vand.u32 2147483647, %v3853_v48  ;;  %v3862_v42 = vand.u32 2147483647, %v3854_v44 }
 0xb63   :  { %v3818_v10 = vmul.f32 0.5, %v4618_v52  ;;  %v3859_v41 = vsub.f32 %v3819_v36, %v7210_v31 }
 0xb64   :  { %v3863_v39 = vand.u32 2147483647, %v3855_v17  ;;  %v3869_v40 = vsub.f32 1.0, %v3861_v18  ;;  %v3870_v49 = vsub.f32 1.0, %v3862_v42 }
 0xb65   :  { %v3858_v54 = vsub.f32 %v3818_v10, %v7210_v31  ;;  %v3867_v2 = vand.u32 2147483647, %v3859_v41  ;;  %v3881_v31 = vmax.f32 %v3873_v55, 0.0 }
 0xb66   :  { %v3877_v50 = vmax.f32 %v3869_v40, 0.0  ;;  %v3871_v8 = vsub.f32 1.0, %v3863_v39  ;;  %v3878_v34 = vmax.f32 %v3870_v49, 0.0 }
 0xb67   :  { %v3866_v16 = vand.u32 2147483647, %v3858_v54  ;;  %v3875_v27 = vsub.f32 1.0, %v3867_v2 }
 0xb68   :  { %v3879_v20 = vmax.f32 %v3871_v8, 0.0 }
 0xb69   :  { %v3874_v21 = vsub.f32 1.0, %v3866_v16  ;;  %v3883_v23 = vmax.f32 %v3875_v27, 0.0 }
 0xb6b   :  { %v3882_v60 = vmax.f32 %v3874_v21, 0.0 }
 0xc1e   :  { %v4927_v5 = vpop.f32.mrb[54].mxu0 }
 0xc1f   :  { %3721 = vst.msk [vmem:[#allocation4 + $0x8] sm:$0xff] %vm1481_vm2, %v4927_v5  ;;  %v3604_v25 = vpop.f32.mrb[55].mxu0 }
 0xc20   :  { %3720 = vst.msk [vmem:[#allocation4] sm:$0xff] %vm1481_vm2, %v3604_v25 }
 0xc22   :  { %v4930_v11 = vpop.f32.mrb[56].mxu0 }
 0xc23   :  { %3723 = vst.msk [vmem:[#allocation4 + $0x18] sm:$0xff] %vm1481_vm2, %v4930_v11  ;;  %v3614_v59 = vpop.f32.mrb[57].mxu0 }
 0xc24   :  { %3722 = vst.msk [vmem:[#allocation4 + $0x10] sm:$0xff] %vm1481_vm2, %v3614_v59 }
 0xc26   :  { %v4941_v12 = vpop.f32.mrb[38].mxu1 }
 0xc27   :  { %3725 = vst.msk [vmem:[#allocation4 + $0x68] sm:$0xff] %vm1481_vm2, %v4941_v12  ;;  %v4955_v35 = vpop.f32.mrb[58].mxu0  ;;  %v3701_v13 = vpop.f32.mrb[39].mxu1 }
 0xc28   :  { %3724 = vst.msk [vmem:[#allocation4 + $0x60] sm:$0xff] %vm1481_vm2, %v3701_v13  ;;  %v3950_v58 = vpop.f32.mrb[59].mxu0 }
 0xc29   :  { %v5237_v51 = vpack.c.bf16 %v4955_v35, %v3950_v58 }
 0xc2a   :  { %v4944_v53 = vpop.f32.mrb[40].mxu1 }
 0xc2b   :  { %3727 = vst.msk [vmem:[#allocation4 + $0x78] sm:$0xff] %vm1481_vm2, %v4944_v53  ;;  %v4958_v30 = vpop.f32.mrb[60].mxu0  ;;  %5238 = vmatprep.subr.bf16.mxu0 %v5237_v51  ;;  %v3711_v26 = vpop.f32.mrb[41].mxu1 }
 0xc2c   :  { %3726 = vst.msk [vmem:[#allocation4 + $0x70] sm:$0xff] %vm1481_vm2, %v3711_v26  ;;  %v3960_v33 = vpop.f32.mrb[61].mxu0  ;;  %5240 = vmatpush3.bf16.msra.mxu0 %v5237_v51 }
 0xc2d   :  { %v5241_v43 = vpack.c.bf16 %v4958_v30, %v3960_v33 }
 0xc2f   :  { %v4969_v45 = vpop.f32.mrb[42].mxu1  ;;  %5242 = vmatprep.subr.bf16.mxu0 %v5241_v43 }
 0xc30   :  { %v4035_v14 = vpop.f32.mrb[43].mxu1  ;;  %5244 = vmatpush3.bf16.msra.mxu0 %v5241_v43 }
 0xc31   :  { %v5245_v46 = vpack.c.bf16 %v4969_v45, %v4035_v14 }
 0xc33   :  { %v4972_v57 = vpop.f32.mrb[44].mxu1  ;;  %4982 = vmatmul.mubr.msk.f32.vlgmr.msra.gmra.mrb[62].mxu0 %vm1481_vm2, %v3877_v50  ;;  %5246 = vmatprep.subr.bf16.mxu1 %v5245_v46 }
 0xc34   :  { %v4045_v19 = vpop.f32.mrb[45].mxu1  ;;  %4984 = vmatprep.mubr.msk.f32.mxu0 %vm1481_vm2, %v3878_v34  ;;  %5248 = vmatpush3.bf16.msra.mxu1 %v5245_v46 }
 0xc35   :  { %v5249_v22 = vpack.c.bf16 %v4972_v57, %v4045_v19 }
 0xc37   :  { %4985 = vmatmul.mubr.msk.f32.gmra.mrb[64].mxu0 %vm1481_vm2, %v3879_v20  ;;  %5250 = vmatprep.subr.bf16.mxu1 %v5249_v22 }
 0xc38   :  { %5252 = vmatpush3.bf16.msra.mxu1 %v5249_v22 }
 0xc3b   :  { %4996 = vmatmul.mubr.msk.f32.vlgmr.msra.gmra.mrb[46].mxu1 %vm1481_vm2, %v3881_v31 }
 0xc3c   :  { %4998 = vmatprep.mubr.msk.f32.mxu1 %vm1481_vm2, %v3882_v60 }
 0xc3f   :  { %4999 = vmatmul.mubr.msk.f32.gmra.mrb[48].mxu1 %vm1481_vm2, %v3883_v23 }
 0xd06   :  { %v4983_v1 = vpop.f32.mrb[62].mxu0 }
 0xd07   :  { %4250 = vst.msk [vmem:[#allocation4 + $0x28] sm:$0xff] %vm1481_vm2, %v4983_v1  ;;  %v4132_v3 = vpop.f32.mrb[63].mxu0 }
 0xd08   :  { %4249 = vst.msk [vmem:[#allocation4 + $0x20] sm:$0xff] %vm1481_vm2, %v4132_v3 }
 0xd0a   :  { %v4986_v28 = vpop.f32.mrb[64].mxu0 }
 0xd0b   :  { %4252 = vst.msk [vmem:[#allocation4 + $0x38] sm:$0xff] %vm1481_vm2, %v4986_v28  ;;  %v4142_v4 = vpop.f32.mrb[65].mxu0 }
 0xd0c   :  { %4251 = vst.msk [vmem:[#allocation4 + $0x30] sm:$0xff] %vm1481_vm2, %v4142_v4 }
 0xd0e   :  { %v4997_v29 = vpop.f32.mrb[46].mxu1 }
 0xd0f   :  { %4254 = vst.msk [vmem:[#allocation4 + $0x88] sm:$0xff] %vm1481_vm2, %v4997_v29  ;;  %v4229_v37 = vpop.f32.mrb[47].mxu1 }
 0xd10   :  { %4253 = vst.msk [vmem:[#allocation4 + $0x80] sm:$0xff] %vm1481_vm2, %v4229_v37 }
 0xd12   :  { %v5000_v5 = vpop.f32.mrb[48].mxu1 }
 0xd13   :  { %4256 = vst.msk [vmem:[#allocation4 + $0x98] sm:$0xff] %vm1481_vm2, %v5000_v5  ;;  %v4239_v25 = vpop.f32.mrb[49].mxu1 }
 0xd14   :  { %4255 = vst.msk [vmem:[#allocation4 + $0x90] sm:$0xff] %vm1481_vm2, %v4239_v25 }
 0xd15   :  { %5493 = shalt.err (!%p5490_p4)
}
 0xd16   :  { %s5494_s25 = scalar_lea.hbm %s7410_s18, 3072 }
 0xd17   :  { %p5495_p5 = scmp.ne.s32.totalorder %s7410_s18, %s5494_s25  ;;  %p5498_p6 = scmp.lt.u32.totalorder %s5494_s25, %s7410_s18 }
 0xd19   :  { %p5500_p7 = pnand %p5498_p6, %p5495_p5 }
 0xd1b   :  { %5503 = shalt.err (!%p5500_p7)
}
 0xd1c   :  { %s5525_s16 = smov 128   ;;  %s5526_s14 = smov 8  }
 0xd1d   :  { %4285 = dma.vmem_to_hbm [thread:$0]  %s4280_s10, 3072, %s7410_s18, [#allocation5], %s5525_s16, %s5525_s16, %s5526_s14  }
 0xd1e   :  { %5504 = dma.done.wait [#allocation5], 3072  }
 0xd1f   :  { %5505 = vsyncadd [#allocation5], 4294964224 }
 0xd20   :  { %4289 = vsyncpa [#allocation5], 1 }

</bundles_post_ra>
